<compile_context>
chip_gen: v7x
topology: tpu7x:2x2x1
jax: 0.10.0
libtpu: 0.0.40
codegen_flags: <defaults>
</compile_context>

<pallas_src>
import functools

import jax
import jax.numpy as jnp
from jax import lax
from jax.experimental import pallas as pl
from jax.experimental.pallas import tpu as pltpu


# ----------------------------------------------------------------------------
# Kernel 1: conv-as-matmul (channel-major),  out = LeakyReLU(W @ patches + b)
#   W: (C_out, K) bf16   b: (C_out, 1) f32   patches: (K, N) bf16
#   out: (C_out, N) bf16,  N = B*OH*OW tiled along the lane axis.
# ----------------------------------------------------------------------------
def _conv_mm_kernel(w_ref, b_ref, p_ref, o_ref):
    y = jnp.dot(w_ref[...], p_ref[...], preferred_element_type=jnp.float32)
    y = y + b_ref[...]                                  # (C_out, 1) broadcast
    o_ref[...] = jnp.where(y >= 0, y, 0.01 * y).astype(o_ref.dtype)


def conv_matmul(w, b, p, *, max_tile_n=1024):
    c_out, k = w.shape
    _, n = p.shape
    tn = n if n <= max_tile_n else max_tile_n           # full block at tiny B
    return pl.pallas_call(
        _conv_mm_kernel,
        out_shape=jax.ShapeDtypeStruct((c_out, n), jnp.bfloat16),
        grid=(pl.cdiv(n, tn),),
        in_specs=[
            pl.BlockSpec((c_out, k), lambda i: (0, 0)),   # weights stay resident
            pl.BlockSpec((c_out, 1), lambda i: (0, 0)),
            pl.BlockSpec((k, tn), lambda i: (0, i)),
        ],
        out_specs=pl.BlockSpec((c_out, tn), lambda i: (0, i)),
        compiler_params=pltpu.CompilerParams(
            dimension_semantics=("parallel",),
            vmem_limit_bytes=32 * 1024 * 1024),
    )(w, b, p)


# ----------------------------------------------------------------------------
# Kernel 2: conv3, batch-major.  Per batch element:
#   out_b = LeakyReLU(W3 (64,576) @ patches_b (576,49) + b3)  -> (64, 49)
# Output (B, 64, 49) flattens to PyTorch x.reshape(-1, 3136) order for free.
# ----------------------------------------------------------------------------
def _conv3_kernel(w_ref, b_ref, p_ref, o_ref):
    y = jnp.dot(w_ref[...], p_ref[...], preferred_element_type=jnp.float32)
    y = y + b_ref[...]
    o_ref[...] = jnp.where(y >= 0, y, 0.01 * y).astype(o_ref.dtype)


def conv3_batch_major(w, b, p):
    bsz, k, ohw = p.shape
    c_out = w.shape[0]
    return pl.pallas_call(
        _conv3_kernel,
        out_shape=jax.ShapeDtypeStruct((bsz, c_out, ohw), jnp.bfloat16),
        grid=(bsz,),
        in_specs=[
            pl.BlockSpec((c_out, k), lambda bi: (0, 0)),
            pl.BlockSpec((c_out, 1), lambda bi: (0, 0)),
            pl.BlockSpec((None, k, ohw), lambda bi: (bi, 0, 0)),
        ],
        out_specs=pl.BlockSpec((None, c_out, ohw), lambda bi: (bi, 0, 0)),
        compiler_params=pltpu.CompilerParams(
            dimension_semantics=("parallel",),
            vmem_limit_bytes=32 * 1024 * 1024),
    )(w, b, p)


# ----------------------------------------------------------------------------
# Kernel 3: fused FC head stack.
#   grid axis 0: 0 = actor (fc1+LeakyReLU+fc2+masked softmax, exact normalize)
#                1 = critic (fc1+LeakyReLU+fc2)
#   fc1 AND fc2 weights are bf16 (f32 accumulation); feat arrives already bf16.
# ----------------------------------------------------------------------------
def _head_kernel(x_ref, w1_ref, b1_ref, w2_ref, b2_ref, o_ref, *, a_dim):
    x = x_ref[...]                                               # (B, 3136) bf16
    h = jnp.dot(x, w1_ref[...],
                preferred_element_type=jnp.float32) + b1_ref[...]
    h = jnp.where(h >= 0, h, 0.01 * h)                           # (B, 512) f32
    y = jnp.dot(h.astype(jnp.bfloat16), w2_ref[...],
                preferred_element_type=jnp.float32) + b2_ref[...]  # (B, 128) f32

    is_actor = pl.program_id(0) == 0

    @pl.when(is_actor)
    def _():
        lane = lax.broadcasted_iota(jnp.int32, y.shape, 1)
        ym = jnp.where(lane < a_dim, y, -jnp.inf)                # mask padded lanes
        m = jnp.max(ym, axis=-1, keepdims=True)
        e = jnp.exp(ym - m)
        o_ref[...] = e / jnp.sum(e, axis=-1, keepdims=True)      # exact softmax

    @pl.when(jnp.logical_not(is_actor))
    def _():
        o_ref[...] = y


def head_forward(feat, hw1, hb1, hw2, hb2, *, a_dim):
    b, kin = feat.shape
    return pl.pallas_call(
        functools.partial(_head_kernel, a_dim=a_dim),
        out_shape=jax.ShapeDtypeStruct((2, b, 128), jnp.float32),
        grid=(2,),
        in_specs=[
            pl.BlockSpec((b, kin), lambda h: (0, 0)),
            pl.BlockSpec((None, kin, 512), lambda h: (h, 0, 0)),   # bf16 fc1 weights
            pl.BlockSpec((None, 1, 512), lambda h: (h, 0, 0)),
            pl.BlockSpec((None, 512, 128), lambda h: (h, 0, 0)),   # bf16 fc2 weights
            pl.BlockSpec((None, 1, 128), lambda h: (h, 0, 0)),
        ],
        out_specs=pl.BlockSpec((None, b, 128), lambda h: (h, 0, 0)),
        compiler_params=pltpu.CompilerParams(
            dimension_semantics=("parallel",),        # v7x: one head per TensorCore
            vmem_limit_bytes=32 * 1024 * 1024),
    )(feat, hw1, hb1, hw2, hb2)


# ----------------------------------------------------------------------------
# Parameters (deterministic synthetic init, PyTorch layouts -> kernel layouts)
# ----------------------------------------------------------------------------
def make_params(key, a_dim):
    assert a_dim <= 128
    ks = jax.random.split(key, 14)

    def nrm(k, shape, scale=0.05):
        return scale * jax.random.normal(k, shape, dtype=jnp.float32)

    # "PyTorch module state"
    cw1 = nrm(ks[0], (32, 4, 8, 8));   cb1 = nrm(ks[1], (32,))
    cw2 = nrm(ks[2], (64, 32, 4, 4));  cb2 = nrm(ks[3], (64,))
    cw3 = nrm(ks[4], (64, 64, 3, 3));  cb3 = nrm(ks[5], (64,))
    aw1 = nrm(ks[6], (512, 3136));     ab1 = nrm(ks[7], (512,))
    aw2 = nrm(ks[8], (a_dim, 512));    ab2 = nrm(ks[9], (a_dim,))
    vw1 = nrm(ks[10], (512, 3136));    vb1 = nrm(ks[11], (512,))
    vw2 = nrm(ks[12], (1, 512));       vb2 = nrm(ks[13], (1,))

    bf16 = jnp.bfloat16
    pad_a = 128 - a_dim
    kernel_params = dict(
        # conv weights in bf16 (feature order (c_in, kh, kw) matches patches)
        w1=cw1.reshape(32, -1).astype(bf16), b1=cb1.reshape(32, 1),
        w2=cw2.reshape(64, -1).astype(bf16), b2=cb2.reshape(64, 1),
        w3=cw3.reshape(64, -1).astype(bf16), b3=cb3.reshape(64, 1),
        # FC heads: fc1 and fc2 weights bf16, biases f32
        hw1=jnp.stack([aw1.T, vw1.T]).astype(bf16),                # (2, 3136, 512)
        hb1=jnp.stack([ab1, vb1]).reshape(2, 1, 512),
        hw2=jnp.stack([jnp.pad(aw2.T, ((0, 0), (0, pad_a))),
                       jnp.pad(vw2.T, ((0, 0), (0, 127)))]).astype(bf16),  # (2,512,128)
        hb2=jnp.stack([jnp.pad(ab2, (0, pad_a)),
                       jnp.pad(vb2, (0, 127))]).reshape(2, 1, 128),
    )

    # Reference uses the same bf16-rounded weights (cast back to f32).
    rnd = lambda t: t.astype(bf16).astype(jnp.float32)
    ref_params = dict(cw1=rnd(cw1), cb1=cb1, cw2=rnd(cw2), cb2=cb2,
                      cw3=rnd(cw3), cb3=cb3,
                      aw1=rnd(aw1), ab1=ab1, aw2=rnd(aw2), ab2=ab2,
                      vw1=rnd(vw1), vb1=vb1, vw2=rnd(vw2), vb2=vb2)
    return kernel_params, ref_params


# ----------------------------------------------------------------------------
# Forward pass (matches Net.forward semantics)
# ----------------------------------------------------------------------------
def net_forward(x, params, *, a_dim):
    b = x.shape[0]
    hi = lax.Precision.HIGHEST   # identity-kernel patch extraction must be exact
    xb = x.astype(jnp.bfloat16)

    # TODO(synk): folding im2col into the Pallas kernels would need in-kernel
    #   strided gathers / manual DMA; left as one XLA patch op per layer.

    # conv1: 4->32, k8, s4   (84 -> 20);  patch feature order = (c_in, kh, kw)
    p1 = lax.conv_general_dilated_patches(
        xb, (8, 8), (4, 4), "VALID",
        dimension_numbers=("NCHW", "OIHW", "CNHW"), precision=hi)   # (256,B,20,20)
    h1 = conv_matmul(params["w1"], params["b1"],
                     p1.reshape(256, -1).astype(jnp.bfloat16))      # (32, B*400) bf16
    h1 = h1.reshape(32, b, 20, 20)                                  # channel-major CNHW

    # conv2: 32->64, k4, s2  (20 -> 9)
    p2 = lax.conv_general_dilated_patches(
        h1, (4, 4), (2, 2), "VALID",
        dimension_numbers=("CNHW", "OIHW", "CNHW"), precision=hi)   # (512,B,9,9)
    h2 = conv_matmul(params["w2"], params["b2"],
                     p2.reshape(512, -1).astype(jnp.bfloat16))      # (64, B*81) bf16
    h2 = h2.reshape(64, b, 9, 9)

    # conv3: 64->64, k3, s1  (9 -> 7) — batch-major so the flatten is free
    p3 = lax.conv_general_dilated_patches(
        h2, (3, 3), (1, 1), "VALID",
        dimension_numbers=("CNHW", "OIHW", "NCHW"), precision=hi)   # (B,576,7,7)
    h3 = conv3_batch_major(params["w3"], params["b3"],
                           p3.reshape(b, 576, 49).astype(jnp.bfloat16))  # (B,64,49)

    # PyTorch x.reshape(-1, 3136) order: feat[b, c*49 + h*7 + w] — contiguous reshape
    feat = h3.reshape(b, 64 * 49)                                   # (B, 3136) bf16

    heads = head_forward(feat, params["hw1"], params["hb1"],
                         params["hw2"], params["hb2"], a_dim=a_dim)  # (2, B, 128)
    return heads[0, :, :a_dim], heads[1, :, :1]


# ----------------------------------------------------------------------------
# Pure-XLA reference (PyTorch semantics, same bf16 rounding points as kernels)
# ----------------------------------------------------------------------------
def reference_forward(x, rp, *, a_dim):
    hi = lax.Precision.HIGHEST
    bf = lambda t: t.astype(jnp.bfloat16).astype(jnp.float32)
    leaky = lambda t: jnp.where(t >= 0, t, 0.01 * t)

    def conv(h, w, b_, s):
        y = lax.conv_general_dilated(h, w, (s, s), "VALID",
                                     dimension_numbers=("NCHW", "OIHW", "NCHW"),
                                     precision=hi)
        return y + b_.reshape(1, -1, 1, 1)

    h = bf(leaky(conv(bf(x), rp["cw1"], rp["cb1"], 4)))
    h = bf(leaky(conv(h, rp["cw2"], rp["cb2"], 2)))
    h = bf(leaky(conv(h, rp["cw3"], rp["cb3"], 1)))
    feat = h.reshape(h.shape[0], -1)
    a1 = bf(leaky(jnp.dot(feat, rp["aw1"].T, precision=hi) + rp["ab1"]))
    logits = jnp.dot(a1, rp["aw2"].T, precision=hi) + rp["ab2"]
    p = jax.nn.softmax(logits, axis=-1)
    c1 = bf(leaky(jnp.dot(feat, rp["vw1"].T, precision=hi) + rp["vb1"]))
    v = jnp.dot(c1, rp["vw2"].T, precision=hi) + rp["vb2"]
    return p, v


if __name__ == "__main__":
    B, A_DIM = 2, 6
    key = jax.random.PRNGKey(0)
    k_x, k_p = jax.random.split(key)

    # 84x84x4 frames are required by the module's hard-coded 3136 = 64*7*7 flatten.
    x = jax.random.uniform(k_x, (B, 4, 84, 84), dtype=jnp.float32)
    params, ref_params = make_params(k_p, A_DIM)

    fwd = jax.jit(functools.partial(net_forward, a_dim=A_DIM))
    p_out, v = fwd(x, params)
    jax.block_until_ready((p_out, v))

    assert p_out.shape == (B, A_DIM) and v.shape == (B, 1)
    assert bool(jnp.all(jnp.isfinite(p_out))) and bool(jnp.all(jnp.isfinite(v)))
    # exact softmax normalization -> tight row-sum check
    assert bool(jnp.all(jnp.abs(jnp.sum(p_out, axis=-1) - 1.0) < 1e-4))

    # numerical check vs a pure-XLA reference replicating the same bf16 rounding
    p_ref, v_ref = jax.jit(functools.partial(reference_forward, a_dim=A_DIM))(x, ref_params)
    assert bool(jnp.allclose(p_out, p_ref, atol=1e-2, rtol=0.0)), "actor head mismatch"
    assert bool(jnp.allclose(v, v_ref, atol=3e-2, rtol=0.0)), "critic head mismatch"

    print("KERNEL_OK")
</pallas_src>

<mosaic_0001>
module attributes {stable_mosaic.version = 11 : i64} {
  func.func @_conv_mm_kernel(%arg0: i32, %arg1: memref<32x256xbf16, #tpu.memory_space<vmem>>, %arg2: memref<32x1xf32, #tpu.memory_space<vmem>>, %arg3: memref<256x800xbf16, #tpu.memory_space<vmem>>, %arg4: memref<32x800xbf16, #tpu.memory_space<vmem>>) attributes {dimension_semantics = [#tpu.dimension_semantics<parallel>], iteration_bounds = array<i64: 1>, scalar_prefetch = 0 : i64, scratch_operands = 0 : i64, tpu.core_type = #tpu.core_type<tc>, window_params = [{pipeline_mode = #tpu.pipeline_mode<synchronous>, transform_indices = @transform_0, window_bounds = array<i64: 32, 256>}, {pipeline_mode = #tpu.pipeline_mode<synchronous>, transform_indices = @transform_1, window_bounds = array<i64: 32, 1>}, {transform_indices = @transform_2, window_bounds = array<i64: 256, 800>}, {transform_indices = @transform_3, window_bounds = array<i64: 32, 800>}]} {
    %c0 = arith.constant 0 : index
    %c0_0 = arith.constant 0 : index
    %0 = vector.load %arg1[%c0, %c0_0] : memref<32x256xbf16, #tpu.memory_space<vmem>>, vector<32x256xbf16>
    %c0_1 = arith.constant 0 : index
    %c0_2 = arith.constant 0 : index
    %1 = vector.load %arg3[%c0_1, %c0_2] : memref<256x800xbf16, #tpu.memory_space<vmem>>, vector<256x800xbf16>
    %cst = arith.constant dense<0.000000e+00> : vector<32x800xf32>
    %2 = tpu.matmul %0, %1, %cst {dimension_numbers = #tpu.dot_dimension_numbers<[1], [0], [0], [1], [0, 0, 1, 1], [], []>} : vector<32x256xbf16>, vector<256x800xbf16>, vector<32x800xf32> -> vector<32x800xf32>
    %c0_3 = arith.constant 0 : index
    %c0_4 = arith.constant 0 : index
    %3 = vector.load %arg2[%c0_3, %c0_4] : memref<32x1xf32, #tpu.memory_space<vmem>>, vector<32x1xf32>
    %4 = vector.broadcast %3 : vector<32x1xf32> to vector<32x800xf32>
    %5 = arith.addf %2, %4 : vector<32x800xf32>
    %cst_5 = arith.constant 0.000000e+00 : f32
    %6 = vector.broadcast %cst_5 : f32 to vector<32x800xf32>
    %7 = arith.cmpf oge, %5, %6 : vector<32x800xf32>
    %cst_6 = arith.constant 0.00999999977 : f32
    %8 = vector.broadcast %cst_6 : f32 to vector<32x800xf32>
    %9 = arith.mulf %8, %5 : vector<32x800xf32>
    %10 = arith.select %7, %5, %9 : vector<32x800xi1>, vector<32x800xf32>
    %11 = arith.truncf %10 : vector<32x800xf32> to vector<32x800xbf16>
    %c0_7 = arith.constant 0 : index
    %c0_8 = arith.constant 0 : index
    %12 = vector.load %arg4[%c0_7, %c0_8] : memref<32x800xbf16, #tpu.memory_space<vmem>>, vector<32x800xbf16>
    tpu.vector_store %arg4[%c0_7, %c0_8], %11 {strides = array<i32>} : memref<32x800xbf16, #tpu.memory_space<vmem>>, vector<32x800xbf16>,
    return
  }
  func.func @transform_0(%arg0: i32) -> (i32, i32) {
    %c0_i32 = arith.constant 0 : i32
    %c0_i32_0 = arith.constant 0 : i32
    %c0_i32_1 = arith.constant 0 : i32
    return %c0_i32, %c0_i32_0 : i32, i32
  }
  func.func @transform_1(%arg0: i32) -> (i32, i32) {
    %c0_i32 = arith.constant 0 : i32
    %c0_i32_0 = arith.constant 0 : i32
    %c0_i32_1 = arith.constant 0 : i32
    return %c0_i32, %c0_i32_0 : i32, i32
  }
  func.func @transform_2(%arg0: i32) -> (i32, i32) {
    %c0_i32 = arith.constant 0 : i32
    %c0_i32_0 = arith.constant 0 : i32
    return %c0_i32, %arg0 : i32, i32
  }
  func.func @transform_3(%arg0: i32) -> (i32, i32) {
    %c0_i32 = arith.constant 0 : i32
    %c0_i32_0 = arith.constant 0 : i32
    return %c0_i32, %arg0 : i32, i32
  }
}

module attributes {stable_mosaic.version = 11 : i64} {
  func.func @_conv_mm_kernel(%arg0: i32, %arg1: memref<64x512xbf16, #tpu.memory_space<vmem>>, %arg2: memref<64x1xf32, #tpu.memory_space<vmem>>, %arg3: memref<512x162xbf16, #tpu.memory_space<vmem>>, %arg4: memref<64x162xbf16, #tpu.memory_space<vmem>>) attributes {dimension_semantics = [#tpu.dimension_semantics<parallel>], iteration_bounds = array<i64: 1>, scalar_prefetch = 0 : i64, scratch_operands = 0 : i64, tpu.core_type = #tpu.core_type<tc>, window_params = [{pipeline_mode = #tpu.pipeline_mode<synchronous>, transform_indices = @transform_0, window_bounds = array<i64: 64, 512>}, {pipeline_mode = #tpu.pipeline_mode<synchronous>, transform_indices = @transform_1, window_bounds = array<i64: 64, 1>}, {transform_indices = @transform_2, window_bounds = array<i64: 512, 162>}, {transform_indices = @transform_3, window_bounds = array<i64: 64, 162>}]} {
    %c0 = arith.constant 0 : index
    %c0_0 = arith.constant 0 : index
    %0 = vector.load %arg1[%c0, %c0_0] : memref<64x512xbf16, #tpu.memory_space<vmem>>, vector<64x512xbf16>
    %c0_1 = arith.constant 0 : index
    %c0_2 = arith.constant 0 : index
    %1 = vector.load %arg3[%c0_1, %c0_2] : memref<512x162xbf16, #tpu.memory_space<vmem>>, vector<512x162xbf16>
    %cst = arith.constant dense<0.000000e+00> : vector<64x162xf32>
    %2 = tpu.matmul %0, %1, %cst {dimension_numbers = #tpu.dot_dimension_numbers<[1], [0], [0], [1], [0, 0, 1, 1], [], []>} : vector<64x512xbf16>, vector<512x162xbf16>, vector<64x162xf32> -> vector<64x162xf32>
    %c0_3 = arith.constant 0 : index
    %c0_4 = arith.constant 0 : index
    %3 = vector.load %arg2[%c0_3, %c0_4] : memref<64x1xf32, #tpu.memory_space<vmem>>, vector<64x1xf32>
    %4 = vector.broadcast %3 : vector<64x1xf32> to vector<64x162xf32>
    %5 = arith.addf %2, %4 : vector<64x162xf32>
    %cst_5 = arith.constant 0.000000e+00 : f32
    %6 = vector.broadcast %cst_5 : f32 to vector<64x162xf32>
    %7 = arith.cmpf oge, %5, %6 : vector<64x162xf32>
    %cst_6 = arith.constant 0.00999999977 : f32
    %8 = vector.broadcast %cst_6 : f32 to vector<64x162xf32>
    %9 = arith.mulf %8, %5 : vector<64x162xf32>
    %10 = arith.select %7, %5, %9 : vector<64x162xi1>, vector<64x162xf32>
    %11 = arith.truncf %10 : vector<64x162xf32> to vector<64x162xbf16>
    %c0_7 = arith.constant 0 : index
    %c0_8 = arith.constant 0 : index
    %12 = vector.load %arg4[%c0_7, %c0_8] : memref<64x162xbf16, #tpu.memory_space<vmem>>, vector<64x162xbf16>
    tpu.vector_store %arg4[%c0_7, %c0_8], %11 {strides = array<i32>} : memref<64x162xbf16, #tpu.memory_space<vmem>>, vector<64x162xbf16>,
    return
  }
  func.func @transform_0(%arg0: i32) -> (i32, i32) {
    %c0_i32 = arith.constant 0 : i32
    %c0_i32_0 = arith.constant 0 : i32
    %c0_i32_1 = arith.constant 0 : i32
    return %c0_i32, %c0_i32_0 : i32, i32
  }
  func.func @transform_1(%arg0: i32) -> (i32, i32) {
    %c0_i32 = arith.constant 0 : i32
    %c0_i32_0 = arith.constant 0 : i32
    %c0_i32_1 = arith.constant 0 : i32
    return %c0_i32, %c0_i32_0 : i32, i32
  }
  func.func @transform_2(%arg0: i32) -> (i32, i32) {
    %c0_i32 = arith.constant 0 : i32
    %c0_i32_0 = arith.constant 0 : i32
    return %c0_i32, %arg0 : i32, i32
  }
  func.func @transform_3(%arg0: i32) -> (i32, i32) {
    %c0_i32 = arith.constant 0 : i32
    %c0_i32_0 = arith.constant 0 : i32
    return %c0_i32, %arg0 : i32, i32
  }
}

module attributes {stable_mosaic.version = 11 : i64} {
  func.func @_conv3_kernel(%arg0: i32, %arg1: memref<64x576xbf16, #tpu.memory_space<vmem>>, %arg2: memref<64x1xf32, #tpu.memory_space<vmem>>, %arg3: memref<1x576x49xbf16, #tpu.memory_space<vmem>>, %arg4: memref<1x64x49xbf16, #tpu.memory_space<vmem>>) attributes {dimension_semantics = [#tpu.dimension_semantics<parallel>], iteration_bounds = array<i64: 2>, scalar_prefetch = 0 : i64, scratch_operands = 0 : i64, tpu.core_type = #tpu.core_type<tc>, window_params = [{pipeline_mode = #tpu.pipeline_mode<synchronous>, transform_indices = @transform_0, window_bounds = array<i64: 64, 576>}, {pipeline_mode = #tpu.pipeline_mode<synchronous>, transform_indices = @transform_1, window_bounds = array<i64: 64, 1>}, {transform_indices = @transform_2, window_bounds = array<i64: 1, 576, 49>}, {transform_indices = @transform_3, window_bounds = array<i64: 1, 64, 49>}]} {
    %c0 = arith.constant 0 : index
    %c0_0 = arith.constant 0 : index
    %0 = vector.load %arg1[%c0, %c0_0] : memref<64x576xbf16, #tpu.memory_space<vmem>>, vector<64x576xbf16>
    %c0_1 = arith.constant 0 : index
    %c0_2 = arith.constant 0 : index
    %c0_3 = arith.constant 0 : index
    %1 = vector.load %arg3[%c0_1, %c0_2, %c0_3] : memref<1x576x49xbf16, #tpu.memory_space<vmem>>, vector<1x576x49xbf16>
    %2 = vector.shape_cast %1 : vector<1x576x49xbf16> to vector<576x49xbf16>
    %cst = arith.constant dense<0.000000e+00> : vector<64x49xf32>
    %3 = tpu.matmul %0, %2, %cst {dimension_numbers = #tpu.dot_dimension_numbers<[1], [0], [0], [1], [0, 0, 1, 1], [], []>} : vector<64x576xbf16>, vector<576x49xbf16>, vector<64x49xf32> -> vector<64x49xf32>
    %c0_4 = arith.constant 0 : index
    %c0_5 = arith.constant 0 : index
    %4 = vector.load %arg2[%c0_4, %c0_5] : memref<64x1xf32, #tpu.memory_space<vmem>>, vector<64x1xf32>
    %5 = vector.broadcast %4 : vector<64x1xf32> to vector<64x49xf32>
    %6 = arith.addf %3, %5 : vector<64x49xf32>
    %cst_6 = arith.constant 0.000000e+00 : f32
    %7 = vector.broadcast %cst_6 : f32 to vector<64x49xf32>
    %8 = arith.cmpf oge, %6, %7 : vector<64x49xf32>
    %cst_7 = arith.constant 0.00999999977 : f32
    %9 = vector.broadcast %cst_7 : f32 to vector<64x49xf32>
    %10 = arith.mulf %9, %6 : vector<64x49xf32>
    %11 = arith.select %8, %6, %10 : vector<64x49xi1>, vector<64x49xf32>
    %12 = arith.truncf %11 : vector<64x49xf32> to vector<64x49xbf16>
    %c0_8 = arith.constant 0 : index
    %c0_9 = arith.constant 0 : index
    %c0_10 = arith.constant 0 : index
    %13 = vector.load %arg4[%c0_8, %c0_9, %c0_10] : memref<1x64x49xbf16, #tpu.memory_space<vmem>>, vector<1x64x49xbf16>
    %14 = vector.shape_cast %13 : vector<1x64x49xbf16> to vector<64x49xbf16>
    %15 = vector.shape_cast %12 : vector<64x49xbf16> to vector<1x64x49xbf16>
    tpu.vector_store %arg4[%c0_8, %c0_9, %c0_10], %15 {strides = array<i32>} : memref<1x64x49xbf16, #tpu.memory_space<vmem>>, vector<1x64x49xbf16>,
    return
  }
  func.func @transform_0(%arg0: i32) -> (i32, i32) {
    %c0_i32 = arith.constant 0 : i32
    %c0_i32_0 = arith.constant 0 : i32
    %c0_i32_1 = arith.constant 0 : i32
    return %c0_i32, %c0_i32_0 : i32, i32
  }
  func.func @transform_1(%arg0: i32) -> (i32, i32) {
    %c0_i32 = arith.constant 0 : i32
    %c0_i32_0 = arith.constant 0 : i32
    %c0_i32_1 = arith.constant 0 : i32
    return %c0_i32, %c0_i32_0 : i32, i32
  }
  func.func @transform_2(%arg0: i32) -> (i32, i32, i32) {
    %c0_i32 = arith.constant 0 : i32
    %c0_i32_0 = arith.constant 0 : i32
    %c0_i32_1 = arith.constant 0 : i32
    return %arg0, %c0_i32, %c0_i32_0 : i32, i32, i32
  }
  func.func @transform_3(%arg0: i32) -> (i32, i32, i32) {
    %c0_i32 = arith.constant 0 : i32
    %c0_i32_0 = arith.constant 0 : i32
    %c0_i32_1 = arith.constant 0 : i32
    return %arg0, %c0_i32, %c0_i32_0 : i32, i32, i32
  }
}

module attributes {stable_mosaic.version = 11 : i64} {
  func.func @_head_kernel(%arg0: i32, %arg1: memref<2x3136xbf16, #tpu.memory_space<vmem>>, %arg2: memref<1x3136x512xbf16, #tpu.memory_space<vmem>>, %arg3: memref<1x1x512xf32, #tpu.memory_space<vmem>>, %arg4: memref<1x512x128xbf16, #tpu.memory_space<vmem>>, %arg5: memref<1x1x128xf32, #tpu.memory_space<vmem>>, %arg6: memref<1x2x128xf32, #tpu.memory_space<vmem>>) attributes {dimension_semantics = [#tpu.dimension_semantics<parallel>], iteration_bounds = array<i64: 2>, scalar_prefetch = 0 : i64, scratch_operands = 0 : i64, tpu.core_type = #tpu.core_type<tc>, window_params = [{pipeline_mode = #tpu.pipeline_mode<synchronous>, transform_indices = @transform_0, window_bounds = array<i64: 2, 3136>}, {transform_indices = @transform_1, window_bounds = array<i64: 1, 3136, 512>}, {transform_indices = @transform_2, window_bounds = array<i64: 1, 1, 512>}, {transform_indices = @transform_3, window_bounds = array<i64: 1, 512, 128>}, {transform_indices = @transform_4, window_bounds = array<i64: 1, 1, 128>}, {transform_indices = @transform_5, window_bounds = array<i64: 1, 2, 128>}]} {
    %c0 = arith.constant 0 : index
    %c0_0 = arith.constant 0 : index
    %0 = vector.load %arg1[%c0, %c0_0] : memref<2x3136xbf16, #tpu.memory_space<vmem>>, vector<2x3136xbf16>
    %c0_1 = arith.constant 0 : index
    %c0_2 = arith.constant 0 : index
    %c0_3 = arith.constant 0 : index
    %1 = vector.load %arg2[%c0_1, %c0_2, %c0_3] : memref<1x3136x512xbf16, #tpu.memory_space<vmem>>, vector<1x3136x512xbf16>
    %2 = vector.shape_cast %1 : vector<1x3136x512xbf16> to vector<3136x512xbf16>
    %cst = arith.constant dense<0.000000e+00> : vector<2x512xf32>
    %3 = tpu.matmul %0, %2, %cst {dimension_numbers = #tpu.dot_dimension_numbers<[1], [0], [0], [1], [0, 0, 1, 1], [], []>} : vector<2x3136xbf16>, vector<3136x512xbf16>, vector<2x512xf32> -> vector<2x512xf32>
    %c0_4 = arith.constant 0 : index
    %c0_5 = arith.constant 0 : index
    %c0_6 = arith.constant 0 : index
    %4 = vector.load %arg3[%c0_4, %c0_5, %c0_6] : memref<1x1x512xf32, #tpu.memory_space<vmem>>, vector<1x1x512xf32>
    %5 = vector.shape_cast %4 : vector<1x1x512xf32> to vector<1x512xf32>
    %6 = vector.broadcast %5 : vector<1x512xf32> to vector<2x512xf32>
    %7 = arith.addf %3, %6 : vector<2x512xf32>
    %cst_7 = arith.constant 0.000000e+00 : f32
    %8 = vector.broadcast %cst_7 : f32 to vector<2x512xf32>
    %9 = arith.cmpf oge, %7, %8 : vector<2x512xf32>
    %cst_8 = arith.constant 0.00999999977 : f32
    %10 = vector.broadcast %cst_8 : f32 to vector<2x512xf32>
    %11 = arith.mulf %10, %7 : vector<2x512xf32>
    %12 = arith.select %9, %7, %11 : vector<2x512xi1>, vector<2x512xf32>
    %13 = arith.truncf %12 : vector<2x512xf32> to vector<2x512xbf16>
    %c0_9 = arith.constant 0 : index
    %c0_10 = arith.constant 0 : index
    %c0_11 = arith.constant 0 : index
    %14 = vector.load %arg4[%c0_9, %c0_10, %c0_11] : memref<1x512x128xbf16, #tpu.memory_space<vmem>>, vector<1x512x128xbf16>
    %15 = vector.shape_cast %14 : vector<1x512x128xbf16> to vector<512x128xbf16>
    %cst_12 = arith.constant dense<0.000000e+00> : vector<2x128xf32>
    %16 = tpu.matmul %13, %15, %cst_12 {dimension_numbers = #tpu.dot_dimension_numbers<[1], [0], [0], [1], [0, 0, 1, 1], [], []>} : vector<2x512xbf16>, vector<512x128xbf16>, vector<2x128xf32> -> vector<2x128xf32>
    %c0_13 = arith.constant 0 : index
    %c0_14 = arith.constant 0 : index
    %c0_15 = arith.constant 0 : index
    %17 = vector.load %arg5[%c0_13, %c0_14, %c0_15] : memref<1x1x128xf32, #tpu.memory_space<vmem>>, vector<1x1x128xf32>
    %18 = vector.shape_cast %17 : vector<1x1x128xf32> to vector<1x128xf32>
    %19 = vector.broadcast %18 : vector<1x128xf32> to vector<2x128xf32>
    %20 = arith.addf %16, %19 : vector<2x128xf32>
    %c0_i32 = arith.constant 0 : i32
    %21 = arith.cmpi eq, %arg0, %c0_i32 : i32
    %22 = arith.extui %21 : i1 to i32
    %c0_i32_16 = arith.constant 0 : i32
    %23 = arith.cmpi ne, %22, %c0_i32_16 : i32
    scf.if %23 {
      %27 = tpu.iota {dimensions = array<i32: 1>} : vector<2x128xi32>
      %c6_i32 = arith.constant 6 : i32
      %28 = vector.broadcast %c6_i32 : i32 to vector<2x128xi32>
      %29 = arith.cmpi slt, %27, %28 : vector<2x128xi32>
      %cst_18 = arith.constant 0xFF800000 : f32
      %30 = vector.broadcast %cst_18 : f32 to vector<2x128xf32>
      %31 = arith.select %29, %20, %30 : vector<2x128xi1>, vector<2x128xf32>
      %cst_19 = arith.constant dense<0xFF800000> : vector<2xf32>
      %32 = vector.multi_reduction <maximumf>, %31, %cst_19 [1] : vector<2x128xf32> to vector<2xf32>
      %33 = vector.shape_cast %32 : vector<2xf32> to vector<2x1xf32>
      %34 = vector.broadcast %33 : vector<2x1xf32> to vector<2x128xf32>
      %35 = arith.subf %31, %34 : vector<2x128xf32>
      %36 = math.exp %35 : vector<2x128xf32>
      %cst_20 = arith.constant dense<0.000000e+00> : vector<2xf32>
      %37 = vector.multi_reduction <add>, %36, %cst_20 [1] : vector<2x128xf32> to vector<2xf32>
      %38 = vector.shape_cast %37 : vector<2xf32> to vector<2x1xf32>
      %39 = vector.broadcast %38 : vector<2x1xf32> to vector<2x128xf32>
      %40 = arith.divf %36, %39 : vector<2x128xf32>
      %c0_21 = arith.constant 0 : index
      %c0_22 = arith.constant 0 : index
      %c0_23 = arith.constant 0 : index
      %41 = vector.load %arg6[%c0_21, %c0_22, %c0_23] : memref<1x2x128xf32, #tpu.memory_space<vmem>>, vector<1x2x128xf32>
      %42 = vector.shape_cast %41 : vector<1x2x128xf32> to vector<2x128xf32>
      %43 = vector.shape_cast %40 : vector<2x128xf32> to vector<1x2x128xf32>
      tpu.vector_store %arg6[%c0_21, %c0_22, %c0_23], %43 {strides = array<i32>} : memref<1x2x128xf32, #tpu.memory_space<vmem>>, vector<1x2x128xf32>,
    } else {
    }
    %true = arith.constant true
    %24 = arith.xori %21, %true : i1
    %25 = arith.extui %24 : i1 to i32
    %c0_i32_17 = arith.constant 0 : i32
    %26 = arith.cmpi ne, %25, %c0_i32_17 : i32
    scf.if %26 {
      %c0_18 = arith.constant 0 : index
      %c0_19 = arith.constant 0 : index
      %c0_20 = arith.constant 0 : index
      %27 = vector.load %arg6[%c0_18, %c0_19, %c0_20] : memref<1x2x128xf32, #tpu.memory_space<vmem>>, vector<1x2x128xf32>
      %28 = vector.shape_cast %27 : vector<1x2x128xf32> to vector<2x128xf32>
      %29 = vector.shape_cast %20 : vector<2x128xf32> to vector<1x2x128xf32>
      tpu.vector_store %arg6[%c0_18, %c0_19, %c0_20], %29 {strides = array<i32>} : memref<1x2x128xf32, #tpu.memory_space<vmem>>, vector<1x2x128xf32>,
    } else {
    }
    return
  }
  func.func @transform_0(%arg0: i32) -> (i32, i32) {
    %c0_i32 = arith.constant 0 : i32
    %c0_i32_0 = arith.constant 0 : i32
    %c0_i32_1 = arith.constant 0 : i32
    return %c0_i32, %c0_i32_0 : i32, i32
  }
  func.func @transform_1(%arg0: i32) -> (i32, i32, i32) {
    %c0_i32 = arith.constant 0 : i32
    %c0_i32_0 = arith.constant 0 : i32
    %c0_i32_1 = arith.constant 0 : i32
    return %arg0, %c0_i32, %c0_i32_0 : i32, i32, i32
  }
  func.func @transform_2(%arg0: i32) -> (i32, i32, i32) {
    %c0_i32 = arith.constant 0 : i32
    %c0_i32_0 = arith.constant 0 : i32
    %c0_i32_1 = arith.constant 0 : i32
    return %arg0, %c0_i32, %c0_i32_0 : i32, i32, i32
  }
  func.func @transform_3(%arg0: i32) -> (i32, i32, i32) {
    %c0_i32 = arith.constant 0 : i32
    %c0_i32_0 = arith.constant 0 : i32
    %c0_i32_1 = arith.constant 0 : i32
    return %arg0, %c0_i32, %c0_i32_0 : i32, i32, i32
  }
  func.func @transform_4(%arg0: i32) -> (i32, i32, i32) {
    %c0_i32 = arith.constant 0 : i32
    %c0_i32_0 = arith.constant 0 : i32
    %c0_i32_1 = arith.constant 0 : i32
    return %arg0, %c0_i32, %c0_i32_0 : i32, i32, i32
  }
  func.func @transform_5(%arg0: i32) -> (i32, i32, i32) {
    %c0_i32 = arith.constant 0 : i32
    %c0_i32_0 = arith.constant 0 : i32
    %c0_i32_1 = arith.constant 0 : i32
    return %arg0, %c0_i32, %c0_i32_0 : i32, i32, i32
  }
}

</mosaic_0001>

<bundles_post_ra>
// kernel: net_forward.4
= control target key start
LH: loop header
LB: loop body
LE: loop exit
PB: predicated region body
PF: predicated region fallthrough
CT: control target
= control target key end

     0   :  { %v1513_v13 = vmov 0   ;;  %s2006_s2 = inlined_call_operand.vmem [shape: bf16[256,800], index: 2, kind: input, shape index: {}]   ;;  %s2007_s0 = inlined_call_operand.vmem [shape: bf16[32,256], index: 0, kind: input, shape index: {}]   ;;  %s2008_s1 = inlined_call_operand.vmem [shape: f32[32,1], index: 1, kind: input, shape index: {}]   ;;  %s2009_s3 = inlined_call_operand.vmem [shape: bf16[32,800], index: 3, kind: output, shape index: {}]  }
   0x1   :  { %v1347_v0 = vld [vmem:[%s2006_s2 + $0x4] ss:$28 sps:$4 sm:$0xff]   ;;  %v1350_v2 = vld [vmem:[%s2006_s2 + $0x3c] ss:$28 sps:$4 sm:$0xff]   ;;  %v1353_v4 = vld [vmem:[%s2006_s2 + $0x74] ss:$28 sps:$4 sm:$0xff]   ;;  %1345 = vset.pattern.permute.xlu0 %v1513_v13  ;;  %1346 = vset.pattern.permute.xlu1 %v1513_v13 }
   0x2   :  { %v1349_v1 = vld [vmem:[%s2006_s2] ss:$28 sps:$4 sm:$0xff]   ;;  %767 = vmatprep.subr.bf16.mxu0 %v1347_v0  ;;  %v1352_v3 = vld [vmem:[%s2006_s2 + $0x38] ss:$28 sps:$4 sm:$0xff]   ;;  %v1355_v5 = vld [vmem:[%s2006_s2 + $0x70] ss:$28 sps:$4 sm:$0xff]  }
   0x3   :  { %768 = vmatpush1.bf16.msra.mxu0 %v1349_v1  ;;  %v1356_v6 = vld [vmem:[%s2006_s2 + $0xac] ss:$28 sps:$4 sm:$0xff]   ;;  %v1359_v10 = vld [vmem:[%s2006_s2 + $0xe4] ss:$28 sps:$4 sm:$0xff]   ;;  %v1362_v15 = vld [vmem:[%s2006_s2 + $0x11c] ss:$28 sps:$4 sm:$0xff]  }
   0x4   :  { %769 = vmatprep.subr.bf16.mxu0 %v1350_v2  ;;  %v1367_v7 = vld [vmem:[%s2006_s2 + $0xc] ss:$28 sps:$4 sm:$0xff]   ;;  %v1373_v11 = vld [vmem:[%s2006_s2 + $0x44] ss:$28 sps:$4 sm:$0xff]   ;;  %v1379_v16 = vld [vmem:[%s2006_s2 + $0x7c] ss:$28 sps:$4 sm:$0xff]  }
   0x5   :  { %v1370_v8 = vld [vmem:[%s2006_s2 + $0x8] ss:$28 sps:$4 sm:$0xff]   ;;  %820 = vmatprep.subr.bf16.mxu1 %v1367_v7  ;;  %v1376_v12 = vld [vmem:[%s2006_s2 + $0x40] ss:$28 sps:$4 sm:$0xff]   ;;  %v1382_v17 = vld [vmem:[%s2006_s2 + $0x78] ss:$28 sps:$4 sm:$0xff]  }
   0x6   :  { %v1358_v9 = vld [vmem:[%s2006_s2 + $0xa8] ss:$28 sps:$4 sm:$0xff]   ;;  %821 = vmatpush1.bf16.msra.mxu1 %v1370_v8  ;;  %v1361_v14 = vld [vmem:[%s2006_s2 + $0xe0] ss:$28 sps:$4 sm:$0xff]   ;;  %v1385_v18 = vld [vmem:[%s2006_s2 + $0xb4] ss:$28 sps:$4 sm:$0xff]  }
   0x7   :  { %770 = vmatpush1.bf16.msra.mxu0 %v1352_v3  ;;  %822 = vmatprep.subr.bf16.mxu1 %v1373_v11  ;;  %v1364_v19 = vld [vmem:[%s2006_s2 + $0x118] ss:$28 sps:$4 sm:$0xff]   ;;  %v1388_v21 = vld [vmem:[%s2006_s2 + $0xb0] ss:$28 sps:$4 sm:$0xff]   ;;  %v1394_v25 = vld [vmem:[%s2006_s2 + $0xe8] ss:$28 sps:$4 sm:$0xff]  }
   0x8   :  { %771 = vmatprep.subr.bf16.mxu0 %v1353_v4  ;;  %v1365_v20 = vld [vmem:[%s2006_s2 + $0x154] ss:$28 sps:$4 sm:$0xff]   ;;  %v1391_v22 = vld [vmem:[%s2006_s2 + $0xec] ss:$28 sps:$4 sm:$0xff]   ;;  %v1397_v26 = vld [vmem:[%s2006_s2 + $0x124] ss:$28 sps:$4 sm:$0xff]  }
   0x9   :  { %v1369_v23 = vld [vmem:[%s2006_s2 + $0x150] ss:$28 sps:$4 sm:$0xff]   ;;  %v1375_v27 = vld [vmem:[%s2006_s2 + $0x188] ss:$28 sps:$4 sm:$0xff]   ;;  %v1400_v29 = vld [vmem:[%s2006_s2 + $0x120] ss:$28 sps:$4 sm:$0xff]  }
   0xa   :  { %823 = vmatpush1.bf16.msra.mxu1 %v1376_v12  ;;  %v1371_v24 = vld [vmem:[%s2006_s2 + $0x18c] ss:$28 sps:$4 sm:$0xff]   ;;  %v1377_v28 = vld [vmem:[%s2006_s2 + $0x1c4] ss:$28 sps:$4 sm:$0xff]   ;;  %v1403_v30 = vld [vmem:[%s2006_s2 + $0x15c] ss:$28 sps:$4 sm:$0xff]  }
   0xb   :  { %772 = vmatpush1.bf16.msra.mxu0 %v1355_v5  ;;  %824 = vmatprep.subr.bf16.mxu1 %v1379_v16  ;;  %v1381_v31 = vld [vmem:[%s2006_s2 + $0x1c0] ss:$28 sps:$4 sm:$0xff]   ;;  %v1406_v33 = vld [vmem:[%s2006_s2 + $0x158] ss:$28 sps:$4 sm:$0xff]   ;;  %v1645_v37 = vld [vmem:[%s2007_s0 + $0x4] ss:$8 sps:$4 sm:$0xff]  }
   0xc   :  { %773 = vmatprep.subr.bf16.mxu0 %v1356_v6  ;;  %v1383_v32 = vld [vmem:[%s2006_s2 + $0x1fc] ss:$28 sps:$4 sm:$0xff]   ;;  %v1409_v34 = vld [vmem:[%s2006_s2 + $0x194] ss:$28 sps:$4 sm:$0xff]   ;;  %v1415_v39 = vld [vmem:[%s2006_s2 + $0x1cc] ss:$28 sps:$4 sm:$0xff]   ;;  %799 = vmatprep.mubr.bf16.mxu0 %v1645_v37 }
   0xd   :  { %v1387_v35 = vld [vmem:[%s2006_s2 + $0x1f8] ss:$28 sps:$4 sm:$0xff]   ;;  %v1412_v38 = vld [vmem:[%s2006_s2 + $0x190] ss:$28 sps:$4 sm:$0xff]   ;;  %852 = vmatprep.mubr.bf16.mxu1 %v1645_v37  ;;  %v1418_v42 = vld [vmem:[%s2006_s2 + $0x1c8] ss:$28 sps:$4 sm:$0xff]  }
   0xe   :  { %825 = vmatpush1.bf16.msra.mxu1 %v1382_v17  ;;  %v1389_v36 = vld [vmem:[%s2006_s2 + $0x234] ss:$28 sps:$4 sm:$0xff]   ;;  %v1395_v41 = vld [vmem:[%s2006_s2 + $0x26c] ss:$28 sps:$4 sm:$0xff]   ;;  %v1421_v43 = vld [vmem:[%s2006_s2 + $0x204] ss:$28 sps:$4 sm:$0xff]  }
   0xf   :  { %774 = vmatpush1.bf16.msra.mxu0 %v1358_v9  ;;  %826 = vmatprep.subr.bf16.mxu1 %v1385_v18  ;;  %v1393_v40 = vld [vmem:[%s2006_s2 + $0x230] ss:$28 sps:$4 sm:$0xff]   ;;  %v1399_v44 = vld [vmem:[%s2006_s2 + $0x268] ss:$28 sps:$4 sm:$0xff]   ;;  %v1424_v46 = vld [vmem:[%s2006_s2 + $0x200] ss:$28 sps:$4 sm:$0xff]  }
  0x10   :  { %775 = vmatprep.subr.bf16.mxu0 %v1359_v10  ;;  %v1401_v45 = vld [vmem:[%s2006_s2 + $0x2a4] ss:$28 sps:$4 sm:$0xff]   ;;  %v1428_v47 = vld [vmem:[%s2006_s2 + $0x23c] ss:$28 sps:$4 sm:$0xff]   ;;  %v1434_v51 = vld [vmem:[%s2006_s2 + $0x274] ss:$28 sps:$4 sm:$0xff]  }
  0x11   :  { %v1405_v48 = vld [vmem:[%s2006_s2 + $0x2a0] ss:$28 sps:$4 sm:$0xff]   ;;  %v1433_v50 = vld [vmem:[%s2006_s2 + $0x238] ss:$28 sps:$4 sm:$0xff]   ;;  %v1439_v54 = vld [vmem:[%s2006_s2 + $0x270] ss:$28 sps:$4 sm:$0xff]  }
  0x12   :  { %827 = vmatpush1.bf16.msra.mxu1 %v1388_v21  ;;  %v1407_v49 = vld [vmem:[%s2006_s2 + $0x2dc] ss:$28 sps:$4 sm:$0xff]   ;;  %v1413_v53 = vld [vmem:[%s2006_s2 + $0x314] ss:$28 sps:$4 sm:$0xff]   ;;  %v1440_v55 = vld [vmem:[%s2006_s2 + $0x2ac] ss:$28 sps:$4 sm:$0xff]  }
  0x13   :  { %776 = vmatpush1.bf16.msra.mxu0 %v1361_v14  ;;  %828 = vmatprep.subr.bf16.mxu1 %v1391_v22  ;;  %v1411_v52 = vld [vmem:[%s2006_s2 + $0x2d8] ss:$28 sps:$4 sm:$0xff]   ;;  %v1417_v56 = vld [vmem:[%s2006_s2 + $0x310] ss:$28 sps:$4 sm:$0xff]   ;;  %v1445_v58 = vld [vmem:[%s2006_s2 + $0x2a8] ss:$28 sps:$4 sm:$0xff]  }
  0x14   :  { %777 = vmatprep.subr.bf16.mxu0 %v1362_v15  ;;  %v1419_v57 = vld [vmem:[%s2006_s2 + $0x34c] ss:$28 sps:$4 sm:$0xff]   ;;  %v1446_v59 = vld [vmem:[%s2006_s2 + $0x2e4] ss:$28 sps:$4 sm:$0xff]   ;;  %v1432_v61 = vld [vmem:[%s2006_s2 + $0x14] ss:$28 sps:$4 sm:$0xff]  }
  0x15   :  { %v1423_v60 = vld [vmem:[%s2006_s2 + $0x348] ss:$28 sps:$4 sm:$0xff]   ;;  %v1451_v63 = vld [vmem:[%s2006_s2 + $0x2e0] ss:$28 sps:$4 sm:$0xff]   ;;  %v1430_v1 = vld [vmem:[%s2006_s2 + $0x10] ss:$28 sps:$4 sm:$0xff]  }
  0x16   :  { %829 = vmatpush1.bf16.msra.mxu1 %v1394_v25  ;;  %v1724_v62 = vld [vmem:[%s2007_s0] ss:$8 sps:$4 sm:$0xff]   ;;  %v1452_v0 = vld [vmem:[%s2006_s2 + $0x31c] ss:$28 sps:$4 sm:$0xff]   ;;  %v1458_v4 = vld [vmem:[%s2006_s2 + $0x354] ss:$28 sps:$4 sm:$0xff]  }
  0x17   :  { %778 = vmatpush1.bf16.msra.mxu0 %v1364_v19  ;;  %830 = vmatprep.subr.bf16.mxu1 %v1397_v26  ;;  %v1438_v2 = vld [vmem:[%s2006_s2 + $0x4c] ss:$28 sps:$4 sm:$0xff]   ;;  %v1457_v3 = vld [vmem:[%s2006_s2 + $0x318] ss:$28 sps:$4 sm:$0xff]   ;;  %v1444_v6 = vld [vmem:[%s2006_s2 + $0x84] ss:$28 sps:$4 sm:$0xff]  }
  0x18   :  { %779 = vmatprep.subr.bf16.mxu0 %v1365_v20  ;;  %v1436_v5 = vld [vmem:[%s2006_s2 + $0x48] ss:$28 sps:$4 sm:$0xff]   ;;  %v1463_v7 = vld [vmem:[%s2006_s2 + $0x350] ss:$28 sps:$4 sm:$0xff]   ;;  %v1442_v8 = vld [vmem:[%s2006_s2 + $0x80] ss:$28 sps:$4 sm:$0xff]  }
  0x19   :  { %v1467_v9 = vld [vmem:[%s2006_s2 + $0x1d8] ss:$28 sps:$4 sm:$0xff]   ;;  %v1472_v13 = vld [vmem:[%s2006_s2 + $0x210] ss:$28 sps:$4 sm:$0xff]   ;;  %v1477_v18 = vld [vmem:[%s2006_s2 + $0x248] ss:$28 sps:$4 sm:$0xff]  }
  0x1a   :  { %831 = vmatpush1.bf16.msra.mxu1 %v1400_v29  ;;  %v1450_v10 = vld [vmem:[%s2006_s2 + $0xbc] ss:$28 sps:$4 sm:$0xff]   ;;  %v1456_v15 = vld [vmem:[%s2006_s2 + $0xf4] ss:$28 sps:$4 sm:$0xff]   ;;  %v1462_v20 = vld [vmem:[%s2006_s2 + $0x12c] ss:$28 sps:$4 sm:$0xff]  }
  0x1b   :  { %780 = vmatpush1.bf16.msra.mxu0 %v1369_v23  ;;  %832 = vmatprep.subr.bf16.mxu1 %v1403_v30  ;;  %v1468_v11 = vld [vmem:[%s2006_s2 + $0x18] ss:$28 sps:$4 sm:$0xff]   ;;  %v1473_v16 = vld [vmem:[%s2006_s2 + $0x50] ss:$28 sps:$4 sm:$0xff]   ;;  %v1478_v21 = vld [vmem:[%s2006_s2 + $0x88] ss:$28 sps:$4 sm:$0xff]  }
  0x1c   :  { %781 = vmatprep.subr.bf16.mxu0 %v1371_v24  ;;  %v1769_v12 = vld [vmem:[%s2007_s0 + $0x14] ss:$8 sps:$4 sm:$0xff]   ;;  %v1788_v17 = vld [vmem:[%s2007_s0 + $0x10] ss:$8 sps:$4 sm:$0xff]   ;;  %v1460_v23 = vld [vmem:[%s2006_s2 + $0x128] ss:$28 sps:$4 sm:$0xff]  }
  0x1d   :  { %v1448_v14 = vld [vmem:[%s2006_s2 + $0xb8] ss:$28 sps:$4 sm:$0xff]   ;;  %v1454_v19 = vld [vmem:[%s2006_s2 + $0xf0] ss:$28 sps:$4 sm:$0xff]   ;;  %v1482_v22 = vld [vmem:[%s2006_s2 + $0x280] ss:$28 sps:$4 sm:$0xff]  }
  0x1e   :  { %833 = vmatpush1.bf16.msra.mxu1 %v1406_v33  ;;  %v147_v24 = vld [vmem:[%s2008_s1] sm:$0xff]  ;;  %v149_v25 = vld [vmem:[%s2008_s1 + $0x10] sm:$0xff]  ;;  %v148_v30 = vld [vmem:[%s2008_s1 + $0x8] sm:$0xff] }
  0x1f   :  { %782 = vmatpush1.bf16.msra.mxu0 %v1375_v27  ;;  %834 = vmatprep.subr.bf16.mxu1 %v1409_v34  ;;  %v1466_v26 = vld [vmem:[%s2006_s2 + $0x164] ss:$28 sps:$4 sm:$0xff]   ;;  %v1488_v33 = vld [vmem:[%s2006_s2 + $0xf8] ss:$28 sps:$4 sm:$0xff]   ;;  %v1492_v34 = vld [vmem:[%s2006_s2 + $0x2f0] ss:$28 sps:$4 sm:$0xff]  }
  0x20   :  { %783 = vmatprep.subr.bf16.mxu0 %v1377_v28  ;;  %v1483_v27 = vld [vmem:[%s2006_s2 + $0xc0] ss:$28 sps:$4 sm:$0xff]   ;;  %v1487_v28 = vld [vmem:[%s2006_s2 + $0x2b8] ss:$28 sps:$4 sm:$0xff]   ;;  %153 = vperm.xlu0 %1345, %v147_v24  }
  0x21   :  { %163 = vperm.xlu1 %1346, %v149_v25   ;;  %v1464_v29 = vld [vmem:[%s2006_s2 + $0x160] ss:$28 sps:$4 sm:$0xff]  }
  0x22   :  { %835 = vmatpush1.bf16.msra.mxu1 %v1412_v38  ;;  %v1500_v38 = vld [vmem:[%s2006_s2 + $0x328] ss:$28 sps:$4 sm:$0xff]  }
  0x23   :  { %784 = vmatpush1.bf16.msra.mxu0 %v1381_v31  ;;  %836 = vmatprep.subr.bf16.mxu1 %v1415_v39  ;;  %v150_v31 = vld [vmem:[%s2008_s1 + $0x18] sm:$0xff]  ;;  %v1474_v39 = vld [vmem:[%s2006_s2 + $0x1d0] ss:$28 sps:$4 sm:$0xff]  }
  0x24   :  { %785 = vmatprep.subr.bf16.mxu0 %v1383_v32  ;;  %v1471_v32 = vld [vmem:[%s2006_s2 + $0x19c] ss:$28 sps:$4 sm:$0xff]   ;;  %158 = vperm.xlu0 %1345, %v148_v30  }
  0x25   :  { %168 = vperm.xlu1 %1346, %v150_v31  }
  0x26   :  { %837 = vmatpush1.bf16.msra.mxu1 %v1418_v42  ;;  %v1505_v42 = vld [vmem:[%s2006_s2 + $0x360] ss:$28 sps:$4 sm:$0xff]  }
  0x27   :  { %786 = vmatpush1.bf16.msra.mxu0 %v1387_v35  ;;  %838 = vmatprep.subr.bf16.mxu1 %v1421_v43  ;;  %v1469_v35 = vld [vmem:[%s2006_s2 + $0x198] ss:$28 sps:$4 sm:$0xff]   ;;  %v1479_v43 = vld [vmem:[%s2006_s2 + $0x208] ss:$28 sps:$4 sm:$0xff]  }
  0x28   :  { %787 = vmatprep.subr.bf16.mxu0 %v1389_v36  ;;  %v1476_v36 = vld [vmem:[%s2006_s2 + $0x1d4] ss:$28 sps:$4 sm:$0xff]  }
  0x2a   :  { %839 = vmatpush1.bf16.msra.mxu1 %v1424_v46  ;;  %v1484_v46 = vld [vmem:[%s2006_s2 + $0x240] ss:$28 sps:$4 sm:$0xff]  }
  0x2b   :  { %788 = vmatpush1.bf16.msra.mxu0 %v1393_v40  ;;  %840 = vmatprep.subr.bf16.mxu1 %v1428_v47  ;;  %v1481_v40 = vld [vmem:[%s2006_s2 + $0x20c] ss:$28 sps:$4 sm:$0xff]   ;;  %v1491_v47 = vld [vmem:[%s2006_s2 + $0x27c] ss:$28 sps:$4 sm:$0xff]  }
  0x2c   :  { %789 = vmatprep.subr.bf16.mxu0 %v1395_v41  ;;  %v1501_v41 = vld [vmem:[%s2006_s2 + $0x168] ss:$28 sps:$4 sm:$0xff]  }
  0x2e   :  { %841 = vmatpush1.bf16.msra.mxu1 %v1433_v50  ;;  %v1497_v50 = vld [vmem:[%s2006_s2 + $0x2b0] ss:$28 sps:$4 sm:$0xff]  }
  0x2f   :  { %790 = vmatpush1.bf16.msra.mxu0 %v1399_v44  ;;  %842 = vmatprep.subr.bf16.mxu1 %v1434_v51  ;;  %v1486_v44 = vld [vmem:[%s2006_s2 + $0x244] ss:$28 sps:$4 sm:$0xff]   ;;  %v1504_v51 = vld [vmem:[%s2006_s2 + $0x2ec] ss:$28 sps:$4 sm:$0xff]  }
  0x30   :  { %791 = vmatprep.subr.bf16.mxu0 %v1401_v45  ;;  %v1506_v45 = vld [vmem:[%s2006_s2 + $0x1a0] ss:$28 sps:$4 sm:$0xff]  }
  0x32   :  { %843 = vmatpush1.bf16.msra.mxu1 %v1439_v54  ;;  %v1507_v54 = vld [vmem:[%s2006_s2 + $0x320] ss:$28 sps:$4 sm:$0xff]  }
  0x33   :  { %792 = vmatpush1.bf16.msra.mxu0 %v1405_v48  ;;  %844 = vmatprep.subr.bf16.mxu1 %v1440_v55  ;;  %v1489_v48 = vld [vmem:[%s2006_s2 + $0x278] ss:$28 sps:$4 sm:$0xff]  }
  0x34   :  { %793 = vmatprep.subr.bf16.mxu0 %v1407_v49  ;;  %v1499_v49 = vld [vmem:[%s2006_s2 + $0x2b4] ss:$28 sps:$4 sm:$0xff]   ;;  %v1512_v55 = vld [vmem:[%s2006_s2 + $0x35c] ss:$28 sps:$4 sm:$0xff]  }
  0x36   :  { %845 = vmatpush1.bf16.msra.mxu1 %v1445_v58 }
  0x37   :  { %794 = vmatpush1.bf16.msra.mxu0 %v1411_v52  ;;  %846 = vmatprep.subr.bf16.mxu1 %v1446_v59  ;;  %v1502_v52 = vld [vmem:[%s2006_s2 + $0x2e8] ss:$28 sps:$4 sm:$0xff]  }
  0x38   :  { %795 = vmatprep.subr.bf16.mxu0 %v1413_v53  ;;  %v1509_v53 = vld [vmem:[%s2006_s2 + $0x324] ss:$28 sps:$4 sm:$0xff]  }
  0x3a   :  { %847 = vmatpush1.bf16.msra.mxu1 %v1451_v63 }
  0x3b   :  { %796 = vmatpush1.bf16.msra.mxu0 %v1417_v56  ;;  %848 = vmatprep.subr.bf16.mxu1 %v1452_v0  ;;  %v1510_v56 = vld [vmem:[%s2006_s2 + $0x358] ss:$28 sps:$4 sm:$0xff]  }
  0x3c   :  { %797 = vmatprep.subr.bf16.mxu0 %v1419_v57 }
  0x3e   :  { %849 = vmatpush1.bf16.msra.mxu1 %v1457_v3 }
  0x3f   :  { %798 = vmatpush1.bf16.msra.mxu0 %v1423_v60  ;;  %850 = vmatprep.subr.bf16.mxu1 %v1458_v4 }
  0x40   :  { %873 = vmatprep.subr.bf16.mxu0 %v1432_v61 }
  0x42   :  { %800 = vmatmul.mubr.bf16.vlgmr.msra.gmra.mrb[0].mxu0 %v1724_v62  ;;  %851 = vmatpush1.bf16.msra.mxu1 %v1463_v7 }
  0x43   :  { %874 = vmatpush1.bf16.msra.mxu0 %v1430_v1  ;;  %1316 = vmatprep.subr.bf16.mxu1 %v1467_v9 }
  0x44   :  { %875 = vmatprep.subr.bf16.mxu0 %v1438_v2  ;;  %809 = vmatprep.mubr.bf16.mxu0 %v1769_v12 }
  0x45   :  { %853 = vmatmul.mubr.bf16.vlgmr.msra.gmra.mrb[0].mxu1 %v1724_v62 }
  0x46   :  { %1317 = vmatpush3.bf16.msra.mxu1 %v1468_v11  ;;  %862 = vmatprep.mubr.bf16.mxu1 %v1769_v12 }
  0x47   :  { %876 = vmatpush1.bf16.msra.mxu0 %v1436_v5  ;;  %1318 = vmatprep.subr.bf16.mxu1 %v1472_v13 }
  0x48   :  { %877 = vmatprep.subr.bf16.mxu0 %v1444_v6 }
  0x4a   :  { %810 = vmatmul.mubr.bf16.gmra.mrb[4].mxu0 %v1788_v17  ;;  %1319 = vmatpush3.bf16.msra.mxu1 %v1473_v16 }
  0x4b   :  { %878 = vmatpush1.bf16.msra.mxu0 %v1442_v8  ;;  %905 = vmatprep.mubr.bf16.mxu0 %v1645_v37 }
  0x4c   :  { %879 = vmatprep.subr.bf16.mxu0 %v1450_v10  ;;  %1320 = vmatprep.subr.bf16.mxu1 %v1477_v18 }
  0x4d   :  { %863 = vmatmul.mubr.bf16.gmra.mrb[4].mxu1 %v1788_v17 }
  0x4e   :  { %1321 = vmatpush3.bf16.msra.mxu1 %v1478_v21  ;;  %958 = vmatprep.mubr.bf16.mxu1 %v1645_v37  ;;  %v1493_v37 = vld [vmem:[%s2006_s2 + $0x130] ss:$28 sps:$4 sm:$0xff]  }
  0x4f   :  { %880 = vmatpush1.bf16.msra.mxu0 %v1448_v14  ;;  %1322 = vmatprep.subr.bf16.mxu1 %v1482_v22 }
  0x50   :  { %881 = vmatprep.subr.bf16.mxu0 %v1456_v15 }
  0x52   :  { %1323 = vmatpush3.bf16.msra.mxu1 %v1483_v27 }
  0x53   :  { %882 = vmatpush1.bf16.msra.mxu0 %v1454_v19  ;;  %1324 = vmatprep.subr.bf16.mxu1 %v1487_v28 }
  0x54   :  { %883 = vmatprep.subr.bf16.mxu0 %v1462_v20 }
  0x56   :  { %1325 = vmatpush3.bf16.msra.mxu1 %v1488_v33 }
  0x57   :  { %884 = vmatpush1.bf16.msra.mxu0 %v1460_v23  ;;  %1326 = vmatprep.subr.bf16.mxu1 %v1492_v34 }
  0x58   :  { %885 = vmatprep.subr.bf16.mxu0 %v1466_v26 }
  0x5a   :  { %1327 = vmatpush3.bf16.msra.mxu1 %v1493_v37 }
  0x5b   :  { %886 = vmatpush1.bf16.msra.mxu0 %v1464_v29  ;;  %1328 = vmatprep.subr.bf16.mxu1 %v1500_v38 }
  0x5c   :  { %887 = vmatprep.subr.bf16.mxu0 %v1471_v32 }
  0x5e   :  { %1329 = vmatpush3.bf16.msra.mxu1 %v1501_v41 }
  0x5f   :  { %888 = vmatpush1.bf16.msra.mxu0 %v1469_v35  ;;  %1330 = vmatprep.subr.bf16.mxu1 %v1505_v42 }
  0x60   :  { %889 = vmatprep.subr.bf16.mxu0 %v1476_v36 }
  0x62   :  { %1331 = vmatpush3.bf16.msra.mxu1 %v1506_v45 }
  0x63   :  { %890 = vmatpush1.bf16.msra.mxu0 %v1474_v39 }
  0x64   :  { %891 = vmatprep.subr.bf16.mxu0 %v1481_v40 }
  0x65   :  { %959 = vmatmul.mubr.bf16.vlgmr.msra.gmra.mrb[8].mxu1 %v1724_v62 }
  0x66   :  { %966 = vmatprep.mubr.bf16.mxu1 %v1769_v12 }
  0x67   :  { %892 = vmatpush1.bf16.msra.mxu0 %v1479_v43 }
  0x68   :  { %893 = vmatprep.subr.bf16.mxu0 %v1486_v44 }
  0x6b   :  { %894 = vmatpush1.bf16.msra.mxu0 %v1484_v46 }
  0x6c   :  { %895 = vmatprep.subr.bf16.mxu0 %v1491_v47 }
  0x6d   :  { %967 = vmatmul.mubr.bf16.gmra.mrb[12].mxu1 %v1788_v17 }
  0x6f   :  { %896 = vmatpush1.bf16.msra.mxu0 %v1489_v48 }
  0x70   :  { %897 = vmatprep.subr.bf16.mxu0 %v1499_v49 }
  0x73   :  { %898 = vmatpush1.bf16.msra.mxu0 %v1497_v50 }
  0x74   :  { %899 = vmatprep.subr.bf16.mxu0 %v1504_v51 }
  0x77   :  { %900 = vmatpush1.bf16.msra.mxu0 %v1502_v52 }
  0x78   :  { %901 = vmatprep.subr.bf16.mxu0 %v1509_v53 }
  0x7b   :  { %902 = vmatpush1.bf16.msra.mxu0 %v1507_v54 }
  0x7c   :  { %903 = vmatprep.subr.bf16.mxu0 %v1512_v55 }
  0x7f   :  { %904 = vmatpush1.bf16.msra.mxu0 %v1510_v56 }
  0x82   :  { %906 = vmatmul.mubr.bf16.vlgmr.msra.gmra.mrb[8].mxu0 %v1724_v62 }
  0x83   :  { %915 = vmatprep.mubr.bf16.mxu0 %v1769_v12 }
  0x8a   :  { %916 = vmatmul.mubr.bf16.gmra.mrb[12].mxu0 %v1788_v17 }
  0x9f   :  { %v1918_v57 = vpop.permute.xlu0 %153 }
  0xa0   :  { %v1930_v16 = vpop.permute.xlu1 %163 }
  0xa3   :  { %v1920_v59 = vpop.permute.xlu0 %158 }
  0xa4   :  { %v1940_v37 = vpop.permute.xlu1 %168 }
 0x115   :  { %v801_v58 = vpop.f32.mrb[0].mxu0 }
 0x116   :  { %v802_v60 = vadd.f32 %v801_v58, %v1918_v57  ;;  %v803_v61 = vpop.f32.mrb[1].mxu0 }
 0x117   :  { %v804_v63 = vadd.f32 %v803_v61, %v1918_v57  ;;  %v805_v0 = vpop.f32.mrb[2].mxu0 }
 0x118   :  { %vm975_vm0 = vcmp.ge.f32.partialorder %v802_v60, 0.0  ;;  %v1003_v1 = vmul.f32 0.01, %v802_v60  ;;  %v806_v2 = vadd.f32 %v805_v0, %v1920_v59  ;;  %v807_v62 = vpop.f32.mrb[3].mxu0  ;;  %v854_v13 = vpop.f32.mrb[0].mxu1 }
 0x119   :  { %vm976_vm1 = vcmp.ge.f32.partialorder %v804_v63, 0.0  ;;  %v1004_v3 = vmul.f32 0.01, %v804_v63  ;;  %v808_v4 = vadd.f32 %v807_v62, %v1920_v59  ;;  %v855_v14 = vadd.f32 %v854_v13, %v1918_v57  ;;  %v856_v15 = vpop.f32.mrb[1].mxu1 }
 0x11a   :  { %v1031_v5 = vsel %vm975_vm0, %v802_v60, %v1003_v1  ;;  %vm982_vm2 = vcmp.ge.f32.partialorder %v806_v2, 0.0  ;;  %v1010_v6 = vmul.f32 0.01, %v806_v2  ;;  %v857_v17 = vadd.f32 %v856_v15, %v1918_v57  ;;  %v858_v18 = vpop.f32.mrb[2].mxu1 }
 0x11b   :  { %v1032_v7 = vsel %vm976_vm1, %v804_v63, %v1004_v3  ;;  %vm983_vm3 = vcmp.ge.f32.partialorder %v808_v4, 0.0  ;;  %v1011_v8 = vmul.f32 0.01, %v808_v4  ;;  %vm977_vm4 = vcmp.ge.f32.partialorder %v855_v14, 0.0  ;;  %v860_v21 = vpop.f32.mrb[3].mxu1 }
 0x11c   :  { %v1300_v9 = vpack.c.bf16 %v1032_v7, %v1031_v5  ;;  %v1038_v10 = vsel %vm982_vm2, %v806_v2, %v1010_v6  ;;  %v1005_v19 = vmul.f32 0.01, %v855_v14  ;;  %v859_v20 = vadd.f32 %v858_v18, %v1920_v59 }
 0x11d   :  { %v1039_v11 = vsel %vm983_vm3, %v808_v4, %v1011_v8  ;;  %v811_v22 = vpop.f32.mrb[4].mxu0  ;;  %vm978_vm5 = vcmp.ge.f32.partialorder %v857_v17, 0.0  ;;  %v1006_v23 = vmul.f32 0.01, %v857_v17  ;;  %v861_v24 = vadd.f32 %v860_v21, %v1920_v59 }
 0x11e   :  { %1147 = vst [vmem:[%s2009_s3] sm:$0xff] %v1300_v9  ;;  %v1304_v12 = vpack.c.bf16 %v1039_v11, %v1038_v10  ;;  %v812_v25 = vadd.f32 %v811_v22, %v1930_v16  ;;  %v813_v26 = vpop.f32.mrb[5].mxu0  ;;  %v1033_v27 = vsel %vm977_vm4, %v855_v14, %v1005_v19  ;;  %vm984_vm6 = vcmp.ge.f32.partialorder %v859_v20, 0.0 }
 0x11f   :  { %v1012_v28 = vmul.f32 0.01, %v859_v20  ;;  %v814_v29 = vadd.f32 %v813_v26, %v1930_v16  ;;  %v815_v30 = vpop.f32.mrb[6].mxu0  ;;  %v1034_v31 = vsel %vm978_vm5, %v857_v17, %v1006_v23  ;;  %vm985_vm7 = vcmp.ge.f32.partialorder %v861_v24, 0.0 }
 0x120   :  { %1152 = vst [vmem:[%s2009_s3 + $0x1c] sm:$0xff] %v1304_v12  ;;  %v1013_v32 = vmul.f32 0.01, %v861_v24  ;;  %vm989_vm8 = vcmp.ge.f32.partialorder %v812_v25, 0.0  ;;  %v817_v33 = vpop.f32.mrb[7].mxu0  ;;  %v1301_v34 = vpack.c.bf16 %v1034_v31, %v1033_v27  ;;  %v864_v39 = vpop.f32.mrb[4].mxu1  ;;  %v816_v41 = vadd.f32 %v815_v30, %v1940_v37 }
 0x121   :  { %v1040_v35 = vsel %vm984_vm6, %v859_v20, %v1012_v28  ;;  %v1017_v36 = vmul.f32 0.01, %v812_v25  ;;  %vm990_vm9 = vcmp.ge.f32.partialorder %v814_v29, 0.0  ;;  %v1018_v40 = vmul.f32 0.01, %v814_v29  ;;  %v866_v44 = vpop.f32.mrb[5].mxu1 }
 0x122   :  { %v1041_v38 = vsel %vm985_vm7, %v861_v24, %v1013_v32  ;;  %1148 = vst [vmem:[%s2009_s3 + $0x8] sm:$0xff] %v1301_v34  ;;  %v865_v43 = vadd.f32 %v864_v39, %v1930_v16  ;;  %v818_v46 = vadd.f32 %v817_v33, %v1940_v37  ;;  %v867_v47 = vadd.f32 %v866_v44, %v1930_v16  ;;  %v868_v48 = vpop.f32.mrb[6].mxu1 }
 0x123   :  { %v1305_v42 = vpack.c.bf16 %v1041_v38, %v1040_v35  ;;  %v1045_v45 = vsel %vm989_vm8, %v812_v25, %v1017_v36  ;;  %v1046_v49 = vsel %vm990_vm9, %v814_v29, %v1018_v40  ;;  %vm996_vm10 = vcmp.ge.f32.partialorder %v816_v41, 0.0  ;;  %v870_v54 = vpop.f32.mrb[7].mxu1 }
 0x124   :  { %v1024_v50 = vmul.f32 0.01, %v816_v41  ;;  %vm991_vm11 = vcmp.ge.f32.partialorder %v865_v43, 0.0  ;;  %v1019_v51 = vmul.f32 0.01, %v865_v43  ;;  %v1308_v52 = vpack.c.bf16 %v1046_v49, %v1045_v45 }
 0x125   :  { %1153 = vst [vmem:[%s2009_s3 + $0x24] sm:$0xff] %v1305_v42  ;;  %v869_v53 = vadd.f32 %v868_v48, %v1940_v37  ;;  %vm992_vm12 = vcmp.ge.f32.partialorder %v867_v47, 0.0  ;;  %v1020_v55 = vmul.f32 0.01, %v867_v47  ;;  %v871_v56 = vadd.f32 %v870_v54, %v1940_v37 }
 0x126   :  { %v1052_v58 = vsel %vm996_vm10, %v816_v41, %v1024_v50  ;;  %v1047_v60 = vsel %vm991_vm11, %v865_v43, %v1019_v51  ;;  %1156 = vst [vmem:[%s2009_s3 + $0x38] sm:$0xff] %v1308_v52  ;;  %vm997_vm14 = vcmp.ge.f32.partialorder %v818_v46, 0.0  ;;  %v1025_v1 = vmul.f32 0.01, %v818_v46 }
 0x127   :  { %vm998_vm13 = vcmp.ge.f32.partialorder %v869_v53, 0.0  ;;  %v1026_v61 = vmul.f32 0.01, %v869_v53  ;;  %v1048_v63 = vsel %vm992_vm12, %v867_v47, %v1020_v55  ;;  %vm999_vm15 = vcmp.ge.f32.partialorder %v871_v56, 0.0 }
 0x128   :  { %v1027_v0 = vmul.f32 0.01, %v871_v56  ;;  %v1309_v2 = vpack.c.bf16 %v1048_v63, %v1047_v60  ;;  %v1053_v4 = vsel %vm997_vm14, %v818_v46, %v1025_v1  ;;  %vm1150_vm1 = vcmask 257024  }
 0x129   :  { %v1054_v62 = vsel %vm998_vm13, %v869_v53, %v1026_v61  ;;  %v1312_v6 = vpack.c.bf16 %v1053_v4, %v1052_v58 }
 0x12a   :  { %v1055_v3 = vsel %vm999_vm15, %v871_v56, %v1027_v0  ;;  %1157 = vst [vmem:[%s2009_s3 + $0x40] sm:$0xff] %v1309_v2 }
 0x12b   :  { %v1313_v5 = vpack.c.bf16 %v1055_v3, %v1054_v62  ;;  %1160 = vst [vmem:[%s2009_s3 + $0x54] sm:$0xff] %v1312_v6 }
 0x12d   :  { %1161 = vst [vmem:[%s2009_s3 + $0x5c] sm:$0xff] %v1313_v5 }
 0x138   :  { %v1332_v7 = vpop.f32.mrb[8].mxu1 }
 0x139   :  { %v1333_v8 = vpop.f32.mrb[9].mxu1 }
 0x13a   :  { %v1334_v9 = vadd.f32 %v1333_v8, %v1332_v7  ;;  %v1335_v10 = vpop.f32.mrb[10].mxu1 }
 0x13b   :  { %v1336_v11 = vpop.f32.mrb[11].mxu1 }
 0x13c   :  { %v961_v12 = vadd.f32 %v1334_v9, %v1918_v57  ;;  %v1337_v13 = vadd.f32 %v1336_v11, %v1335_v10 }
 0x13e   :  { %vm981_vm0 = vcmp.ge.f32.partialorder %v961_v12, 0.0  ;;  %v1009_v14 = vmul.f32 0.01, %v961_v12  ;;  %v964_v15 = vadd.f32 %v1337_v13, %v1920_v59 }
 0x140   :  { %v1037_v17 = vsel %vm981_vm0, %v961_v12, %v1009_v14  ;;  %vm988_vm2 = vcmp.ge.f32.partialorder %v964_v15, 0.0  ;;  %v1016_v18 = vmul.f32 0.01, %v964_v15  ;;  %v1338_v19 = vpop.f32.mrb[12].mxu1 }
 0x141   :  { %v1303_v20 = vpack.c.bf16 %v1037_v17, %v1037_v17  ;;  %v1339_v21 = vpop.f32.mrb[13].mxu1 }
 0x142   :  { %v1044_v22 = vsel %vm988_vm2, %v964_v15, %v1016_v18  ;;  %v1340_v23 = vadd.f32 %v1339_v21, %v1338_v19  ;;  %v1341_v24 = vpop.f32.mrb[14].mxu1 }
 0x143   :  { %1151 = vst.msk [vmem:[%s2009_s3 + $0x18] sm:$0xf] %vm1150_vm1, %v1303_v20  ;;  %v1307_v25 = vpack.c.bf16 %v1044_v22, %v1044_v22  ;;  %v1342_v26 = vpop.f32.mrb[15].mxu1 }
 0x144   :  { %v969_v27 = vadd.f32 %v1340_v23, %v1930_v16  ;;  %v1343_v28 = vadd.f32 %v1342_v26, %v1341_v24 }
 0x145   :  { %1155 = vst.msk [vmem:[%s2009_s3 + $0x34] sm:$0xf] %vm1150_vm1, %v1307_v25 }
 0x146   :  { %vm995_vm3 = vcmp.ge.f32.partialorder %v969_v27, 0.0  ;;  %v1023_v29 = vmul.f32 0.01, %v969_v27  ;;  %v972_v30 = vadd.f32 %v1343_v28, %v1940_v37 }
 0x148   :  { %v1051_v31 = vsel %vm995_vm3, %v969_v27, %v1023_v29  ;;  %vm1002_vm4 = vcmp.ge.f32.partialorder %v972_v30, 0.0  ;;  %v1030_v32 = vmul.f32 0.01, %v972_v30 }
 0x149   :  { %v1311_v33 = vpack.c.bf16 %v1051_v31, %v1051_v31 }
 0x14a   :  { %v1058_v34 = vsel %vm1002_vm4, %v972_v30, %v1030_v32 }
 0x14b   :  { %1159 = vst.msk [vmem:[%s2009_s3 + $0x50] sm:$0xf] %vm1150_vm1, %v1311_v33  ;;  %v1315_v35 = vpack.c.bf16 %v1058_v34, %v1058_v34 }
 0x14d   :  { %1163 = vst.msk [vmem:[%s2009_s3 + $0x6c] sm:$0xf] %vm1150_vm1, %v1315_v35 }
 0x155   :  { %v907_v36 = vpop.f32.mrb[8].mxu0 }
 0x156   :  { %v908_v38 = vadd.f32 %v907_v36, %v1918_v57  ;;  %v909_v39 = vpop.f32.mrb[9].mxu0 }
 0x157   :  { %v910_v40 = vadd.f32 %v909_v39, %v1918_v57  ;;  %v911_v41 = vpop.f32.mrb[10].mxu0 }
 0x158   :  { %vm979_vm5 = vcmp.ge.f32.partialorder %v908_v38, 0.0  ;;  %v1007_v42 = vmul.f32 0.01, %v908_v38  ;;  %v912_v43 = vadd.f32 %v911_v41, %v1920_v59  ;;  %v913_v44 = vpop.f32.mrb[11].mxu0 }
 0x159   :  { %vm980_vm6 = vcmp.ge.f32.partialorder %v910_v40, 0.0  ;;  %v1008_v45 = vmul.f32 0.01, %v910_v40  ;;  %v914_v46 = vadd.f32 %v913_v44, %v1920_v59 }
 0x15a   :  { %v1035_v47 = vsel %vm979_vm5, %v908_v38, %v1007_v42  ;;  %vm986_vm7 = vcmp.ge.f32.partialorder %v912_v43, 0.0  ;;  %v1014_v48 = vmul.f32 0.01, %v912_v43 }
 0x15b   :  { %v1036_v49 = vsel %vm980_vm6, %v910_v40, %v1008_v45  ;;  %vm987_vm8 = vcmp.ge.f32.partialorder %v914_v46, 0.0  ;;  %v1015_v50 = vmul.f32 0.01, %v914_v46 }
 0x15c   :  { %v1302_v51 = vpack.c.bf16 %v1036_v49, %v1035_v47  ;;  %v1042_v52 = vsel %vm986_vm7, %v912_v43, %v1014_v48 }
 0x15d   :  { %v1043_v53 = vsel %vm987_vm8, %v914_v46, %v1015_v50  ;;  %v917_v57 = vpop.f32.mrb[12].mxu0 }
 0x15e   :  { %1149 = vst [vmem:[%s2009_s3 + $0x10] sm:$0xff] %v1302_v51  ;;  %v1306_v54 = vpack.c.bf16 %v1043_v53, %v1042_v52  ;;  %v918_v55 = vadd.f32 %v917_v57, %v1930_v16  ;;  %v919_v56 = vpop.f32.mrb[13].mxu0 }
 0x15f   :  { %v920_v59 = vadd.f32 %v919_v56, %v1930_v16  ;;  %v921_v58 = vpop.f32.mrb[14].mxu0 }
 0x160   :  { %1154 = vst [vmem:[%s2009_s3 + $0x2c] sm:$0xff] %v1306_v54  ;;  %vm993_vm9 = vcmp.ge.f32.partialorder %v918_v55, 0.0  ;;  %v1021_v60 = vmul.f32 0.01, %v918_v55  ;;  %v922_v61 = vadd.f32 %v921_v58, %v1940_v37  ;;  %v923_v63 = vpop.f32.mrb[15].mxu0 }
 0x161   :  { %vm994_vm10 = vcmp.ge.f32.partialorder %v920_v59, 0.0  ;;  %v1022_v0 = vmul.f32 0.01, %v920_v59  ;;  %v924_v1 = vadd.f32 %v923_v63, %v1940_v37 }
 0x162   :  { %v1049_v2 = vsel %vm993_vm9, %v918_v55, %v1021_v60  ;;  %vm1000_vm11 = vcmp.ge.f32.partialorder %v922_v61, 0.0  ;;  %v1028_v62 = vmul.f32 0.01, %v922_v61 }
 0x163   :  { %v1050_v3 = vsel %vm994_vm10, %v920_v59, %v1022_v0  ;;  %vm1001_vm12 = vcmp.ge.f32.partialorder %v924_v1, 0.0  ;;  %v1029_v16 = vmul.f32 0.01, %v924_v1 }
 0x164   :  { %v1310_v4 = vpack.c.bf16 %v1050_v3, %v1049_v2  ;;  %v1056_v5 = vsel %vm1000_vm11, %v922_v61, %v1028_v62 }
 0x165   :  { %v1057_v6 = vsel %vm1001_vm12, %v924_v1, %v1029_v16 }
 0x166   :  { %1158 = vst [vmem:[%s2009_s3 + $0x48] sm:$0xff] %v1310_v4  ;;  %v1314_v7 = vpack.c.bf16 %v1057_v6, %v1056_v5 }
 0x168   :  { %1162 = vst [vmem:[%s2009_s3 + $0x64] sm:$0xff] %v1314_v7 }

// kernel: net_forward.5
= control target key start
LH: loop header
LB: loop body
LE: loop exit
PB: predicated region body
PF: predicated region fallthrough
CT: control target
= control target key end

     0   :  { %v1050_v1 = vmov 0   ;;  %vm784_vm0 = vcmask 1043456   ;;  %vm785_vm2 = vcmask 277508   ;;  %s1380_s2 = inlined_call_operand.vmem [shape: bf16[512,162], index: 2, kind: input, shape index: {}]   ;;  %s1381_s0 = inlined_call_operand.vmem [shape: bf16[64,512], index: 0, kind: input, shape index: {}]   ;;  %s1382_s1 = inlined_call_operand.vmem [shape: f32[64,1], index: 1, kind: input, shape index: {}]   ;;  %s1383_s3 = inlined_call_operand.vmem [shape: bf16[64,162], index: 3, kind: output, shape index: {}]  }
   0x1   :  { %v930_v0 = vld [vmem:[%s1380_s2 + $0x4] ss:$8 sps:$4 sm:$0xff]   ;;  %928 = vset.pattern.permute.xlu0 %v1050_v1  ;;  %929 = vset.pattern.permute.xlu1 %v1050_v1  ;;  %v934_v3 = vld [vmem:[%s1380_s2] ss:$8 sps:$4 sm:$0xff]   ;;  %v936_v5 = vld [vmem:[%s1380_s2 + $0x14] ss:$8 sps:$4 sm:$0xff]  }
   0x2   :  { %v932_v2 = vld [vmem:[%s1380_s2 + $0x104] ss:$8 sps:$4 sm:$0xff]   ;;  %542 = vmatprep.subr.bf16.mxu1 %v930_v0  ;;  %v935_v4 = vld [vmem:[%s1380_s2 + $0x100] ss:$8 sps:$4 sm:$0xff]   ;;  %v938_v6 = vld [vmem:[%s1380_s2 + $0x114] ss:$8 sps:$4 sm:$0xff]  }
   0x3   :  { %615 = vmatprep.subr.bf16.mxu0 %v932_v2  ;;  %543 = vmatpush1.bf16.msra.mxu1 %v934_v3  ;;  %v940_v7 = vld [vmem:[%s1380_s2 + $0x10] ss:$8 sps:$4 sm:$0xff]   ;;  %v942_v9 = vld [vmem:[%s1380_s2 + $0x24] ss:$8 sps:$4 sm:$0xff]   ;;  %v946_v11 = vld [vmem:[%s1380_s2 + $0x20] ss:$8 sps:$4 sm:$0xff]  }
   0x4   :  { %616 = vmatpush1.bf16.msra.mxu0 %v935_v4  ;;  %544 = vmatprep.subr.bf16.mxu1 %v936_v5  ;;  %v941_v8 = vld [vmem:[%s1380_s2 + $0x110] ss:$8 sps:$4 sm:$0xff]   ;;  %v944_v10 = vld [vmem:[%s1380_s2 + $0x124] ss:$8 sps:$4 sm:$0xff]   ;;  %v947_v12 = vld [vmem:[%s1380_s2 + $0x120] ss:$8 sps:$4 sm:$0xff]  }
   0x5   :  { %617 = vmatprep.subr.bf16.mxu0 %v938_v6  ;;  %v948_v13 = vld [vmem:[%s1380_s2 + $0x34] ss:$8 sps:$4 sm:$0xff]   ;;  %v952_v15 = vld [vmem:[%s1380_s2 + $0x30] ss:$8 sps:$4 sm:$0xff]   ;;  %v954_v17 = vld [vmem:[%s1380_s2 + $0x44] ss:$8 sps:$4 sm:$0xff]  }
   0x6   :  { %v950_v14 = vld [vmem:[%s1380_s2 + $0x134] ss:$8 sps:$4 sm:$0xff]   ;;  %v953_v16 = vld [vmem:[%s1380_s2 + $0x130] ss:$8 sps:$4 sm:$0xff]   ;;  %v956_v18 = vld [vmem:[%s1380_s2 + $0x144] ss:$8 sps:$4 sm:$0xff]  }
   0x7   :  { %545 = vmatpush1.bf16.msra.mxu1 %v940_v7  ;;  %v958_v19 = vld [vmem:[%s1380_s2 + $0x40] ss:$8 sps:$4 sm:$0xff]   ;;  %v960_v21 = vld [vmem:[%s1380_s2 + $0x54] ss:$8 sps:$4 sm:$0xff]   ;;  %v964_v23 = vld [vmem:[%s1380_s2 + $0x50] ss:$8 sps:$4 sm:$0xff]  }
   0x8   :  { %618 = vmatpush1.bf16.msra.mxu0 %v941_v8  ;;  %546 = vmatprep.subr.bf16.mxu1 %v942_v9  ;;  %v959_v20 = vld [vmem:[%s1380_s2 + $0x140] ss:$8 sps:$4 sm:$0xff]   ;;  %v962_v22 = vld [vmem:[%s1380_s2 + $0x154] ss:$8 sps:$4 sm:$0xff]   ;;  %v965_v24 = vld [vmem:[%s1380_s2 + $0x150] ss:$8 sps:$4 sm:$0xff]  }
   0x9   :  { %619 = vmatprep.subr.bf16.mxu0 %v944_v10  ;;  %v966_v25 = vld [vmem:[%s1380_s2 + $0x64] ss:$8 sps:$4 sm:$0xff]   ;;  %v970_v27 = vld [vmem:[%s1380_s2 + $0x60] ss:$8 sps:$4 sm:$0xff]   ;;  %v972_v29 = vld [vmem:[%s1380_s2 + $0x74] ss:$8 sps:$4 sm:$0xff]  }
   0xa   :  { %v968_v26 = vld [vmem:[%s1380_s2 + $0x164] ss:$8 sps:$4 sm:$0xff]   ;;  %v971_v28 = vld [vmem:[%s1380_s2 + $0x160] ss:$8 sps:$4 sm:$0xff]   ;;  %v974_v30 = vld [vmem:[%s1380_s2 + $0x174] ss:$8 sps:$4 sm:$0xff]  }
   0xb   :  { %547 = vmatpush1.bf16.msra.mxu1 %v946_v11  ;;  %v976_v31 = vld [vmem:[%s1380_s2 + $0x70] ss:$8 sps:$4 sm:$0xff]   ;;  %v978_v33 = vld [vmem:[%s1380_s2 + $0x84] ss:$8 sps:$4 sm:$0xff]   ;;  %v982_v35 = vld [vmem:[%s1380_s2 + $0x80] ss:$8 sps:$4 sm:$0xff]  }
   0xc   :  { %620 = vmatpush1.bf16.msra.mxu0 %v947_v12  ;;  %548 = vmatprep.subr.bf16.mxu1 %v948_v13  ;;  %v977_v32 = vld [vmem:[%s1380_s2 + $0x170] ss:$8 sps:$4 sm:$0xff]   ;;  %v980_v34 = vld [vmem:[%s1380_s2 + $0x184] ss:$8 sps:$4 sm:$0xff]   ;;  %v983_v36 = vld [vmem:[%s1380_s2 + $0x180] ss:$8 sps:$4 sm:$0xff]  }
   0xd   :  { %621 = vmatprep.subr.bf16.mxu0 %v950_v14  ;;  %v984_v37 = vld [vmem:[%s1380_s2 + $0x94] ss:$8 sps:$4 sm:$0xff]   ;;  %v988_v39 = vld [vmem:[%s1380_s2 + $0x90] ss:$8 sps:$4 sm:$0xff]   ;;  %v990_v41 = vld [vmem:[%s1380_s2 + $0xa4] ss:$8 sps:$4 sm:$0xff]  }
   0xe   :  { %v986_v38 = vld [vmem:[%s1380_s2 + $0x194] ss:$8 sps:$4 sm:$0xff]   ;;  %v989_v40 = vld [vmem:[%s1380_s2 + $0x190] ss:$8 sps:$4 sm:$0xff]   ;;  %v992_v42 = vld [vmem:[%s1380_s2 + $0x1a4] ss:$8 sps:$4 sm:$0xff]  }
   0xf   :  { %549 = vmatpush1.bf16.msra.mxu1 %v952_v15  ;;  %v994_v43 = vld [vmem:[%s1380_s2 + $0xa0] ss:$8 sps:$4 sm:$0xff]   ;;  %v996_v45 = vld [vmem:[%s1380_s2 + $0xb4] ss:$8 sps:$4 sm:$0xff]   ;;  %v1000_v47 = vld [vmem:[%s1380_s2 + $0xb0] ss:$8 sps:$4 sm:$0xff]  }
  0x10   :  { %622 = vmatpush1.bf16.msra.mxu0 %v953_v16  ;;  %550 = vmatprep.subr.bf16.mxu1 %v954_v17  ;;  %v995_v44 = vld [vmem:[%s1380_s2 + $0x1a0] ss:$8 sps:$4 sm:$0xff]   ;;  %v998_v46 = vld [vmem:[%s1380_s2 + $0x1b4] ss:$8 sps:$4 sm:$0xff]   ;;  %v1001_v48 = vld [vmem:[%s1380_s2 + $0x1b0] ss:$8 sps:$4 sm:$0xff]  }
  0x11   :  { %623 = vmatprep.subr.bf16.mxu0 %v956_v18  ;;  %v1002_v49 = vld [vmem:[%s1380_s2 + $0xc4] ss:$8 sps:$4 sm:$0xff]   ;;  %v1006_v53 = vld [vmem:[%s1380_s2 + $0xc0] ss:$8 sps:$4 sm:$0xff]   ;;  %v1008_v55 = vld [vmem:[%s1380_s2 + $0xd4] ss:$8 sps:$4 sm:$0xff]  }
  0x12   :  { %v1028_v50 = vld [vmem:[%s1381_s0 + $0x4] ss:$16 sps:$4 sm:$0xff]   ;;  %v1031_v52 = vld [vmem:[%s1381_s0 + $0xc] ss:$16 sps:$4 sm:$0xff]   ;;  %v1007_v54 = vld [vmem:[%s1380_s2 + $0x1c0] ss:$8 sps:$4 sm:$0xff]  }
  0x13   :  { %551 = vmatpush1.bf16.msra.mxu1 %v958_v19  ;;  %v1004_v51 = vld [vmem:[%s1380_s2 + $0x1c4] ss:$8 sps:$4 sm:$0xff]   ;;  %574 = vmatprep.mubr.bf16.mxu1 %v1028_v50  ;;  %v1010_v56 = vld [vmem:[%s1380_s2 + $0x1d4] ss:$8 sps:$4 sm:$0xff]   ;;  %v1012_v57 = vld [vmem:[%s1380_s2 + $0xd0] ss:$8 sps:$4 sm:$0xff]  }
  0x14   :  { %624 = vmatpush1.bf16.msra.mxu0 %v959_v20  ;;  %552 = vmatprep.subr.bf16.mxu1 %v960_v21  ;;  %v1013_v58 = vld [vmem:[%s1380_s2 + $0x1d0] ss:$8 sps:$4 sm:$0xff]   ;;  %v1014_v59 = vld [vmem:[%s1380_s2 + $0xe4] ss:$8 sps:$4 sm:$0xff]   ;;  %v1018_v0 = vld [vmem:[%s1380_s2 + $0xe0] ss:$8 sps:$4 sm:$0xff]  }
  0x15   :  { %625 = vmatprep.subr.bf16.mxu0 %v962_v22  ;;  %647 = vmatprep.mubr.bf16.mxu0 %v1031_v52  ;;  %v1016_v60 = vld [vmem:[%s1380_s2 + $0x1e4] ss:$8 sps:$4 sm:$0xff]   ;;  %v96_v62 = vld [vmem:[%s1382_s1 + $0x10] sm:$0xff]  ;;  %v1019_v1 = vld [vmem:[%s1380_s2 + $0x1e0] ss:$8 sps:$4 sm:$0xff]  }
  0x16   :  { %v94_v61 = vld [vmem:[%s1382_s1] sm:$0xff]  ;;  %v95_v63 = vld [vmem:[%s1382_s1 + $0x8] sm:$0xff]  ;;  %114 = vperm.xlu1 %929, %v96_v62   ;;  %v97_v2 = vld [vmem:[%s1382_s1 + $0x18] sm:$0xff] }
  0x17   :  { %553 = vmatpush1.bf16.msra.mxu1 %v964_v23  ;;  %104 = vperm.xlu0 %928, %v94_v61   ;;  %v1020_v3 = vld [vmem:[%s1380_s2 + $0xf4] ss:$8 sps:$4 sm:$0xff]   ;;  %v98_v5 = vld [vmem:[%s1382_s1 + $0x20] sm:$0xff]  ;;  %v1024_v6 = vld [vmem:[%s1380_s2 + $0xf0] ss:$8 sps:$4 sm:$0xff]  }
  0x18   :  { %626 = vmatpush1.bf16.msra.mxu0 %v965_v24  ;;  %554 = vmatprep.subr.bf16.mxu1 %v966_v25  ;;  %v1022_v4 = vld [vmem:[%s1380_s2 + $0x1f4] ss:$8 sps:$4 sm:$0xff]   ;;  %v1025_v7 = vld [vmem:[%s1380_s2 + $0x1f0] ss:$8 sps:$4 sm:$0xff]   ;;  %v99_v8 = vld [vmem:[%s1382_s1 + $0x28] sm:$0xff] }
  0x19   :  { %627 = vmatprep.subr.bf16.mxu0 %v968_v26  ;;  %v1026_v9 = vld [vmem:[%s1381_s0] ss:$16 sps:$4 sm:$0xff]   ;;  %v1029_v10 = vld [vmem:[%s1381_s0 + $0x8] ss:$16 sps:$4 sm:$0xff]   ;;  %v1032_v12 = vld [vmem:[%s1381_s0 + $0x24] ss:$16 sps:$4 sm:$0xff]  }
  0x1a   :  { %119 = vperm.xlu1 %929, %v97_v2   ;;  %v100_v11 = vld [vmem:[%s1382_s1 + $0x30] sm:$0xff]  ;;  %v1034_v13 = vld [vmem:[%s1381_s0 + $0x2c] ss:$16 sps:$4 sm:$0xff]   ;;  %v1037_v16 = vld [vmem:[%s1381_s0 + $0x28] ss:$16 sps:$4 sm:$0xff]  }
  0x1b   :  { %555 = vmatpush1.bf16.msra.mxu1 %v970_v27  ;;  %109 = vperm.xlu0 %928, %v95_v63   ;;  %v101_v14 = vld [vmem:[%s1382_s1 + $0x38] sm:$0xff]  ;;  %v1036_v15 = vld [vmem:[%s1381_s0 + $0x20] ss:$16 sps:$4 sm:$0xff]   ;;  %v1038_v17 = vld [vmem:[%s1381_s0 + $0x44] ss:$16 sps:$4 sm:$0xff]  }
  0x1c   :  { %628 = vmatpush1.bf16.msra.mxu0 %v971_v28  ;;  %556 = vmatprep.subr.bf16.mxu1 %v972_v29  ;;  %v1040_v18 = vld [vmem:[%s1381_s0 + $0x4c] ss:$16 sps:$4 sm:$0xff]   ;;  %v1042_v19 = vld [vmem:[%s1381_s0 + $0x40] ss:$16 sps:$4 sm:$0xff]   ;;  %v1043_v20 = vld [vmem:[%s1381_s0 + $0x48] ss:$16 sps:$4 sm:$0xff]  }
  0x1d   :  { %629 = vmatprep.subr.bf16.mxu0 %v974_v30  ;;  %v1044_v21 = vld [vmem:[%s1381_s0 + $0x64] ss:$16 sps:$4 sm:$0xff]   ;;  %v1046_v22 = vld [vmem:[%s1381_s0 + $0x6c] ss:$16 sps:$4 sm:$0xff]   ;;  %v1048_v23 = vld [vmem:[%s1381_s0 + $0x60] ss:$16 sps:$4 sm:$0xff]  }
  0x1e   :  { %129 = vperm.xlu1 %929, %v99_v8   ;;  %v1049_v24 = vld [vmem:[%s1381_s0 + $0x68] ss:$16 sps:$4 sm:$0xff]   ;;  %vm1336_vm5 = vmor %vm785_vm2, %vm784_vm0 }
  0x1f   :  { %557 = vmatpush1.bf16.msra.mxu1 %v976_v31  ;;  %124 = vperm.xlu0 %928, %v98_v5  }
  0x20   :  { %630 = vmatpush1.bf16.msra.mxu0 %v977_v32  ;;  %558 = vmatprep.subr.bf16.mxu1 %v978_v33 }
  0x21   :  { %631 = vmatprep.subr.bf16.mxu0 %v980_v34 }
  0x22   :  { %139 = vperm.xlu1 %929, %v101_v14  }
  0x23   :  { %559 = vmatpush1.bf16.msra.mxu1 %v982_v35  ;;  %134 = vperm.xlu0 %928, %v100_v11  }
  0x24   :  { %632 = vmatpush1.bf16.msra.mxu0 %v983_v36  ;;  %560 = vmatprep.subr.bf16.mxu1 %v984_v37 }
  0x25   :  { %633 = vmatprep.subr.bf16.mxu0 %v986_v38 }
  0x27   :  { %561 = vmatpush1.bf16.msra.mxu1 %v988_v39 }
  0x28   :  { %634 = vmatpush1.bf16.msra.mxu0 %v989_v40  ;;  %562 = vmatprep.subr.bf16.mxu1 %v990_v41 }
  0x29   :  { %635 = vmatprep.subr.bf16.mxu0 %v992_v42 }
  0x2b   :  { %563 = vmatpush1.bf16.msra.mxu1 %v994_v43 }
  0x2c   :  { %636 = vmatpush1.bf16.msra.mxu0 %v995_v44  ;;  %564 = vmatprep.subr.bf16.mxu1 %v996_v45 }
  0x2d   :  { %637 = vmatprep.subr.bf16.mxu0 %v998_v46 }
  0x2f   :  { %565 = vmatpush1.bf16.msra.mxu1 %v1000_v47 }
  0x30   :  { %638 = vmatpush1.bf16.msra.mxu0 %v1001_v48  ;;  %566 = vmatprep.subr.bf16.mxu1 %v1002_v49 }
  0x31   :  { %639 = vmatprep.subr.bf16.mxu0 %v1004_v51 }
  0x33   :  { %567 = vmatpush1.bf16.msra.mxu1 %v1006_v53 }
  0x34   :  { %640 = vmatpush1.bf16.msra.mxu0 %v1007_v54  ;;  %568 = vmatprep.subr.bf16.mxu1 %v1008_v55 }
  0x35   :  { %641 = vmatprep.subr.bf16.mxu0 %v1010_v56 }
  0x37   :  { %569 = vmatpush1.bf16.msra.mxu1 %v1012_v57 }
  0x38   :  { %642 = vmatpush1.bf16.msra.mxu0 %v1013_v58  ;;  %570 = vmatprep.subr.bf16.mxu1 %v1014_v59 }
  0x39   :  { %643 = vmatprep.subr.bf16.mxu0 %v1016_v60 }
  0x3b   :  { %571 = vmatpush1.bf16.msra.mxu1 %v1018_v0 }
  0x3c   :  { %644 = vmatpush1.bf16.msra.mxu0 %v1019_v1  ;;  %572 = vmatprep.subr.bf16.mxu1 %v1020_v3 }
  0x3d   :  { %645 = vmatprep.subr.bf16.mxu0 %v1022_v4 }
  0x3f   :  { %573 = vmatpush1.bf16.msra.mxu1 %v1024_v6 }
  0x40   :  { %646 = vmatpush1.bf16.msra.mxu0 %v1025_v7 }
  0x42   :  { %575 = vmatmul.mubr.bf16.vlgmr.msra.gmra.mrb[0].mxu1 %v1026_v9 }
  0x43   :  { %648 = vmatmul.mubr.bf16.vlgmr.msra.gmra.mrb[0].mxu0 %v1029_v10  ;;  %584 = vmatprep.mubr.bf16.mxu1 %v1032_v12 }
  0x44   :  { %657 = vmatprep.mubr.bf16.mxu0 %v1034_v13 }
  0x4a   :  { %585 = vmatmul.mubr.bf16.gmra.mrb[4].mxu1 %v1036_v15 }
  0x4b   :  { %658 = vmatmul.mubr.bf16.gmra.mrb[4].mxu0 %v1037_v16  ;;  %594 = vmatprep.mubr.bf16.mxu1 %v1038_v17 }
  0x4c   :  { %667 = vmatprep.mubr.bf16.mxu0 %v1040_v18 }
  0x52   :  { %595 = vmatmul.mubr.bf16.gmra.mrb[8].mxu1 %v1042_v19 }
  0x53   :  { %668 = vmatmul.mubr.bf16.gmra.mrb[8].mxu0 %v1043_v20  ;;  %604 = vmatprep.mubr.bf16.mxu1 %v1044_v21 }
  0x54   :  { %677 = vmatprep.mubr.bf16.mxu0 %v1046_v22 }
  0x5a   :  { %605 = vmatmul.mubr.bf16.gmra.mrb[12].mxu1 %v1048_v23 }
  0x5b   :  { %678 = vmatmul.mubr.bf16.gmra.mrb[12].mxu0 %v1049_v24 }
  0x95   :  { %v115_v27 = vpop.permute.xlu1 %114 }
  0x96   :  { %v105_v25 = vpop.permute.xlu0 %104 }
  0x99   :  { %v120_v48 = vpop.permute.xlu1 %119 }
  0x9a   :  { %v110_v26 = vpop.permute.xlu0 %109 }
  0x9d   :  { %v130_v12 = vpop.permute.xlu1 %129 }
  0x9e   :  { %v125_v13 = vpop.permute.xlu0 %124 }
 0x115   :  { %v576_v28 = vpop.f32.mrb[0].mxu1 }
 0x116   :  { %v649_v29 = vpop.f32.mrb[0].mxu0  ;;  %v577_v30 = vadd.f32 %v576_v28, %v105_v25  ;;  %v578_v31 = vpop.f32.mrb[1].mxu1 }
 0x117   :  { %v651_v32 = vpop.f32.mrb[1].mxu0  ;;  %v579_v33 = vadd.f32 %v578_v31, %v105_v25  ;;  %v580_v34 = vpop.f32.mrb[2].mxu1 }
 0x118   :  { %v653_v35 = vpop.f32.mrb[2].mxu0  ;;  %v650_v36 = vadd.f32 %v649_v29, %v577_v30  ;;  %v581_v37 = vadd.f32 %v580_v34, %v110_v26  ;;  %v582_v38 = vpop.f32.mrb[3].mxu1 }
 0x119   :  { %v655_v39 = vpop.f32.mrb[3].mxu0  ;;  %v652_v40 = vadd.f32 %v651_v32, %v579_v33  ;;  %v583_v41 = vadd.f32 %v582_v38, %v110_v26  ;;  %v140_v38 = vpop.permute.xlu1 %139 }
 0x11a   :  { %vm688_vm1 = vcmp.ge.f32.partialorder %v650_v36, 0.0  ;;  %v704_v42 = vmul.f32 0.01, %v650_v36  ;;  %v654_v43 = vadd.f32 %v653_v35, %v581_v37 }
 0x11b   :  { %vm689_vm3 = vcmp.ge.f32.partialorder %v652_v40, 0.0  ;;  %v705_v44 = vmul.f32 0.01, %v652_v40  ;;  %v656_v45 = vadd.f32 %v655_v39, %v583_v41  ;;  %v135_v39 = vpop.permute.xlu0 %134 }
 0x11c   :  { %v720_v46 = vsel %vm688_vm1, %v650_v36, %v704_v42  ;;  %vm690_vm4 = vcmp.ge.f32.partialorder %v654_v43, 0.0  ;;  %v706_v47 = vmul.f32 0.01, %v654_v43 }
 0x11d   :  { %v721_v49 = vsel %vm689_vm3, %v652_v40, %v705_v44  ;;  %vm691_vm6 = vcmp.ge.f32.partialorder %v656_v45, 0.0  ;;  %v707_v51 = vmul.f32 0.01, %v656_v45  ;;  %v586_v52 = vpop.f32.mrb[4].mxu1 }
 0x11e   :  { %v659_v53 = vpop.f32.mrb[4].mxu0  ;;  %v887_v54 = vpack.c.bf16 %v721_v49, %v720_v46  ;;  %v722_v55 = vsel %vm690_vm4, %v654_v43, %v706_v47  ;;  %v587_v56 = vadd.f32 %v586_v52, %v115_v27  ;;  %v588_v57 = vpop.f32.mrb[5].mxu1 }
 0x11f   :  { %v661_v58 = vpop.f32.mrb[5].mxu0  ;;  %v723_v59 = vsel %vm691_vm6, %v656_v45, %v707_v51  ;;  %v589_v60 = vadd.f32 %v588_v57, %v115_v27  ;;  %v590_v61 = vpop.f32.mrb[6].mxu1 }
 0x120   :  { %v663_v62 = vpop.f32.mrb[6].mxu0  ;;  %787 = vst.msk [vmem:[%s1383_s3] sm:$0xff] %vm1336_vm5, %v887_v54  ;;  %v888_v63 = vpack.c.bf16 %v723_v59, %v722_v55  ;;  %v660_v0 = vadd.f32 %v659_v53, %v587_v56  ;;  %v591_v1 = vadd.f32 %v590_v61, %v120_v48  ;;  %v592_v2 = vpop.f32.mrb[7].mxu1 }
 0x121   :  { %v665_v3 = vpop.f32.mrb[7].mxu0  ;;  %v662_v4 = vadd.f32 %v661_v58, %v589_v60  ;;  %v593_v5 = vadd.f32 %v592_v2, %v120_v48 }
 0x122   :  { %788 = vst.msk [vmem:[%s1383_s3 + $0x8] sm:$0xff] %vm1336_vm5, %v888_v63  ;;  %vm692_vm7 = vcmp.ge.f32.partialorder %v660_v0, 0.0  ;;  %v708_v6 = vmul.f32 0.01, %v660_v0  ;;  %v664_v7 = vadd.f32 %v663_v62, %v591_v1 }
 0x123   :  { %vm693_vm8 = vcmp.ge.f32.partialorder %v662_v4, 0.0  ;;  %v709_v8 = vmul.f32 0.01, %v662_v4  ;;  %v666_v9 = vadd.f32 %v665_v3, %v593_v5 }
 0x124   :  { %v724_v10 = vsel %vm692_vm7, %v660_v0, %v708_v6  ;;  %vm694_vm9 = vcmp.ge.f32.partialorder %v664_v7, 0.0  ;;  %v710_v11 = vmul.f32 0.01, %v664_v7 }
 0x125   :  { %v725_v14 = vsel %vm693_vm8, %v662_v4, %v709_v8  ;;  %vm695_vm10 = vcmp.ge.f32.partialorder %v666_v9, 0.0  ;;  %v711_v15 = vmul.f32 0.01, %v666_v9  ;;  %v596_v16 = vpop.f32.mrb[8].mxu1 }
 0x126   :  { %v669_v17 = vpop.f32.mrb[8].mxu0  ;;  %v889_v18 = vpack.c.bf16 %v725_v14, %v724_v10  ;;  %v726_v19 = vsel %vm694_vm9, %v664_v7, %v710_v11  ;;  %v597_v20 = vadd.f32 %v596_v16, %v125_v13  ;;  %v598_v21 = vpop.f32.mrb[9].mxu1 }
 0x127   :  { %v671_v22 = vpop.f32.mrb[9].mxu0  ;;  %v727_v23 = vsel %vm695_vm10, %v666_v9, %v711_v15  ;;  %v599_v24 = vadd.f32 %v598_v21, %v125_v13  ;;  %v600_v25 = vpop.f32.mrb[10].mxu1 }
 0x128   :  { %v673_v26 = vpop.f32.mrb[10].mxu0  ;;  %789 = vst.msk [vmem:[%s1383_s3 + $0x10] sm:$0xff] %vm1336_vm5, %v889_v18  ;;  %v890_v27 = vpack.c.bf16 %v727_v23, %v726_v19  ;;  %v670_v28 = vadd.f32 %v669_v17, %v597_v20  ;;  %v601_v29 = vadd.f32 %v600_v25, %v130_v12  ;;  %v602_v30 = vpop.f32.mrb[11].mxu1 }
 0x129   :  { %v675_v31 = vpop.f32.mrb[11].mxu0  ;;  %v672_v32 = vadd.f32 %v671_v22, %v599_v24  ;;  %v603_v33 = vadd.f32 %v602_v30, %v130_v12 }
 0x12a   :  { %790 = vst.msk [vmem:[%s1383_s3 + $0x18] sm:$0xff] %vm1336_vm5, %v890_v27  ;;  %vm696_vm11 = vcmp.ge.f32.partialorder %v670_v28, 0.0  ;;  %v712_v34 = vmul.f32 0.01, %v670_v28  ;;  %v674_v35 = vadd.f32 %v673_v26, %v601_v29 }
 0x12b   :  { %vm697_vm12 = vcmp.ge.f32.partialorder %v672_v32, 0.0  ;;  %v713_v36 = vmul.f32 0.01, %v672_v32  ;;  %v676_v37 = vadd.f32 %v675_v31, %v603_v33 }
 0x12c   :  { %v728_v40 = vsel %vm696_vm11, %v670_v28, %v712_v34  ;;  %vm698_vm13 = vcmp.ge.f32.partialorder %v674_v35, 0.0  ;;  %v714_v41 = vmul.f32 0.01, %v674_v35 }
 0x12d   :  { %v729_v42 = vsel %vm697_vm12, %v672_v32, %v713_v36  ;;  %vm699_vm14 = vcmp.ge.f32.partialorder %v676_v37, 0.0  ;;  %v715_v43 = vmul.f32 0.01, %v676_v37  ;;  %v606_v44 = vpop.f32.mrb[12].mxu1 }
 0x12e   :  { %v679_v45 = vpop.f32.mrb[12].mxu0  ;;  %v891_v46 = vpack.c.bf16 %v729_v42, %v728_v40  ;;  %v730_v47 = vsel %vm698_vm13, %v674_v35, %v714_v41  ;;  %v607_v48 = vadd.f32 %v606_v44, %v135_v39  ;;  %v608_v49 = vpop.f32.mrb[13].mxu1 }
 0x12f   :  { %v681_v51 = vpop.f32.mrb[13].mxu0  ;;  %v731_v52 = vsel %vm699_vm14, %v676_v37, %v715_v43  ;;  %v609_v53 = vadd.f32 %v608_v49, %v135_v39  ;;  %v610_v54 = vpop.f32.mrb[14].mxu1 }
 0x130   :  { %v683_v55 = vpop.f32.mrb[14].mxu0  ;;  %791 = vst.msk [vmem:[%s1383_s3 + $0x20] sm:$0xff] %vm1336_vm5, %v891_v46  ;;  %v892_v56 = vpack.c.bf16 %v731_v52, %v730_v47  ;;  %v680_v57 = vadd.f32 %v679_v45, %v607_v48  ;;  %v611_v58 = vadd.f32 %v610_v54, %v140_v38  ;;  %v612_v59 = vpop.f32.mrb[15].mxu1 }
 0x131   :  { %v685_v60 = vpop.f32.mrb[15].mxu0  ;;  %v682_v61 = vadd.f32 %v681_v51, %v609_v53  ;;  %v613_v62 = vadd.f32 %v612_v59, %v140_v38 }
 0x132   :  { %792 = vst.msk [vmem:[%s1383_s3 + $0x28] sm:$0xff] %vm1336_vm5, %v892_v56  ;;  %vm700_vm15 = vcmp.ge.f32.partialorder %v680_v57, 0.0  ;;  %v716_v63 = vmul.f32 0.01, %v680_v57  ;;  %v684_v0 = vadd.f32 %v683_v55, %v611_v58 }
 0x133   :  { %vm701_vm0 = vcmp.ge.f32.partialorder %v682_v61, 0.0  ;;  %v717_v1 = vmul.f32 0.01, %v682_v61  ;;  %v686_v2 = vadd.f32 %v685_v60, %v613_v62 }
 0x134   :  { %v732_v3 = vsel %vm700_vm15, %v680_v57, %v716_v63  ;;  %vm702_vm1 = vcmp.ge.f32.partialorder %v684_v0, 0.0  ;;  %v718_v4 = vmul.f32 0.01, %v684_v0 }
 0x135   :  { %v733_v5 = vsel %vm701_vm0, %v682_v61, %v717_v1  ;;  %vm703_vm2 = vcmp.ge.f32.partialorder %v686_v2, 0.0  ;;  %v719_v6 = vmul.f32 0.01, %v686_v2 }
 0x136   :  { %v893_v7 = vpack.c.bf16 %v733_v5, %v732_v3  ;;  %v734_v8 = vsel %vm702_vm1, %v684_v0, %v718_v4 }
 0x137   :  { %v735_v9 = vsel %vm703_vm2, %v686_v2, %v719_v6 }
 0x138   :  { %793 = vst.msk [vmem:[%s1383_s3 + $0x30] sm:$0xff] %vm1336_vm5, %v893_v7  ;;  %v894_v10 = vpack.c.bf16 %v735_v9, %v734_v8 }
 0x13a   :  { %794 = vst.msk [vmem:[%s1383_s3 + $0x38] sm:$0xff] %vm1336_vm5, %v894_v10 }

// kernel: net_forward.6
= control target key start
LH: loop header
LB: loop body
LE: loop exit
PB: predicated region body
PF: predicated region fallthrough
CT: control target
= control target key end

     0   :  { %s1264_s12 = smov 0   ;;  %s1431_s0 = inlined_call_operand.vmem [shape: bf16[64,576], index: 0, kind: input, shape index: {}]   ;;  %s1432_s1 = inlined_call_operand.vmem [shape: f32[64,1], index: 1, kind: input, shape index: {}]   ;;  %s1433_s2 = inlined_call_operand.vmem [shape: bf16[2,576,49], index: 2, kind: input, shape index: {}]   ;;  %s1434_s3 = inlined_call_operand.vmem [shape: bf16[2,64,49], index: 3, kind: output, shape index: {}]  }
   0x1 LB: > { %s960_s13 = sadd.s32 4294967295, %s1241_s12   ;;  %p964_p0 = scmp.ge.s32.totalorder %s1241_s12, 1  ;;  %s1241_s12 = sphi %s1264_s12, %s13_s12  }
   0x2   : > { %p137_p1 = scmp.lt.s32.totalorder %s1241_s12, 3 }
   0x4   : > { %p138_p2 = pnand %p964_p0, %p137_p1 }
   0x5   : > { %p161_p3 = scmp.lt.s32.totalorder (!%p138_p2), %s960_s13, 1  ;;  %v1205_v0 = vld [vmem:[%s1431_s0 + $0x4] ss:$20 sps:$4 sm:$0xff] (!%p138_p2)   ;;  %v1208_v1 = vld [vmem:[%s1431_s0 + $0xc] ss:$20 sps:$4 sm:$0xff] (!%p138_p2)   ;;  %v1243_v2 = vmov (!%p138_p2), 0  }
   0x6   : > { %141 = sbr.rel (%p138_p2) target bundleno = 311 (0x137), region = 32  ;;  %1169 = vset.pattern.permute.xlu0 (!%p138_p2), %v1243_v2  ;;  %1170 = vset.pattern.permute.xlu1 (!%p138_p2), %v1243_v2  ;;  %v1203_v33 = vld [vmem:[%s1431_s0] ss:$20 sps:$4 sm:$0xff] (!%p138_p2)   ;;  %v1206_v35 = vld [vmem:[%s1431_s0 + $0x8] ss:$20 sps:$4 sm:$0xff] (!%p138_p2)   ;;  %vm632_vm0 = vcmask (!%p138_p2), 523264  }
   0x7   : > { %677 = vmatprep.mubr.bf16.mxu0 (!%p138_p2), %v1205_v0  ;;  %742 = vmatprep.mubr.bf16.mxu1 (!%p138_p2), %v1208_v1  ;;  %v1210_v38 = vld [vmem:[%s1431_s0 + $0x2c] ss:$20 sps:$4 sm:$0xff] (!%p138_p2)   ;;  %v1212_v39 = vld [vmem:[%s1431_s0 + $0x34] ss:$20 sps:$4 sm:$0xff] (!%p138_p2)   ;;  %v1215_v43 = vld [vmem:[%s1431_s0 + $0x30] ss:$20 sps:$4 sm:$0xff] (!%p138_p2)  }
   0x8   : > { %v1214_v42 = vld [vmem:[%s1431_s0 + $0x28] ss:$20 sps:$4 sm:$0xff] (!%p138_p2)   ;;  %v268_v47 = vld [vmem:[%s1432_s1] sm:$0xff] (!%p138_p2)  ;;  %v270_v48 = vld [vmem:[%s1432_s1 + $0x10] sm:$0xff] (!%p138_p2)  ;;  %vm896_vm1 = vcmask (!%p138_p2), 396288  }
   0x9   : > { %v1217_v44 = vld [vmem:[%s1431_s0 + $0x54] ss:$20 sps:$4 sm:$0xff] (!%p138_p2)   ;;  %v1219_v45 = vld [vmem:[%s1431_s0 + $0x5c] ss:$20 sps:$4 sm:$0xff] (!%p138_p2)   ;;  %278 = vperm.xlu0 (!%p138_p2), %1169, %v268_v47   ;;  %v1222_v50 = vld [vmem:[%s1431_s0 + $0x58] ss:$20 sps:$4 sm:$0xff] (!%p138_p2)   ;;  %288 = vperm.xlu1 (!%p138_p2), %1170, %v270_v48  }
   0xa   : > { %v1221_v49 = vld [vmem:[%s1431_s0 + $0x50] ss:$20 sps:$4 sm:$0xff] (!%p138_p2)   ;;  %v269_v52 = vld [vmem:[%s1432_s1 + $0x8] sm:$0xff] (!%p138_p2)  ;;  %v271_v54 = vld [vmem:[%s1432_s1 + $0x18] sm:$0xff] (!%p138_p2) }
   0xb   : > { %v1224_v51 = vld [vmem:[%s1431_s0 + $0x7c] ss:$20 sps:$4 sm:$0xff] (!%p138_p2)   ;;  %v1226_v53 = vld [vmem:[%s1431_s0 + $0x84] ss:$20 sps:$4 sm:$0xff] (!%p138_p2)   ;;  %v273_v56 = vld [vmem:[%s1432_s1 + $0x28] sm:$0xff] (!%p138_p2) }
   0xc   : > { %v272_v55 = vld [vmem:[%s1432_s1 + $0x20] sm:$0xff] (!%p138_p2)  ;;  %v1228_v57 = vld [vmem:[%s1431_s0 + $0x78] ss:$20 sps:$4 sm:$0xff] (!%p138_p2)   ;;  %v274_v60 = vld [vmem:[%s1432_s1 + $0x30] sm:$0xff] (!%p138_p2) }
   0xd   : > { %s1436_s13 = smov (!%p161_p3, %s960_s13), 1  ;;  %283 = vperm.xlu0 %1169, %v269_v52   ;;  %293 = vperm.xlu1 %1170, %v271_v54   ;;  %v1229_v58 = vld [vmem:[%s1431_s0 + $0x80] ss:$20 sps:$4 sm:$0xff]   ;;  %v1231_v59 = vld [vmem:[%s1431_s0 + $0x10] ss:$20 sps:$4 sm:$0xff]   ;;  %v275_v62 = vld [vmem:[%s1432_s1 + $0x38] sm:$0xff] }
   0xe   : > { %s1159_s18 = smul.u32 288, %s1436_s13  ;;  %v1232_v61 = vld [vmem:[%s1431_s0 + $0x60] ss:$20 sps:$4 sm:$0xff]   ;;  %v1233_v63 = vld [vmem:[%s1431_s0 + $0x38] ss:$20 sps:$4 sm:$0xff]   ;;  %s1038_s24 = sshll.u32 %s1436_s13, 5 }
   0xf   : > { %v1234_v0 = vld [vmem:[%s1431_s0 + $0x88] ss:$20 sps:$4 sm:$0xff]   ;;  %s1409_s13 = scalar_lea.vmem %s1434_s3, %s1038_s24 }
  0x10   : > { %s1284_s21 = scalar_lea.vmem %s1433_s2, %s1159_s18 }
  0x11   : > { %v1171_v3 = vld [vmem:[%s1284_s21 + $0x40] sm:$0xff]   ;;  %v1175_v7 = vld [vmem:[%s1284_s21 + $0x48] sm:$0xff]   ;;  %v1179_v11 = vld [vmem:[%s1284_s21 + $0x50] sm:$0xff]   ;;  %298 = vperm.xlu0 %1169, %v272_v55   ;;  %303 = vperm.xlu1 %1170, %v273_v56  }
  0x12   : > { %v1172_v4 = vld [vmem:[%s1284_s21 + $0xc0] sm:$0xff]   ;;  %1047 = vmatprep.subr.bf16.mxu0 %v1171_v3  ;;  %v1176_v8 = vld [vmem:[%s1284_s21 + $0xc8] sm:$0xff]   ;;  %v1180_v12 = vld [vmem:[%s1284_s21 + $0xd0] sm:$0xff]  }
  0x13   : > { %v1173_v5 = vld [vmem:[%s1284_s21] sm:$0xff]   ;;  %1087 = vmatprep.subr.bf16.mxu1 %v1172_v4  ;;  %v1177_v9 = vld [vmem:[%s1284_s21 + $0x8] sm:$0xff]   ;;  %v1181_v13 = vld [vmem:[%s1284_s21 + $0x10] sm:$0xff]  }
  0x14   : > { %v1174_v6 = vld [vmem:[%s1284_s21 + $0x80] sm:$0xff]   ;;  %1048 = vmatpush3.bf16.msra.mxu0 %v1173_v5  ;;  %v1178_v10 = vld [vmem:[%s1284_s21 + $0x88] sm:$0xff]   ;;  %v1182_v14 = vld [vmem:[%s1284_s21 + $0x90] sm:$0xff]  }
  0x15   : > { %1088 = vmatpush3.bf16.msra.mxu1 %v1174_v6  ;;  %1049 = vmatprep.subr.bf16.mxu0 %v1175_v7  ;;  %v1183_v15 = vld [vmem:[%s1284_s21 + $0x58] sm:$0xff]   ;;  %v1187_v19 = vld [vmem:[%s1284_s21 + $0x60] sm:$0xff]   ;;  %v1191_v23 = vld [vmem:[%s1284_s21 + $0x68] sm:$0xff]  }
  0x16   : > { %1089 = vmatprep.subr.bf16.mxu1 %v1176_v8  ;;  %v1184_v16 = vld [vmem:[%s1284_s21 + $0xd8] sm:$0xff]   ;;  %v1188_v20 = vld [vmem:[%s1284_s21 + $0xe0] sm:$0xff]   ;;  %v1192_v24 = vld [vmem:[%s1284_s21 + $0xe8] sm:$0xff]   ;;  %308 = vperm.xlu0 %1169, %v274_v60  }
  0x17   : > { %v1185_v17 = vld [vmem:[%s1284_s21 + $0x18] sm:$0xff]   ;;  %v1189_v21 = vld [vmem:[%s1284_s21 + $0x20] sm:$0xff]   ;;  %v1193_v25 = vld [vmem:[%s1284_s21 + $0x28] sm:$0xff]   ;;  %313 = vperm.xlu1 %1170, %v275_v62  }
  0x18   : > { %1050 = vmatpush3.bf16.msra.mxu0 %v1177_v9  ;;  %v1186_v18 = vld [vmem:[%s1284_s21 + $0x98] sm:$0xff]   ;;  %v1190_v22 = vld [vmem:[%s1284_s21 + $0xa0] sm:$0xff]   ;;  %v1194_v26 = vld [vmem:[%s1284_s21 + $0xa8] sm:$0xff]  }
  0x19   : > { %1090 = vmatpush3.bf16.msra.mxu1 %v1178_v10  ;;  %1051 = vmatprep.subr.bf16.mxu0 %v1179_v11  ;;  %v1195_v27 = vld [vmem:[%s1284_s21 + $0x70] sm:$0xff]   ;;  %v1199_v31 = vld [vmem:[%s1284_s21 + $0x78] sm:$0xff]   ;;  %v1209_v37 = vld [vmem:[%s1284_s21 + $0x100] sm:$0xff]  }
  0x1a   : > { %1091 = vmatprep.subr.bf16.mxu1 %v1180_v12  ;;  %v1196_v28 = vld [vmem:[%s1284_s21 + $0xf0] sm:$0xff]   ;;  %v1200_v32 = vld [vmem:[%s1284_s21 + $0xf8] sm:$0xff]   ;;  %v1216_v40 = vld [vmem:[%s1284_s21 + $0x108] sm:$0xff]  }
  0x1b   : > { %v1197_v29 = vld [vmem:[%s1284_s21 + $0x30] sm:$0xff]   ;;  %v1201_v34 = vld [vmem:[%s1284_s21 + $0x38] sm:$0xff]  }
  0x1c   : > { %1052 = vmatpush3.bf16.msra.mxu0 %v1181_v13  ;;  %v1198_v30 = vld [vmem:[%s1284_s21 + $0xb0] sm:$0xff]   ;;  %v1202_v36 = vld [vmem:[%s1284_s21 + $0xb8] sm:$0xff]  }
  0x1d   : > { %1092 = vmatpush3.bf16.msra.mxu1 %v1182_v14  ;;  %1053 = vmatprep.subr.bf16.mxu0 %v1183_v15  ;;  %v1223_v41 = vld [vmem:[%s1284_s21 + $0x110] sm:$0xff]   ;;  %v1230_v46 = vld [vmem:[%s1284_s21 + $0x118] sm:$0xff]  }
  0x1e   : > { %1093 = vmatprep.subr.bf16.mxu1 %v1184_v16 }
  0x20   : > { %1054 = vmatpush3.bf16.msra.mxu0 %v1185_v17 }
  0x21   : > { %1094 = vmatpush3.bf16.msra.mxu1 %v1186_v18  ;;  %1055 = vmatprep.subr.bf16.mxu0 %v1187_v19 }
  0x22   : > { %1095 = vmatprep.subr.bf16.mxu1 %v1188_v20 }
  0x24   : > { %1056 = vmatpush3.bf16.msra.mxu0 %v1189_v21 }
  0x25   : > { %1096 = vmatpush3.bf16.msra.mxu1 %v1190_v22  ;;  %1057 = vmatprep.subr.bf16.mxu0 %v1191_v23 }
  0x26   : > { %1097 = vmatprep.subr.bf16.mxu1 %v1192_v24 }
  0x28   : > { %1058 = vmatpush3.bf16.msra.mxu0 %v1193_v25 }
  0x29   : > { %1098 = vmatpush3.bf16.msra.mxu1 %v1194_v26  ;;  %1059 = vmatprep.subr.bf16.mxu0 %v1195_v27 }
  0x2a   : > { %1099 = vmatprep.subr.bf16.mxu1 %v1196_v28 }
  0x2c   : > { %1060 = vmatpush3.bf16.msra.mxu0 %v1197_v29 }
  0x2d   : > { %1100 = vmatpush3.bf16.msra.mxu1 %v1198_v30  ;;  %1061 = vmatprep.subr.bf16.mxu0 %v1199_v31 }
  0x2e   : > { %1101 = vmatprep.subr.bf16.mxu1 %v1200_v32 }
  0x30   : > { %1062 = vmatpush3.bf16.msra.mxu0 %v1201_v34 }
  0x31   : > { %1102 = vmatpush3.bf16.msra.mxu1 %v1202_v36  ;;  %1135 = vmatprep.subr.bf16.mxu0 %v1209_v37 }
  0x32   : > { %1151 = vmatprep.subr.bf16.mxu1 %v1209_v37 }
  0x33   : > { %678 = vmatmul.mubr.bf16.vlgmr.msra.gmra.mrb[0].mxu0 %v1203_v33 }
  0x34   : > { %743 = vmatmul.mubr.bf16.vlgmr.msra.gmra.mrb[0].mxu1 %v1206_v35  ;;  %1136 = vmatpush3.bf16.msra.mxu0 %v1209_v37 }
  0x35   : > { %1155 = vmatpush3.bf16.msra.mxu1 %v1209_v37  ;;  %685 = vmatprep.mubr.bf16.mxu0 %v1210_v38 }
  0x36   : > { %750 = vmatprep.mubr.bf16.mxu1 %v1212_v39  ;;  %1137 = vmatprep.subr.bf16.mxu0 %v1216_v40 }
  0x37   : > { %1152 = vmatprep.subr.bf16.mxu1 %v1216_v40 }
  0x38   : > { %1138 = vmatpush3.bf16.msra.mxu0 %v1216_v40 }
  0x39   : > { %1156 = vmatpush3.bf16.msra.mxu1 %v1216_v40  ;;  %1139 = vmatprep.subr.bf16.mxu0 %v1223_v41 }
  0x3a   : > { %1153 = vmatprep.subr.bf16.mxu1 %v1223_v41 }
  0x3b   : > { %686 = vmatmul.mubr.bf16.gmra.mrb[4].mxu0 %v1214_v42 }
  0x3c   : > { %751 = vmatmul.mubr.bf16.gmra.mrb[4].mxu1 %v1215_v43  ;;  %693 = vmatprep.mubr.bf16.mxu0 %v1217_v44 }
  0x3d   : > { %758 = vmatprep.mubr.bf16.mxu1 %v1219_v45  ;;  %1140 = vmatpush3.bf16.msra.mxu0 %v1223_v41 }
  0x3e   : > { %1157 = vmatpush3.bf16.msra.mxu1 %v1223_v41  ;;  %1141 = vmatprep.subr.bf16.mxu0 %v1230_v46 }
  0x3f   : > { %1154 = vmatprep.subr.bf16.mxu1 %v1230_v46 }
  0x41   : > { %1142 = vmatpush3.bf16.msra.mxu0 %v1230_v46 }
  0x42   : > { %1158 = vmatpush3.bf16.msra.mxu1 %v1230_v46 }
  0x43   : > { %694 = vmatmul.mubr.bf16.gmra.mrb[8].mxu0 %v1221_v49 }
  0x44   : > { %759 = vmatmul.mubr.bf16.gmra.mrb[8].mxu1 %v1222_v50  ;;  %701 = vmatprep.mubr.bf16.mxu0 %v1224_v51 }
  0x45   : > { %766 = vmatprep.mubr.bf16.mxu1 %v1226_v53 }
  0x4b   : > { %702 = vmatmul.mubr.bf16.gmra.mrb[12].mxu0 %v1228_v57 }
  0x4c   : > { %767 = vmatmul.mubr.bf16.gmra.mrb[12].mxu1 %v1229_v58  ;;  %1143 = vmatprep.mubr.msk.bf16.mxu0 %vm632_vm0, %v1231_v59 }
  0x4d   : > { %1147 = vmatprep.mubr.msk.bf16.mxu1 %vm632_vm0, %v1232_v61 }
  0x53   : > { %1144 = vmatmul.mubr.msk.bf16.vlgmr.msra.gmra.mrb[16].mxu0 %vm632_vm0, %v1233_v63 }
  0x54   : > { %1148 = vmatmul.mubr.msk.bf16.vlgmr.msra.gmra.mrb[16].mxu1 %vm632_vm0, %v1234_v0 }
  0x88   : > { %v279_v1 = vpop.permute.xlu0 %278  ;;  %v289_v18 = vpop.permute.xlu1 %288 }
  0x8c   : > { %v284_v3 = vpop.permute.xlu0 %283  ;;  %v294_v33 = vpop.permute.xlu1 %293 }
  0x90   : > { %v299_v36 = vpop.permute.xlu0 %298  ;;  %v304_v50 = vpop.permute.xlu1 %303 }
  0x95   : > { %v309_v54 = vpop.permute.xlu0 %308 }
 0x106   : > { %v1063_v2 = vpop.f32.mrb[0].mxu0 }
 0x107   : > { %v1103_v4 = vpop.f32.mrb[0].mxu1  ;;  %v1064_v5 = vpop.f32.mrb[1].mxu0 }
 0x108   : > { %v1065_v6 = vadd.f32 %v1064_v5, %v1063_v2  ;;  %v1104_v7 = vpop.f32.mrb[1].mxu1  ;;  %v1066_v8 = vpop.f32.mrb[2].mxu0 }
 0x109   : > { %v1105_v9 = vadd.f32 %v1104_v7, %v1103_v4  ;;  %v1106_v10 = vpop.f32.mrb[2].mxu1  ;;  %v1067_v11 = vpop.f32.mrb[3].mxu0 }
 0x10a   : > { %v680_v12 = vadd.f32 %v1065_v6, %v279_v1  ;;  %v1068_v13 = vadd.f32 %v1067_v11, %v1066_v8  ;;  %v1107_v14 = vpop.f32.mrb[3].mxu1  ;;  %v314_v4 = vpop.permute.xlu1 %313 }
 0x10b   : > { %v1108_v15 = vadd.f32 %v1107_v14, %v1106_v10 }
 0x10c   : > { %v683_v16 = vadd.f32 %v1068_v13, %v284_v3  ;;  %v1400_v17 = vadd.f32 %v1105_v9, %v680_v12 }
 0x10e   : > { %v1069_v19 = vpop.f32.mrb[4].mxu0  ;;  %v1402_v20 = vadd.f32 %v1108_v15, %v683_v16 }
 0x10f   : > { %v1109_v21 = vpop.f32.mrb[4].mxu1  ;;  %v1070_v22 = vpop.f32.mrb[5].mxu0 }
 0x110   : > { %v1071_v23 = vadd.f32 %v1070_v22, %v1069_v19  ;;  %v1110_v24 = vpop.f32.mrb[5].mxu1  ;;  %v1072_v25 = vpop.f32.mrb[6].mxu0 }
 0x111   : > { %v1111_v26 = vadd.f32 %v1110_v24, %v1109_v21  ;;  %v1112_v27 = vpop.f32.mrb[6].mxu1  ;;  %v1073_v28 = vpop.f32.mrb[7].mxu0 }
 0x112   : > { %v688_v29 = vadd.f32 %v1071_v23, %v289_v18  ;;  %v1074_v30 = vadd.f32 %v1073_v28, %v1072_v25  ;;  %v1113_v31 = vpop.f32.mrb[7].mxu1 }
 0x113   : > { %v1114_v32 = vadd.f32 %v1113_v31, %v1112_v27 }
 0x114   : > { %v691_v34 = vadd.f32 %v1074_v30, %v294_v33  ;;  %v753_v35 = vadd.f32 %v1111_v26, %v688_v29 }
 0x116   : > { %v1075_v37 = vpop.f32.mrb[8].mxu0  ;;  %v756_v38 = vadd.f32 %v1114_v32, %v691_v34 }
 0x117   : > { %v1115_v39 = vpop.f32.mrb[8].mxu1  ;;  %v1076_v40 = vpop.f32.mrb[9].mxu0 }
 0x118   : > { %v1077_v41 = vadd.f32 %v1076_v40, %v1075_v37  ;;  %v1116_v42 = vpop.f32.mrb[9].mxu1  ;;  %v1078_v43 = vpop.f32.mrb[10].mxu0 }
 0x119   : > { %v1117_v44 = vadd.f32 %v1116_v42, %v1115_v39  ;;  %v1118_v45 = vpop.f32.mrb[10].mxu1  ;;  %v1079_v46 = vpop.f32.mrb[11].mxu0 }
 0x11a   : > { %v696_v47 = vadd.f32 %v1077_v41, %v299_v36  ;;  %v1080_v48 = vadd.f32 %v1079_v46, %v1078_v43  ;;  %v1119_v49 = vpop.f32.mrb[11].mxu1 }
 0x11b   : > { %v1120_v51 = vadd.f32 %v1119_v49, %v1118_v45 }
 0x11c   : > { %v699_v52 = vadd.f32 %v1080_v48, %v304_v50  ;;  %v761_v53 = vadd.f32 %v1117_v44, %v696_v47 }
 0x11e   : > { %v1081_v55 = vpop.f32.mrb[12].mxu0  ;;  %v764_v56 = vadd.f32 %v1120_v51, %v699_v52 }
 0x11f   : > { %v1121_v57 = vpop.f32.mrb[12].mxu1  ;;  %v1082_v58 = vpop.f32.mrb[13].mxu0 }
 0x120   : > { %v1083_v59 = vadd.f32 %v1082_v58, %v1081_v55  ;;  %v1122_v60 = vpop.f32.mrb[13].mxu1  ;;  %v1084_v61 = vpop.f32.mrb[14].mxu0 }
 0x121   : > { %v1123_v62 = vadd.f32 %v1122_v60, %v1121_v57  ;;  %v1124_v63 = vpop.f32.mrb[14].mxu1  ;;  %v1085_v0 = vpop.f32.mrb[15].mxu0 }
 0x122   : > { %v704_v1 = vadd.f32 %v1083_v59, %v309_v54  ;;  %v1086_v2 = vadd.f32 %v1085_v0, %v1084_v61  ;;  %v1125_v3 = vpop.f32.mrb[15].mxu1 }
 0x123   : > { %v1126_v5 = vadd.f32 %v1125_v3, %v1124_v63 }
 0x124   : > { %v707_v6 = vadd.f32 %v1086_v2, %v314_v4  ;;  %v769_v7 = vadd.f32 %v1123_v62, %v704_v1 }
 0x126   : > { %v1145_v8 = vpop.f32.mrb[16].mxu0  ;;  %v772_v9 = vadd.f32 %v1126_v5, %v707_v6 }
 0x127   : > { %v818_v10 = vadd.f32 %v1145_v8, %v753_v35  ;;  %v1149_v11 = vpop.f32.mrb[16].mxu1  ;;  %v809_v12 = vpop.f32.mrb[17].mxu0 }
 0x128   : > { %v834_v13 = vadd.f32 %v1149_v11, %v769_v7  ;;  %v810_v14 = vadd.f32 %v809_v12, %v1400_v17  ;;  %v825_v15 = vpop.f32.mrb[17].mxu1  ;;  %v1146_v16 = vpop.f32.mrb[18].mxu0 }
 0x129   : > { %vm842_vm2 = vcmp.ge.f32.partialorder %v818_v10, 0.0  ;;  %v850_v18 = vmul.f32 0.01, %v818_v10  ;;  %v826_v19 = vadd.f32 %v825_v15, %v761_v53  ;;  %v821_v21 = vadd.f32 %v1146_v16, %v756_v38  ;;  %v1150_v22 = vpop.f32.mrb[18].mxu1  ;;  %v812_v23 = vpop.f32.mrb[19].mxu0 }
 0x12a   : > { %vm846_vm3 = vcmp.ge.f32.partialorder %v834_v13, 0.0  ;;  %v854_v24 = vmul.f32 0.01, %v834_v13  ;;  %vm840_vm4 = vcmp.ge.f32.partialorder %v810_v14, 0.0  ;;  %v848_v25 = vmul.f32 0.01, %v810_v14 }
 0x12b   : > { %v858_v26 = vsel %vm842_vm2, %v818_v10, %v850_v18  ;;  %vm844_vm5 = vcmp.ge.f32.partialorder %v826_v19, 0.0  ;;  %v852_v17 = vmul.f32 0.01, %v826_v19  ;;  %vm843_vm6 = vcmp.ge.f32.partialorder %v821_v21, 0.0  ;;  %v828_v27 = vpop.f32.mrb[19].mxu1 }
 0x12c   : > { %v1041_v28 = vpack.c.bf16 %v858_v26, %v858_v26  ;;  %v862_v29 = vsel %vm846_vm3, %v834_v13, %v854_v24  ;;  %v856_v30 = vsel %vm840_vm4, %v810_v14, %v848_v25  ;;  %v851_v31 = vmul.f32 0.01, %v821_v21 }
 0x12d   : > { %v1045_v32 = vpack.c.bf16 %v862_v29, %v862_v29  ;;  %v1039_v33 = vpack.c.bf16 %v856_v30, %v856_v30  ;;  %v860_v34 = vsel %vm844_vm5, %v826_v19, %v852_v17  ;;  %v837_v35 = vadd.f32 %v1150_v22, %v772_v9 }
 0x12e   : > { %899 = vst.msk [vmem:[%s1409_s13 + $0x8] sm:$0xf] %vm896_vm1, %v1041_v28  ;;  %v1043_v36 = vpack.c.bf16 %v860_v34, %v860_v34  ;;  %v859_v37 = vsel %vm843_vm6, %v821_v21, %v851_v31  ;;  %v813_v38 = vadd.f32 %v812_v23, %v1402_v20  ;;  %v829_v39 = vadd.f32 %v828_v27, %v764_v56 }
 0x12f   : > { %903 = vst.msk [vmem:[%s1409_s13 + $0x18] sm:$0xf] %vm896_vm1, %v1045_v32  ;;  %897 = vst.msk [vmem:[%s1409_s13] sm:$0xf] %vm896_vm1, %v1039_v33  ;;  %v1042_v40 = vpack.c.bf16 %v859_v37, %v859_v37  ;;  %vm847_vm7 = vcmp.ge.f32.partialorder %v837_v35, 0.0 }
 0x130   : > { %v855_v41 = vmul.f32 0.01, %v837_v35  ;;  %901 = vst.msk [vmem:[%s1409_s13 + $0x10] sm:$0xf] %vm896_vm1, %v1043_v36  ;;  %vm841_vm8 = vcmp.ge.f32.partialorder %v813_v38, 0.0  ;;  %vm845_vm9 = vcmp.ge.f32.partialorder %v829_v39, 0.0 }
 0x131   : > { %v849_v42 = vmul.f32 0.01, %v813_v38  ;;  %v853_v43 = vmul.f32 0.01, %v829_v39  ;;  %900 = vst.msk [vmem:[%s1409_s13 + $0xc] sm:$0xf] %vm896_vm1, %v1042_v40 }
 0x132   : > { %v863_v20 = vsel %vm847_vm7, %v837_v35, %v855_v41 }
 0x133   : > { %v1046_v44 = vpack.c.bf16 %v863_v20, %v863_v20  ;;  %v857_v45 = vsel %vm841_vm8, %v813_v38, %v849_v42  ;;  %v861_v46 = vsel %vm845_vm9, %v829_v39, %v853_v43 }
 0x134   : > { %v1040_v47 = vpack.c.bf16 %v857_v45, %v857_v45  ;;  %v1044_v48 = vpack.c.bf16 %v861_v46, %v861_v46 }
 0x135   : > { %904 = vst.msk [vmem:[%s1409_s13 + $0x1c] sm:$0xf] %vm896_vm1, %v1046_v44 }
 0x136   : > { %898 = vst.msk [vmem:[%s1409_s13 + $0x4] sm:$0xf] %vm896_vm1, %v1040_v47  ;;  %902 = vst.msk [vmem:[%s1409_s13 + $0x14] sm:$0xf] %vm896_vm1, %v1044_v48 }
 0x137 PF: > { %s13_s12 = sadd.s32 1, %s1241_s12  }
 0x138   : > { %p10_p4 = scmp.ge.s32.totalorder %s13_s12, 4  }
 0x13a   :  { %12 = sbr.rel (!%p10_p4) target bundleno = 1 (0x1), region = 62 }

// kernel: net_forward.7
= control target key start
LH: loop header
LB: loop body
LE: loop exit
PB: predicated region body
PF: predicated region fallthrough
CT: control target
= control target key end

     0   :  { %s8982_s18 = smov 0   ;;  %s10001_s0 = inlined_call_operand.vmem [shape: bf16[2,3136], index: 0, kind: input, shape index: {}]   ;;  %s10002_s1 = inlined_call_operand.vmem [shape: bf16[2,3136,512], index: 1, kind: input, shape index: {}]   ;;  %s10003_s2 = inlined_call_operand.vmem [shape: f32[2,1,512], index: 2, kind: input, shape index: {}]   ;;  %s10004_s3 = inlined_call_operand.vmem [shape: bf16[2,512,128], index: 3, kind: input, shape index: {}]   ;;  %s10005_s4 = inlined_call_operand.vmem [shape: f32[2,1,128], index: 4, kind: input, shape index: {}]   ;;  %s10006_s5 = inlined_call_operand.vmem [shape: f32[2,2,128], index: 5, kind: output, shape index: {}]  }
   0x1 LB: > { %s8988_s19 = sadd.s32 4294967295, %s8948_s18   ;;  %p6739_p0 = scmp.ge.s32.totalorder %s8948_s18, 1  ;;  %s8948_s18 = sphi %s8982_s18, %s15_s18  }
   0x2   : > { %p214_p1 = scmp.lt.s32.totalorder %s8948_s18, 3 }
   0x4   : > { %p215_p2 = pnand %p6739_p0, %p214_p1 }
   0x5   : > { %p253_p3 = scmp.lt.s32.totalorder (!%p215_p2), %s8988_s19, 1  ;;  %v1065_v0 = vlaneseq (!%p215_p2)  ;;  %v8950_v1 = vmov (!%p215_p2), 1966171168   ;;  %v9004_v5 = vld [vmem:[%s10001_s0] sm:$0xff] (!%p215_p2)  ;;  %vm5194_vm0 = vcmask (!%p215_p2), 523264   ;;  %p7565_p4 = scmp.ne.s32.totalorder (!%p215_p2), %s8988_s19, 0 }
   0x6   : > { %218 = sbr.rel (%p215_p2) target bundleno = 1568 (0x620), region = 40  ;;  %v1091_v2 = vunpack.c.l.s4 (!%p215_p2), %v8950_v1 }
   0x7   : > { %v8997_v3 = vshrl.u32 (!%p215_p2), %v1065_v0, 7 }
   0x8   : > { %v1092_v4 = vunpack.c.0.s8 (!%p215_p2), %v1091_v2 }
   0xa   : > { %v9012_v6 = vsub.s32 (!%p215_p2), %v1092_v4, %v8997_v3 }
   0xc   : > { %v9022_v8 = vrot.slane (!%p215_p2), %v9004_v5, %v9012_v6 }
   0xd   : > { %s8994_s20 = scalar_select %p253_p3, %s8988_s19, 1 }
   0xe   : > { %v1104_v12 = vcombine.high %v9022_v8, %v9022_v8  ;;  %vm6631_vm5 = vcmask (!%p7565_p4), 1041408  }
   0xf   : > { %s7714_s21 = smul.u32 6272, %s8994_s20  ;;  %s6744_s22 = sshll.u32 %s8994_s20, 1 }
  0x10   : > { %s9009_s27 = scalar_lea.vmem %s10006_s5, %s6744_s22  ;;  %v9033_v16 = vrot.slane %v1104_v12, %v9012_v6  ;;  %s7569_s12 = sshll.u32 %s8994_s20, 8 }
  0x11   : > { %s9017_s30 = scalar_lea.vmem %s10002_s1, %s7714_s21  ;;  %s9814_s15 = scalar_lea.vmem %s10004_s3, %s7569_s12 }
  0x12   : > { %v7725_v7 = vld [vmem:[%s9017_s30 + $0x4] ss:$16 sps:$4 sm:$0xff]   ;;  %v7727_v9 = vld [vmem:[%s9017_s30 + $0xc] ss:$16 sps:$4 sm:$0xff]   ;;  %v7729_v10 = vld [vmem:[%s9017_s30] ss:$16 sps:$4 sm:$0xff]   ;;  %5230 = vmatprep.mubr.bf16.mxu0 %v9033_v16  ;;  %5763 = vmatprep.mubr.bf16.mxu1 %v9033_v16  ;;  %s269_s28 = scalar_lea.vmem %s10005_s4, %s8994_s20 }
  0x13   : > { %5198 = vmatprep.subr.bf16.mxu0 %v7725_v7  ;;  %v7730_v11 = vld [vmem:[%s9017_s30 + $0x8] ss:$16 sps:$4 sm:$0xff]   ;;  %5731 = vmatprep.subr.bf16.mxu1 %v7727_v9  ;;  %v7731_v13 = vld [vmem:[%s9017_s30 + $0x24] ss:$16 sps:$4 sm:$0xff]   ;;  %v7733_v14 = vld [vmem:[%s9017_s30 + $0x2c] ss:$16 sps:$4 sm:$0xff]  }
  0x14   : > { %5199 = vmatpush1.bf16.msra.mxu0 %v7729_v10  ;;  %5732 = vmatpush1.bf16.msra.mxu1 %v7730_v11  ;;  %v7735_v15 = vld [vmem:[%s9017_s30 + $0x20] ss:$16 sps:$4 sm:$0xff]   ;;  %v7736_v17 = vld [vmem:[%s9017_s30 + $0x28] ss:$16 sps:$4 sm:$0xff]   ;;  %v7737_v18 = vld [vmem:[%s9017_s30 + $0x44] ss:$16 sps:$4 sm:$0xff]  }
  0x15   : > { %5200 = vmatprep.subr.bf16.mxu0 %v7731_v13  ;;  %5733 = vmatprep.subr.bf16.mxu1 %v7733_v14  ;;  %v7739_v19 = vld [vmem:[%s9017_s30 + $0x4c] ss:$16 sps:$4 sm:$0xff]   ;;  %v7741_v20 = vld [vmem:[%s9017_s30 + $0x40] ss:$16 sps:$4 sm:$0xff]   ;;  %v7742_v21 = vld [vmem:[%s9017_s30 + $0x48] ss:$16 sps:$4 sm:$0xff]  }
  0x16   : > { %v7743_v22 = vld [vmem:[%s9017_s30 + $0x64] ss:$16 sps:$4 sm:$0xff]   ;;  %v7745_v23 = vld [vmem:[%s9017_s30 + $0x6c] ss:$16 sps:$4 sm:$0xff]   ;;  %v7747_v24 = vld [vmem:[%s9017_s30 + $0x60] ss:$16 sps:$4 sm:$0xff]  }
  0x17   : > { %v7748_v25 = vld [vmem:[%s9017_s30 + $0x68] ss:$16 sps:$4 sm:$0xff]   ;;  %v7749_v26 = vld [vmem:[%s9017_s30 + $0x84] ss:$16 sps:$4 sm:$0xff]   ;;  %v7751_v27 = vld [vmem:[%s9017_s30 + $0x8c] ss:$16 sps:$4 sm:$0xff]  }
  0x18   : > { %5201 = vmatpush1.bf16.msra.mxu0 %v7735_v15  ;;  %5734 = vmatpush1.bf16.msra.mxu1 %v7736_v17  ;;  %v7753_v28 = vld [vmem:[%s9017_s30 + $0x80] ss:$16 sps:$4 sm:$0xff]   ;;  %v7754_v29 = vld [vmem:[%s9017_s30 + $0x88] ss:$16 sps:$4 sm:$0xff]   ;;  %v7755_v30 = vld [vmem:[%s9017_s30 + $0xa4] ss:$16 sps:$4 sm:$0xff]  }
  0x19   : > { %5202 = vmatprep.subr.bf16.mxu0 %v7737_v18  ;;  %5735 = vmatprep.subr.bf16.mxu1 %v7739_v19  ;;  %v7757_v31 = vld [vmem:[%s9017_s30 + $0xac] ss:$16 sps:$4 sm:$0xff]   ;;  %v7759_v32 = vld [vmem:[%s9017_s30 + $0xa0] ss:$16 sps:$4 sm:$0xff]   ;;  %v7760_v33 = vld [vmem:[%s9017_s30 + $0xa8] ss:$16 sps:$4 sm:$0xff]  }
  0x1a   : > { %v7761_v34 = vld [vmem:[%s9017_s30 + $0xc4] ss:$16 sps:$4 sm:$0xff]   ;;  %v7763_v35 = vld [vmem:[%s9017_s30 + $0xcc] ss:$16 sps:$4 sm:$0xff]   ;;  %v7765_v36 = vld [vmem:[%s9017_s30 + $0xc0] ss:$16 sps:$4 sm:$0xff]  }
  0x1b   : > { %v7766_v37 = vld [vmem:[%s9017_s30 + $0xc8] ss:$16 sps:$4 sm:$0xff]   ;;  %v7767_v38 = vld [vmem:[%s9017_s30 + $0xe4] ss:$16 sps:$4 sm:$0xff]   ;;  %v7769_v39 = vld [vmem:[%s9017_s30 + $0xec] ss:$16 sps:$4 sm:$0xff]  }
  0x1c   : > { %5203 = vmatpush1.bf16.msra.mxu0 %v7741_v20  ;;  %5736 = vmatpush1.bf16.msra.mxu1 %v7742_v21  ;;  %v7771_v40 = vld [vmem:[%s9017_s30 + $0xe0] ss:$16 sps:$4 sm:$0xff]   ;;  %v7772_v41 = vld [vmem:[%s9017_s30 + $0xe8] ss:$16 sps:$4 sm:$0xff]   ;;  %v7773_v42 = vld [vmem:[%s9017_s30 + $0x104] ss:$16 sps:$4 sm:$0xff]   ;;  %v9100_v20 = vrot.slane %v9022_v8, %v9012_v6 }
  0x1d   : > { %5204 = vmatprep.subr.bf16.mxu0 %v7743_v22  ;;  %5737 = vmatprep.subr.bf16.mxu1 %v7745_v23  ;;  %v7775_v43 = vld [vmem:[%s9017_s30 + $0x10c] ss:$16 sps:$4 sm:$0xff]   ;;  %v7777_v44 = vld [vmem:[%s9017_s30 + $0x100] ss:$16 sps:$4 sm:$0xff]   ;;  %v7778_v45 = vld [vmem:[%s9017_s30 + $0x108] ss:$16 sps:$4 sm:$0xff]   ;;  %v1136_v23 = vcombine.high %v9033_v16, %v9033_v16 }
  0x1e   : > { %v7779_v46 = vld [vmem:[%s9017_s30 + $0x124] ss:$16 sps:$4 sm:$0xff]   ;;  %v7781_v47 = vld [vmem:[%s9017_s30 + $0x12c] ss:$16 sps:$4 sm:$0xff]   ;;  %v7783_v48 = vld [vmem:[%s9017_s30 + $0x120] ss:$16 sps:$4 sm:$0xff]  }
  0x1f   : > { %v7784_v49 = vld [vmem:[%s9017_s30 + $0x128] ss:$16 sps:$4 sm:$0xff]   ;;  %v7785_v50 = vld [vmem:[%s9017_s30 + $0x144] ss:$16 sps:$4 sm:$0xff]   ;;  %v7787_v51 = vld [vmem:[%s9017_s30 + $0x14c] ss:$16 sps:$4 sm:$0xff]  }
  0x20   : > { %5205 = vmatpush1.bf16.msra.mxu0 %v7747_v24  ;;  %5738 = vmatpush1.bf16.msra.mxu1 %v7748_v25  ;;  %v7789_v52 = vld [vmem:[%s9017_s30 + $0x140] ss:$16 sps:$4 sm:$0xff]   ;;  %v7790_v53 = vld [vmem:[%s9017_s30 + $0x148] ss:$16 sps:$4 sm:$0xff]   ;;  %v7791_v54 = vld [vmem:[%s9017_s30 + $0x164] ss:$16 sps:$4 sm:$0xff]  }
  0x21   : > { %5206 = vmatprep.subr.bf16.mxu0 %v7749_v26  ;;  %5739 = vmatprep.subr.bf16.mxu1 %v7751_v27  ;;  %v7793_v55 = vld [vmem:[%s9017_s30 + $0x16c] ss:$16 sps:$4 sm:$0xff]   ;;  %v7795_v56 = vld [vmem:[%s9017_s30 + $0x160] ss:$16 sps:$4 sm:$0xff]   ;;  %v7796_v57 = vld [vmem:[%s9017_s30 + $0x168] ss:$16 sps:$4 sm:$0xff]  }
  0x22   : > { %v7797_v58 = vld [vmem:[%s9017_s30 + $0x184] ss:$16 sps:$4 sm:$0xff]   ;;  %v7799_v59 = vld [vmem:[%s9017_s30 + $0x18c] ss:$16 sps:$4 sm:$0xff]   ;;  %v7801_v60 = vld [vmem:[%s9017_s30 + $0x180] ss:$16 sps:$4 sm:$0xff]  }
  0x23   : > { %v7802_v61 = vld [vmem:[%s9017_s30 + $0x188] ss:$16 sps:$4 sm:$0xff]   ;;  %v7803_v62 = vld [vmem:[%s9017_s30 + $0x1a4] ss:$16 sps:$4 sm:$0xff]   ;;  %v7805_v63 = vld [vmem:[%s9017_s30 + $0x1ac] ss:$16 sps:$4 sm:$0xff]  }
  0x24   : > { %5207 = vmatpush1.bf16.msra.mxu0 %v7753_v28  ;;  %5740 = vmatpush1.bf16.msra.mxu1 %v7754_v29  ;;  %v7807_v1 = vld [vmem:[%s9017_s30 + $0x1a0] ss:$16 sps:$4 sm:$0xff]   ;;  %v7808_v2 = vld [vmem:[%s9017_s30 + $0x1a8] ss:$16 sps:$4 sm:$0xff]   ;;  %v7809_v4 = vld [vmem:[%s9017_s30 + $0x1c4] ss:$16 sps:$4 sm:$0xff]  }
  0x25   : > { %5208 = vmatprep.subr.bf16.mxu0 %v7755_v30  ;;  %5741 = vmatprep.subr.bf16.mxu1 %v7757_v31  ;;  %v7811_v7 = vld [vmem:[%s9017_s30 + $0x1cc] ss:$16 sps:$4 sm:$0xff]   ;;  %v7813_v9 = vld [vmem:[%s9017_s30 + $0x1c0] ss:$16 sps:$4 sm:$0xff]   ;;  %v7814_v10 = vld [vmem:[%s9017_s30 + $0x1c8] ss:$16 sps:$4 sm:$0xff]  }
  0x26   : > { %v7815_v11 = vld [vmem:[%s9017_s30 + $0x1e4] ss:$16 sps:$4 sm:$0xff]   ;;  %v7817_v12 = vld [vmem:[%s9017_s30 + $0x1ec] ss:$16 sps:$4 sm:$0xff]   ;;  %v7819_v13 = vld [vmem:[%s9017_s30 + $0x1e0] ss:$16 sps:$4 sm:$0xff]  }
  0x27   : > { %v7820_v14 = vld [vmem:[%s9017_s30 + $0x1e8] ss:$16 sps:$4 sm:$0xff]   ;;  %v7823_v15 = vld [vmem:[%s9017_s30 + $0x204] ss:$16 sps:$4 sm:$0xff]   ;;  %v7826_v17 = vld [vmem:[%s9017_s30 + $0x20c] ss:$16 sps:$4 sm:$0xff]  }
  0x28   : > { %5209 = vmatpush1.bf16.msra.mxu0 %v7759_v32  ;;  %5742 = vmatpush1.bf16.msra.mxu1 %v7760_v33  ;;  %v7821_v18 = vld [vmem:[%s9017_s30 + $0x200] ss:$16 sps:$4 sm:$0xff]   ;;  %v7824_v19 = vld [vmem:[%s9017_s30 + $0x208] ss:$16 sps:$4 sm:$0xff]   ;;  %v7829_v21 = vld [vmem:[%s9017_s30 + $0x224] ss:$16 sps:$4 sm:$0xff]  }
  0x29   : > { %5210 = vmatprep.subr.bf16.mxu0 %v7761_v34  ;;  %5743 = vmatprep.subr.bf16.mxu1 %v7763_v35  ;;  %v7832_v22 = vld [vmem:[%s9017_s30 + $0x22c] ss:$16 sps:$4 sm:$0xff]   ;;  %v7827_v24 = vld [vmem:[%s9017_s30 + $0x220] ss:$16 sps:$4 sm:$0xff]   ;;  %v7830_v8 = vld [vmem:[%s9017_s30 + $0x228] ss:$16 sps:$4 sm:$0xff]  }
  0x2a   : > { %v7835_v25 = vld [vmem:[%s9017_s30 + $0x244] ss:$16 sps:$4 sm:$0xff]   ;;  %v7838_v26 = vld [vmem:[%s9017_s30 + $0x24c] ss:$16 sps:$4 sm:$0xff]   ;;  %v7833_v16 = vld [vmem:[%s9017_s30 + $0x240] ss:$16 sps:$4 sm:$0xff]  }
  0x2b   : > { %v7836_v27 = vld [vmem:[%s9017_s30 + $0x248] ss:$16 sps:$4 sm:$0xff]   ;;  %v7841_v28 = vld [vmem:[%s9017_s30 + $0x264] ss:$16 sps:$4 sm:$0xff]   ;;  %v7844_v29 = vld [vmem:[%s9017_s30 + $0x26c] ss:$16 sps:$4 sm:$0xff]  }
  0x2c   : > { %5211 = vmatpush1.bf16.msra.mxu0 %v7765_v36  ;;  %5744 = vmatpush1.bf16.msra.mxu1 %v7766_v37  ;;  %v7839_v30 = vld [vmem:[%s9017_s30 + $0x260] ss:$16 sps:$4 sm:$0xff]   ;;  %v7842_v31 = vld [vmem:[%s9017_s30 + $0x268] ss:$16 sps:$4 sm:$0xff]   ;;  %v7847_v32 = vld [vmem:[%s9017_s30 + $0x284] ss:$16 sps:$4 sm:$0xff]  }
  0x2d   : > { %5212 = vmatprep.subr.bf16.mxu0 %v7767_v38  ;;  %5745 = vmatprep.subr.bf16.mxu1 %v7769_v39  ;;  %v7850_v33 = vld [vmem:[%s9017_s30 + $0x28c] ss:$16 sps:$4 sm:$0xff]   ;;  %v7845_v34 = vld [vmem:[%s9017_s30 + $0x280] ss:$16 sps:$4 sm:$0xff]   ;;  %v7848_v35 = vld [vmem:[%s9017_s30 + $0x288] ss:$16 sps:$4 sm:$0xff]  }
  0x2e   : > { %v7853_v36 = vld [vmem:[%s9017_s30 + $0x2a4] ss:$16 sps:$4 sm:$0xff]   ;;  %v7856_v37 = vld [vmem:[%s9017_s30 + $0x2ac] ss:$16 sps:$4 sm:$0xff]   ;;  %v7851_v38 = vld [vmem:[%s9017_s30 + $0x2a0] ss:$16 sps:$4 sm:$0xff]  }
  0x2f   : > { %v7854_v39 = vld [vmem:[%s9017_s30 + $0x2a8] ss:$16 sps:$4 sm:$0xff]   ;;  %s6741_s21 = sshll.u32 %s8994_s20, 2 }
  0x30   : > { %5213 = vmatpush1.bf16.msra.mxu0 %v7771_v40  ;;  %5746 = vmatpush1.bf16.msra.mxu1 %v7772_v41  ;;  %v7859_v40 = vld [vmem:[%s9017_s30 + $0x2c4] ss:$16 sps:$4 sm:$0xff]   ;;  %v7862_v41 = vld [vmem:[%s9017_s30 + $0x2cc] ss:$16 sps:$4 sm:$0xff]   ;;  %s261_s24 = scalar_lea.vmem %s10003_s2, %s6741_s21 }
  0x31   : > { %5214 = vmatprep.subr.bf16.mxu0 %v7773_v42  ;;  %5747 = vmatprep.subr.bf16.mxu1 %v7775_v43  ;;  %v7857_v42 = vld [vmem:[%s9017_s30 + $0x2c0] ss:$16 sps:$4 sm:$0xff]   ;;  %v7860_v43 = vld [vmem:[%s9017_s30 + $0x2c8] ss:$16 sps:$4 sm:$0xff]  }
  0x34   : > { %5215 = vmatpush1.bf16.msra.mxu0 %v7777_v44  ;;  %5748 = vmatpush1.bf16.msra.mxu1 %v7778_v45  ;;  %v7865_v44 = vld [vmem:[%s9017_s30 + $0x2e4] ss:$16 sps:$4 sm:$0xff]   ;;  %v7868_v45 = vld [vmem:[%s9017_s30 + $0x2ec] ss:$16 sps:$4 sm:$0xff]  }
  0x35   : > { %5216 = vmatprep.subr.bf16.mxu0 %v7779_v46  ;;  %5749 = vmatprep.subr.bf16.mxu1 %v7781_v47  ;;  %v7863_v46 = vld [vmem:[%s9017_s30 + $0x2e0] ss:$16 sps:$4 sm:$0xff]   ;;  %v7866_v47 = vld [vmem:[%s9017_s30 + $0x2e8] ss:$16 sps:$4 sm:$0xff]  }
  0x38   : > { %5217 = vmatpush1.bf16.msra.mxu0 %v7783_v48  ;;  %5750 = vmatpush1.bf16.msra.mxu1 %v7784_v49  ;;  %v7871_v48 = vld [vmem:[%s9017_s30 + $0x304] ss:$16 sps:$4 sm:$0xff]   ;;  %v7874_v49 = vld [vmem:[%s9017_s30 + $0x30c] ss:$16 sps:$4 sm:$0xff]  }
  0x39   : > { %5218 = vmatprep.subr.bf16.mxu0 %v7785_v50  ;;  %5751 = vmatprep.subr.bf16.mxu1 %v7787_v51  ;;  %v7869_v50 = vld [vmem:[%s9017_s30 + $0x300] ss:$16 sps:$4 sm:$0xff]   ;;  %v7872_v51 = vld [vmem:[%s9017_s30 + $0x308] ss:$16 sps:$4 sm:$0xff]  }
  0x3c   : > { %5219 = vmatpush1.bf16.msra.mxu0 %v7789_v52  ;;  %5752 = vmatpush1.bf16.msra.mxu1 %v7790_v53  ;;  %v7877_v52 = vld [vmem:[%s9017_s30 + $0x324] ss:$16 sps:$4 sm:$0xff]   ;;  %v7880_v53 = vld [vmem:[%s9017_s30 + $0x32c] ss:$16 sps:$4 sm:$0xff]  }
  0x3d   : > { %5220 = vmatprep.subr.bf16.mxu0 %v7791_v54  ;;  %5753 = vmatprep.subr.bf16.mxu1 %v7793_v55  ;;  %v7875_v54 = vld [vmem:[%s9017_s30 + $0x320] ss:$16 sps:$4 sm:$0xff]   ;;  %v7878_v55 = vld [vmem:[%s9017_s30 + $0x328] ss:$16 sps:$4 sm:$0xff]  }
  0x40   : > { %5221 = vmatpush1.bf16.msra.mxu0 %v7795_v56  ;;  %5754 = vmatpush1.bf16.msra.mxu1 %v7796_v57  ;;  %v7883_v56 = vld [vmem:[%s9017_s30 + $0x344] ss:$16 sps:$4 sm:$0xff]   ;;  %v7886_v57 = vld [vmem:[%s9017_s30 + $0x34c] ss:$16 sps:$4 sm:$0xff]  }
  0x41   : > { %5222 = vmatprep.subr.bf16.mxu0 %v7797_v58  ;;  %5755 = vmatprep.subr.bf16.mxu1 %v7799_v59  ;;  %v7881_v58 = vld [vmem:[%s9017_s30 + $0x340] ss:$16 sps:$4 sm:$0xff]   ;;  %v7884_v59 = vld [vmem:[%s9017_s30 + $0x348] ss:$16 sps:$4 sm:$0xff]  }
  0x44   : > { %5223 = vmatpush1.bf16.msra.mxu0 %v7801_v60  ;;  %5756 = vmatpush1.bf16.msra.mxu1 %v7802_v61  ;;  %v7889_v60 = vld [vmem:[%s9017_s30 + $0x364] ss:$16 sps:$4 sm:$0xff]   ;;  %v7892_v61 = vld [vmem:[%s9017_s30 + $0x36c] ss:$16 sps:$4 sm:$0xff]  }
  0x45   : > { %5224 = vmatprep.subr.bf16.mxu0 %v7803_v62  ;;  %5757 = vmatprep.subr.bf16.mxu1 %v7805_v63  ;;  %v7887_v62 = vld [vmem:[%s9017_s30 + $0x360] ss:$16 sps:$4 sm:$0xff]   ;;  %v7890_v63 = vld [vmem:[%s9017_s30 + $0x368] ss:$16 sps:$4 sm:$0xff]  }
  0x48   : > { %5225 = vmatpush1.bf16.msra.mxu0 %v7807_v1  ;;  %5758 = vmatpush1.bf16.msra.mxu1 %v7808_v2  ;;  %v7895_v1 = vld [vmem:[%s9017_s30 + $0x384] ss:$16 sps:$4 sm:$0xff]   ;;  %v7898_v2 = vld [vmem:[%s9017_s30 + $0x38c] ss:$16 sps:$4 sm:$0xff]  }
  0x49   : > { %5226 = vmatprep.subr.bf16.mxu0 %v7809_v4  ;;  %5759 = vmatprep.subr.bf16.mxu1 %v7811_v7  ;;  %v7893_v4 = vld [vmem:[%s9017_s30 + $0x380] ss:$16 sps:$4 sm:$0xff]   ;;  %v7896_v7 = vld [vmem:[%s9017_s30 + $0x388] ss:$16 sps:$4 sm:$0xff]  }
  0x4c   : > { %5227 = vmatpush1.bf16.msra.mxu0 %v7813_v9  ;;  %5760 = vmatpush1.bf16.msra.mxu1 %v7814_v10  ;;  %v7901_v9 = vld [vmem:[%s9017_s30 + $0x3a4] ss:$16 sps:$4 sm:$0xff]   ;;  %v7904_v10 = vld [vmem:[%s9017_s30 + $0x3ac] ss:$16 sps:$4 sm:$0xff]  }
  0x4d   : > { %5228 = vmatprep.subr.bf16.mxu0 %v7815_v11  ;;  %5761 = vmatprep.subr.bf16.mxu1 %v7817_v12  ;;  %v7899_v11 = vld [vmem:[%s9017_s30 + $0x3a0] ss:$16 sps:$4 sm:$0xff]   ;;  %v7902_v12 = vld [vmem:[%s9017_s30 + $0x3a8] ss:$16 sps:$4 sm:$0xff]  }
  0x50   : > { %5229 = vmatpush1.bf16.msra.mxu0 %v7819_v13  ;;  %5762 = vmatpush1.bf16.msra.mxu1 %v7820_v14  ;;  %v7907_v13 = vld [vmem:[%s9017_s30 + $0x3c4] ss:$16 sps:$4 sm:$0xff]   ;;  %v7910_v14 = vld [vmem:[%s9017_s30 + $0x3cc] ss:$16 sps:$4 sm:$0xff]  }
  0x51   : > { %5239 = vmatprep.subr.bf16.mxu0 %v7823_v15  ;;  %5772 = vmatprep.subr.bf16.mxu1 %v7826_v17  ;;  %v1089_v15 = vcombine.high %v9004_v5, %v9004_v5  ;;  %v7905_v17 = vld [vmem:[%s9017_s30 + $0x3c0] ss:$16 sps:$4 sm:$0xff]   ;;  %v7919_v5 = vld [vmem:[%s9017_s30 + $0x404] ss:$16 sps:$4 sm:$0xff]  }
  0x53   : > { %5231 = vmatmul.mubr.bf16.vlgmr.msra.gmra.mrb[0].mxu0 %v9100_v20  ;;  %5764 = vmatmul.mubr.bf16.vlgmr.msra.gmra.mrb[0].mxu1 %v9100_v20 }
  0x54   : > { %5240 = vmatpush1.bf16.msra.mxu0 %v7821_v18  ;;  %5773 = vmatpush1.bf16.msra.mxu1 %v7824_v19  ;;  %v7908_v18 = vld [vmem:[%s9017_s30 + $0x3c8] ss:$16 sps:$4 sm:$0xff]   ;;  %v7913_v19 = vld [vmem:[%s9017_s30 + $0x3e4] ss:$16 sps:$4 sm:$0xff]  }
  0x55   : > { %5241 = vmatprep.subr.bf16.mxu0 %v7829_v21  ;;  %5774 = vmatprep.subr.bf16.mxu1 %v7832_v22  ;;  %v7916_v21 = vld [vmem:[%s9017_s30 + $0x3ec] ss:$16 sps:$4 sm:$0xff]   ;;  %v9167_v22 = vrot.slane %v1089_v15, %v9012_v6  ;;  %v7989_v15 = vld [vmem:[%s9017_s30 + $0x580] ss:$16 sps:$4 sm:$0xff]  }
  0x56   : > { %5271 = vmatprep.mubr.bf16.mxu0 %v1136_v23  ;;  %5804 = vmatprep.mubr.bf16.mxu1 %v1136_v23  ;;  %v7911_v23 = vld [vmem:[%s9017_s30 + $0x3e0] ss:$16 sps:$4 sm:$0xff]  }
  0x58   : > { %5242 = vmatpush1.bf16.msra.mxu0 %v7827_v24  ;;  %5775 = vmatpush1.bf16.msra.mxu1 %v7830_v8  ;;  %v7914_v24 = vld [vmem:[%s9017_s30 + $0x3e8] ss:$16 sps:$4 sm:$0xff]   ;;  %v7922_v8 = vld [vmem:[%s9017_s30 + $0x40c] ss:$16 sps:$4 sm:$0xff]  }
  0x59   : > { %5243 = vmatprep.subr.bf16.mxu0 %v7835_v25  ;;  %5776 = vmatprep.subr.bf16.mxu1 %v7838_v26  ;;  %v1105_v25 = vcombine.high %v9167_v22, %v9167_v22  ;;  %v7917_v26 = vld [vmem:[%s9017_s30 + $0x400] ss:$16 sps:$4 sm:$0xff]  }
  0x5c   : > { %5244 = vmatpush1.bf16.msra.mxu0 %v7833_v16  ;;  %5777 = vmatpush1.bf16.msra.mxu1 %v7836_v27  ;;  %v7920_v16 = vld [vmem:[%s9017_s30 + $0x408] ss:$16 sps:$4 sm:$0xff]   ;;  %v1134_v27 = vcombine.high %v9100_v20, %v9100_v20  ;;  %v7931_v20 = vld [vmem:[%s9017_s30 + $0x444] ss:$16 sps:$4 sm:$0xff]  }
  0x5d   : > { %5245 = vmatprep.subr.bf16.mxu0 %v7841_v28  ;;  %5778 = vmatprep.subr.bf16.mxu1 %v7844_v29  ;;  %v7925_v28 = vld [vmem:[%s9017_s30 + $0x424] ss:$16 sps:$4 sm:$0xff]   ;;  %v7928_v29 = vld [vmem:[%s9017_s30 + $0x42c] ss:$16 sps:$4 sm:$0xff]  }
  0x60   : > { %5246 = vmatpush1.bf16.msra.mxu0 %v7839_v30  ;;  %5779 = vmatpush1.bf16.msra.mxu1 %v7842_v31  ;;  %v9182_v30 = vrot.slane %v1105_v25, %v9012_v6  ;;  %v7923_v31 = vld [vmem:[%s9017_s30 + $0x420] ss:$16 sps:$4 sm:$0xff]   ;;  %v8004_v25 = vld [vmem:[%s9017_s30 + $0x5c8] ss:$16 sps:$4 sm:$0xff]  }
  0x61   : > { %5247 = vmatprep.subr.bf16.mxu0 %v7847_v32  ;;  %5780 = vmatprep.subr.bf16.mxu1 %v7850_v33  ;;  %v7926_v32 = vld [vmem:[%s9017_s30 + $0x428] ss:$16 sps:$4 sm:$0xff]   ;;  %v7934_v33 = vld [vmem:[%s9017_s30 + $0x44c] ss:$16 sps:$4 sm:$0xff]  }
  0x64   : > { %5248 = vmatpush1.bf16.msra.mxu0 %v7845_v34  ;;  %5781 = vmatpush1.bf16.msra.mxu1 %v7848_v35  ;;  %v7929_v34 = vld [vmem:[%s9017_s30 + $0x440] ss:$16 sps:$4 sm:$0xff]   ;;  %v7932_v35 = vld [vmem:[%s9017_s30 + $0x448] ss:$16 sps:$4 sm:$0xff]  }
  0x65   : > { %5249 = vmatprep.subr.bf16.mxu0 %v7853_v36  ;;  %5782 = vmatprep.subr.bf16.mxu1 %v7856_v37  ;;  %v7937_v36 = vld [vmem:[%s9017_s30 + $0x464] ss:$16 sps:$4 sm:$0xff]   ;;  %v7940_v37 = vld [vmem:[%s9017_s30 + $0x46c] ss:$16 sps:$4 sm:$0xff]  }
  0x68   : > { %5250 = vmatpush1.bf16.msra.mxu0 %v7851_v38  ;;  %5783 = vmatpush1.bf16.msra.mxu1 %v7854_v39  ;;  %v7935_v38 = vld [vmem:[%s9017_s30 + $0x460] ss:$16 sps:$4 sm:$0xff]   ;;  %v7938_v39 = vld [vmem:[%s9017_s30 + $0x468] ss:$16 sps:$4 sm:$0xff]  }
  0x69   : > { %5251 = vmatprep.subr.bf16.mxu0 %v7859_v40  ;;  %5784 = vmatprep.subr.bf16.mxu1 %v7862_v41  ;;  %v7943_v40 = vld [vmem:[%s9017_s30 + $0x484] ss:$16 sps:$4 sm:$0xff]   ;;  %v7946_v41 = vld [vmem:[%s9017_s30 + $0x48c] ss:$16 sps:$4 sm:$0xff]  }
  0x6c   : > { %5252 = vmatpush1.bf16.msra.mxu0 %v7857_v42  ;;  %5785 = vmatpush1.bf16.msra.mxu1 %v7860_v43  ;;  %v7941_v42 = vld [vmem:[%s9017_s30 + $0x480] ss:$16 sps:$4 sm:$0xff]   ;;  %v7944_v43 = vld [vmem:[%s9017_s30 + $0x488] ss:$16 sps:$4 sm:$0xff]  }
  0x6d   : > { %5253 = vmatprep.subr.bf16.mxu0 %v7865_v44  ;;  %5786 = vmatprep.subr.bf16.mxu1 %v7868_v45  ;;  %v7949_v44 = vld [vmem:[%s9017_s30 + $0x4a4] ss:$16 sps:$4 sm:$0xff]   ;;  %v7952_v45 = vld [vmem:[%s9017_s30 + $0x4ac] ss:$16 sps:$4 sm:$0xff]  }
  0x70   : > { %5254 = vmatpush1.bf16.msra.mxu0 %v7863_v46  ;;  %5787 = vmatpush1.bf16.msra.mxu1 %v7866_v47  ;;  %v7947_v46 = vld [vmem:[%s9017_s30 + $0x4a0] ss:$16 sps:$4 sm:$0xff]   ;;  %v7950_v47 = vld [vmem:[%s9017_s30 + $0x4a8] ss:$16 sps:$4 sm:$0xff]  }
  0x71   : > { %5255 = vmatprep.subr.bf16.mxu0 %v7871_v48  ;;  %5788 = vmatprep.subr.bf16.mxu1 %v7874_v49  ;;  %v7955_v48 = vld [vmem:[%s9017_s30 + $0x4c4] ss:$16 sps:$4 sm:$0xff]   ;;  %v7958_v49 = vld [vmem:[%s9017_s30 + $0x4cc] ss:$16 sps:$4 sm:$0xff]  }
  0x74   : > { %5256 = vmatpush1.bf16.msra.mxu0 %v7869_v50  ;;  %5789 = vmatpush1.bf16.msra.mxu1 %v7872_v51  ;;  %v7953_v50 = vld [vmem:[%s9017_s30 + $0x4c0] ss:$16 sps:$4 sm:$0xff]   ;;  %v7956_v51 = vld [vmem:[%s9017_s30 + $0x4c8] ss:$16 sps:$4 sm:$0xff]  }
  0x75   : > { %5257 = vmatprep.subr.bf16.mxu0 %v7877_v52  ;;  %5790 = vmatprep.subr.bf16.mxu1 %v7880_v53  ;;  %v7961_v52 = vld [vmem:[%s9017_s30 + $0x4e4] ss:$16 sps:$4 sm:$0xff]   ;;  %v7964_v53 = vld [vmem:[%s9017_s30 + $0x4ec] ss:$16 sps:$4 sm:$0xff]  }
  0x78   : > { %5258 = vmatpush1.bf16.msra.mxu0 %v7875_v54  ;;  %5791 = vmatpush1.bf16.msra.mxu1 %v7878_v55  ;;  %v7959_v54 = vld [vmem:[%s9017_s30 + $0x4e0] ss:$16 sps:$4 sm:$0xff]   ;;  %v7962_v55 = vld [vmem:[%s9017_s30 + $0x4e8] ss:$16 sps:$4 sm:$0xff]  }
  0x79   : > { %5259 = vmatprep.subr.bf16.mxu0 %v7883_v56  ;;  %5792 = vmatprep.subr.bf16.mxu1 %v7886_v57  ;;  %v7967_v56 = vld [vmem:[%s9017_s30 + $0x504] ss:$16 sps:$4 sm:$0xff]   ;;  %v7970_v57 = vld [vmem:[%s9017_s30 + $0x50c] ss:$16 sps:$4 sm:$0xff]  }
  0x7c   : > { %5260 = vmatpush1.bf16.msra.mxu0 %v7881_v58  ;;  %5793 = vmatpush1.bf16.msra.mxu1 %v7884_v59  ;;  %v7965_v58 = vld [vmem:[%s9017_s30 + $0x500] ss:$16 sps:$4 sm:$0xff]   ;;  %v7968_v59 = vld [vmem:[%s9017_s30 + $0x508] ss:$16 sps:$4 sm:$0xff]  }
  0x7d   : > { %5261 = vmatprep.subr.bf16.mxu0 %v7889_v60  ;;  %5794 = vmatprep.subr.bf16.mxu1 %v7892_v61  ;;  %v7973_v60 = vld [vmem:[%s9017_s30 + $0x524] ss:$16 sps:$4 sm:$0xff]   ;;  %v7976_v61 = vld [vmem:[%s9017_s30 + $0x52c] ss:$16 sps:$4 sm:$0xff]  }
  0x80   : > { %5262 = vmatpush1.bf16.msra.mxu0 %v7887_v62  ;;  %5795 = vmatpush1.bf16.msra.mxu1 %v7890_v63  ;;  %v7971_v62 = vld [vmem:[%s9017_s30 + $0x520] ss:$16 sps:$4 sm:$0xff]   ;;  %v7974_v63 = vld [vmem:[%s9017_s30 + $0x528] ss:$16 sps:$4 sm:$0xff]  }
  0x81   : > { %5263 = vmatprep.subr.bf16.mxu0 %v7895_v1  ;;  %5796 = vmatprep.subr.bf16.mxu1 %v7898_v2  ;;  %v7979_v1 = vld [vmem:[%s9017_s30 + $0x544] ss:$16 sps:$4 sm:$0xff]   ;;  %v7982_v2 = vld [vmem:[%s9017_s30 + $0x54c] ss:$16 sps:$4 sm:$0xff]  }
  0x84   : > { %5264 = vmatpush1.bf16.msra.mxu0 %v7893_v4  ;;  %5797 = vmatpush1.bf16.msra.mxu1 %v7896_v7  ;;  %v7977_v4 = vld [vmem:[%s9017_s30 + $0x540] ss:$16 sps:$4 sm:$0xff]   ;;  %v7980_v7 = vld [vmem:[%s9017_s30 + $0x548] ss:$16 sps:$4 sm:$0xff]  }
  0x85   : > { %5265 = vmatprep.subr.bf16.mxu0 %v7901_v9  ;;  %5798 = vmatprep.subr.bf16.mxu1 %v7904_v10  ;;  %v7985_v9 = vld [vmem:[%s9017_s30 + $0x564] ss:$16 sps:$4 sm:$0xff]   ;;  %v7988_v10 = vld [vmem:[%s9017_s30 + $0x56c] ss:$16 sps:$4 sm:$0xff]  }
  0x88   : > { %5266 = vmatpush1.bf16.msra.mxu0 %v7899_v11  ;;  %5799 = vmatpush1.bf16.msra.mxu1 %v7902_v12  ;;  %v7983_v11 = vld [vmem:[%s9017_s30 + $0x560] ss:$16 sps:$4 sm:$0xff]   ;;  %v7986_v12 = vld [vmem:[%s9017_s30 + $0x568] ss:$16 sps:$4 sm:$0xff]  }
  0x89   : > { %5267 = vmatprep.subr.bf16.mxu0 %v7907_v13  ;;  %5800 = vmatprep.subr.bf16.mxu1 %v7910_v14  ;;  %v7991_v13 = vld [vmem:[%s9017_s30 + $0x584] ss:$16 sps:$4 sm:$0xff]   ;;  %v7994_v14 = vld [vmem:[%s9017_s30 + $0x58c] ss:$16 sps:$4 sm:$0xff]  }
  0x8c   : > { %5268 = vmatpush1.bf16.msra.mxu0 %v7905_v17  ;;  %5801 = vmatpush1.bf16.msra.mxu1 %v7908_v18  ;;  %v7992_v17 = vld [vmem:[%s9017_s30 + $0x588] ss:$16 sps:$4 sm:$0xff]   ;;  %v7997_v18 = vld [vmem:[%s9017_s30 + $0x5a4] ss:$16 sps:$4 sm:$0xff]  }
  0x8d   : > { %5269 = vmatprep.subr.bf16.mxu0 %v7913_v19  ;;  %5802 = vmatprep.subr.bf16.mxu1 %v7916_v21  ;;  %v8000_v19 = vld [vmem:[%s9017_s30 + $0x5ac] ss:$16 sps:$4 sm:$0xff]   ;;  %v7995_v21 = vld [vmem:[%s9017_s30 + $0x5a0] ss:$16 sps:$4 sm:$0xff]  }
  0x90   : > { %5270 = vmatpush1.bf16.msra.mxu0 %v7911_v23  ;;  %5803 = vmatpush1.bf16.msra.mxu1 %v7914_v24  ;;  %v7998_v23 = vld [vmem:[%s9017_s30 + $0x5a8] ss:$16 sps:$4 sm:$0xff]   ;;  %v8003_v24 = vld [vmem:[%s9017_s30 + $0x5c4] ss:$16 sps:$4 sm:$0xff]  }
  0x91   : > { %5280 = vmatprep.subr.bf16.mxu0 %v7919_v5  ;;  %5813 = vmatprep.subr.bf16.mxu1 %v7922_v8  ;;  %v8006_v5 = vld [vmem:[%s9017_s30 + $0x5cc] ss:$16 sps:$4 sm:$0xff]   ;;  %v8001_v8 = vld [vmem:[%s9017_s30 + $0x5c0] ss:$16 sps:$4 sm:$0xff]  }
  0x93   : > { %5272 = vmatmul.mubr.bf16.vlgmr.msra.gmra.mrb[0].mxu0 %v1134_v27  ;;  %5805 = vmatmul.mubr.bf16.vlgmr.msra.gmra.mrb[0].mxu1 %v1134_v27  ;;  %v8007_v27 = vld [vmem:[%s9017_s30 + $0x5e0] ss:$16 sps:$4 sm:$0xff]  }
  0x94   : > { %5281 = vmatpush1.bf16.msra.mxu0 %v7917_v26  ;;  %5814 = vmatpush1.bf16.msra.mxu1 %v7920_v16  ;;  %v8009_v26 = vld [vmem:[%s9017_s30 + $0x5e4] ss:$16 sps:$4 sm:$0xff]   ;;  %v8012_v16 = vld [vmem:[%s9017_s30 + $0x5ec] ss:$16 sps:$4 sm:$0xff]  }
  0x95   : > { %5282 = vmatprep.subr.bf16.mxu0 %v7925_v28  ;;  %5815 = vmatprep.subr.bf16.mxu1 %v7928_v29  ;;  %v8010_v28 = vld [vmem:[%s9017_s30 + $0x5e8] ss:$16 sps:$4 sm:$0xff]   ;;  %v8016_v29 = vld [vmem:[%s9017_s30 + $0x604] ss:$16 sps:$4 sm:$0xff]  }
  0x96   : > { %5312 = vmatprep.mubr.bf16.mxu0 %v9182_v30  ;;  %5845 = vmatprep.mubr.bf16.mxu1 %v9182_v30 }
  0x98   : > { %5283 = vmatpush1.bf16.msra.mxu0 %v7923_v31  ;;  %5816 = vmatpush1.bf16.msra.mxu1 %v7926_v32  ;;  %v8019_v31 = vld [vmem:[%s9017_s30 + $0x60c] ss:$16 sps:$4 sm:$0xff]   ;;  %v8014_v32 = vld [vmem:[%s9017_s30 + $0x600] ss:$16 sps:$4 sm:$0xff]  }
  0x99   : > { %5284 = vmatprep.subr.bf16.mxu0 %v7931_v20  ;;  %5817 = vmatprep.subr.bf16.mxu1 %v7934_v33  ;;  %v8017_v20 = vld [vmem:[%s9017_s30 + $0x608] ss:$16 sps:$4 sm:$0xff]   ;;  %v9250_v33 = vrot.slane %v9167_v22, %v9012_v6 }
  0x9a   : > { %v8023_v22 = vld [vmem:[%s9017_s30 + $0x628] ss:$16 sps:$4 sm:$0xff]  }
  0x9c   : > { %5285 = vmatpush1.bf16.msra.mxu0 %v7929_v34  ;;  %5818 = vmatpush1.bf16.msra.mxu1 %v7932_v35  ;;  %v8022_v34 = vld [vmem:[%s9017_s30 + $0x624] ss:$16 sps:$4 sm:$0xff]   ;;  %v8025_v35 = vld [vmem:[%s9017_s30 + $0x62c] ss:$16 sps:$4 sm:$0xff]  }
  0x9d   : > { %5286 = vmatprep.subr.bf16.mxu0 %v7937_v36  ;;  %5819 = vmatprep.subr.bf16.mxu1 %v7940_v37  ;;  %v1137_v36 = vcombine.high %v9182_v30, %v9182_v30  ;;  %v8020_v37 = vld [vmem:[%s9017_s30 + $0x620] ss:$16 sps:$4 sm:$0xff]  }
  0x9e   : > { %v8026_v30 = vld [vmem:[%s9017_s30 + $0x640] ss:$16 sps:$4 sm:$0xff]  }
  0xa0   : > { %5287 = vmatpush1.bf16.msra.mxu0 %v7935_v38  ;;  %5820 = vmatpush1.bf16.msra.mxu1 %v7938_v39  ;;  %v8028_v38 = vld [vmem:[%s9017_s30 + $0x644] ss:$16 sps:$4 sm:$0xff]   ;;  %v8031_v39 = vld [vmem:[%s9017_s30 + $0x64c] ss:$16 sps:$4 sm:$0xff]  }
  0xa1   : > { %5288 = vmatprep.subr.bf16.mxu0 %v7943_v40  ;;  %5821 = vmatprep.subr.bf16.mxu1 %v7946_v41  ;;  %v8029_v40 = vld [vmem:[%s9017_s30 + $0x648] ss:$16 sps:$4 sm:$0xff]   ;;  %v8034_v41 = vld [vmem:[%s9017_s30 + $0x664] ss:$16 sps:$4 sm:$0xff]  }
  0xa4   : > { %5289 = vmatpush1.bf16.msra.mxu0 %v7941_v42  ;;  %5822 = vmatpush1.bf16.msra.mxu1 %v7944_v43  ;;  %v8037_v42 = vld [vmem:[%s9017_s30 + $0x66c] ss:$16 sps:$4 sm:$0xff]   ;;  %v8032_v43 = vld [vmem:[%s9017_s30 + $0x660] ss:$16 sps:$4 sm:$0xff]  }
  0xa5   : > { %5290 = vmatprep.subr.bf16.mxu0 %v7949_v44  ;;  %5823 = vmatprep.subr.bf16.mxu1 %v7952_v45  ;;  %v8035_v44 = vld [vmem:[%s9017_s30 + $0x668] ss:$16 sps:$4 sm:$0xff]   ;;  %v8040_v45 = vld [vmem:[%s9017_s30 + $0x684] ss:$16 sps:$4 sm:$0xff]  }
  0xa8   : > { %5291 = vmatpush1.bf16.msra.mxu0 %v7947_v46  ;;  %5824 = vmatpush1.bf16.msra.mxu1 %v7950_v47  ;;  %v8043_v46 = vld [vmem:[%s9017_s30 + $0x68c] ss:$16 sps:$4 sm:$0xff]   ;;  %v8038_v47 = vld [vmem:[%s9017_s30 + $0x680] ss:$16 sps:$4 sm:$0xff]  }
  0xa9   : > { %5292 = vmatprep.subr.bf16.mxu0 %v7955_v48  ;;  %5825 = vmatprep.subr.bf16.mxu1 %v7958_v49  ;;  %v8041_v48 = vld [vmem:[%s9017_s30 + $0x688] ss:$16 sps:$4 sm:$0xff]   ;;  %v8046_v49 = vld [vmem:[%s9017_s30 + $0x6a4] ss:$16 sps:$4 sm:$0xff]  }
  0xac   : > { %5293 = vmatpush1.bf16.msra.mxu0 %v7953_v50  ;;  %5826 = vmatpush1.bf16.msra.mxu1 %v7956_v51  ;;  %v8049_v50 = vld [vmem:[%s9017_s30 + $0x6ac] ss:$16 sps:$4 sm:$0xff]   ;;  %v8044_v51 = vld [vmem:[%s9017_s30 + $0x6a0] ss:$16 sps:$4 sm:$0xff]  }
  0xad   : > { %5294 = vmatprep.subr.bf16.mxu0 %v7961_v52  ;;  %5827 = vmatprep.subr.bf16.mxu1 %v7964_v53  ;;  %v8047_v52 = vld [vmem:[%s9017_s30 + $0x6a8] ss:$16 sps:$4 sm:$0xff]   ;;  %v8052_v53 = vld [vmem:[%s9017_s30 + $0x6c4] ss:$16 sps:$4 sm:$0xff]  }
  0xb0   : > { %5295 = vmatpush1.bf16.msra.mxu0 %v7959_v54  ;;  %5828 = vmatpush1.bf16.msra.mxu1 %v7962_v55  ;;  %v8055_v54 = vld [vmem:[%s9017_s30 + $0x6cc] ss:$16 sps:$4 sm:$0xff]   ;;  %v8050_v55 = vld [vmem:[%s9017_s30 + $0x6c0] ss:$16 sps:$4 sm:$0xff]  }
  0xb1   : > { %5296 = vmatprep.subr.bf16.mxu0 %v7967_v56  ;;  %5829 = vmatprep.subr.bf16.mxu1 %v7970_v57  ;;  %v8053_v56 = vld [vmem:[%s9017_s30 + $0x6c8] ss:$16 sps:$4 sm:$0xff]   ;;  %v8058_v57 = vld [vmem:[%s9017_s30 + $0x6e4] ss:$16 sps:$4 sm:$0xff]  }
  0xb4   : > { %5297 = vmatpush1.bf16.msra.mxu0 %v7965_v58  ;;  %5830 = vmatpush1.bf16.msra.mxu1 %v7968_v59  ;;  %v8061_v58 = vld [vmem:[%s9017_s30 + $0x6ec] ss:$16 sps:$4 sm:$0xff]   ;;  %v8056_v59 = vld [vmem:[%s9017_s30 + $0x6e0] ss:$16 sps:$4 sm:$0xff]  }
  0xb5   : > { %5298 = vmatprep.subr.bf16.mxu0 %v7973_v60  ;;  %5831 = vmatprep.subr.bf16.mxu1 %v7976_v61  ;;  %v8059_v60 = vld [vmem:[%s9017_s30 + $0x6e8] ss:$16 sps:$4 sm:$0xff]   ;;  %v8064_v61 = vld [vmem:[%s9017_s30 + $0x704] ss:$16 sps:$4 sm:$0xff]  }
  0xb8   : > { %5299 = vmatpush1.bf16.msra.mxu0 %v7971_v62  ;;  %5832 = vmatpush1.bf16.msra.mxu1 %v7974_v63  ;;  %v8067_v62 = vld [vmem:[%s9017_s30 + $0x70c] ss:$16 sps:$4 sm:$0xff]   ;;  %v8062_v63 = vld [vmem:[%s9017_s30 + $0x700] ss:$16 sps:$4 sm:$0xff]  }
  0xb9   : > { %5300 = vmatprep.subr.bf16.mxu0 %v7979_v1  ;;  %5833 = vmatprep.subr.bf16.mxu1 %v7982_v2  ;;  %v8065_v1 = vld [vmem:[%s9017_s30 + $0x708] ss:$16 sps:$4 sm:$0xff]   ;;  %v8070_v2 = vld [vmem:[%s9017_s30 + $0x724] ss:$16 sps:$4 sm:$0xff]  }
  0xbc   : > { %5301 = vmatpush1.bf16.msra.mxu0 %v7977_v4  ;;  %5834 = vmatpush1.bf16.msra.mxu1 %v7980_v7  ;;  %v8073_v4 = vld [vmem:[%s9017_s30 + $0x72c] ss:$16 sps:$4 sm:$0xff]   ;;  %v8068_v7 = vld [vmem:[%s9017_s30 + $0x720] ss:$16 sps:$4 sm:$0xff]  }
  0xbd   : > { %5302 = vmatprep.subr.bf16.mxu0 %v7985_v9  ;;  %5835 = vmatprep.subr.bf16.mxu1 %v7988_v10  ;;  %v8071_v9 = vld [vmem:[%s9017_s30 + $0x728] ss:$16 sps:$4 sm:$0xff]   ;;  %v8076_v10 = vld [vmem:[%s9017_s30 + $0x744] ss:$16 sps:$4 sm:$0xff]  }
  0xc0   : > { %5303 = vmatpush1.bf16.msra.mxu0 %v7983_v11  ;;  %5836 = vmatpush1.bf16.msra.mxu1 %v7986_v12  ;;  %v8079_v11 = vld [vmem:[%s9017_s30 + $0x74c] ss:$16 sps:$4 sm:$0xff]   ;;  %v8074_v12 = vld [vmem:[%s9017_s30 + $0x740] ss:$16 sps:$4 sm:$0xff]  }
  0xc1   : > { %5304 = vmatprep.subr.bf16.mxu0 %v7991_v13  ;;  %5837 = vmatprep.subr.bf16.mxu1 %v7994_v14  ;;  %v8077_v13 = vld [vmem:[%s9017_s30 + $0x748] ss:$16 sps:$4 sm:$0xff]   ;;  %v8082_v14 = vld [vmem:[%s9017_s30 + $0x764] ss:$16 sps:$4 sm:$0xff]  }
  0xc4   : > { %5305 = vmatpush1.bf16.msra.mxu0 %v7989_v15  ;;  %5838 = vmatpush1.bf16.msra.mxu1 %v7992_v17  ;;  %v8085_v15 = vld [vmem:[%s9017_s30 + $0x76c] ss:$16 sps:$4 sm:$0xff]   ;;  %v8080_v17 = vld [vmem:[%s9017_s30 + $0x760] ss:$16 sps:$4 sm:$0xff]  }
  0xc5   : > { %5306 = vmatprep.subr.bf16.mxu0 %v7997_v18  ;;  %5839 = vmatprep.subr.bf16.mxu1 %v8000_v19  ;;  %v8083_v18 = vld [vmem:[%s9017_s30 + $0x768] ss:$16 sps:$4 sm:$0xff]   ;;  %v8088_v19 = vld [vmem:[%s9017_s30 + $0x784] ss:$16 sps:$4 sm:$0xff]  }
  0xc8   : > { %5307 = vmatpush1.bf16.msra.mxu0 %v7995_v21  ;;  %5840 = vmatpush1.bf16.msra.mxu1 %v7998_v23  ;;  %v8091_v21 = vld [vmem:[%s9017_s30 + $0x78c] ss:$16 sps:$4 sm:$0xff]   ;;  %v8086_v23 = vld [vmem:[%s9017_s30 + $0x780] ss:$16 sps:$4 sm:$0xff]  }
  0xc9   : > { %5308 = vmatprep.subr.bf16.mxu0 %v8003_v24  ;;  %5841 = vmatprep.subr.bf16.mxu1 %v8006_v5  ;;  %v8089_v24 = vld [vmem:[%s9017_s30 + $0x788] ss:$16 sps:$4 sm:$0xff]   ;;  %v8094_v5 = vld [vmem:[%s9017_s30 + $0x7a4] ss:$16 sps:$4 sm:$0xff]  }
  0xcc   : > { %5309 = vmatpush1.bf16.msra.mxu0 %v8001_v8  ;;  %5842 = vmatpush1.bf16.msra.mxu1 %v8004_v25  ;;  %v8097_v8 = vld [vmem:[%s9017_s30 + $0x7ac] ss:$16 sps:$4 sm:$0xff]   ;;  %v8092_v25 = vld [vmem:[%s9017_s30 + $0x7a0] ss:$16 sps:$4 sm:$0xff]  }
  0xcd   : > { %5310 = vmatprep.subr.bf16.mxu0 %v8009_v26  ;;  %5843 = vmatprep.subr.bf16.mxu1 %v8012_v16  ;;  %v8095_v26 = vld [vmem:[%s9017_s30 + $0x7a8] ss:$16 sps:$4 sm:$0xff]   ;;  %v8100_v16 = vld [vmem:[%s9017_s30 + $0x7c4] ss:$16 sps:$4 sm:$0xff]  }
  0xd0   : > { %5311 = vmatpush1.bf16.msra.mxu0 %v8007_v27  ;;  %5844 = vmatpush1.bf16.msra.mxu1 %v8010_v28  ;;  %v8103_v27 = vld [vmem:[%s9017_s30 + $0x7cc] ss:$16 sps:$4 sm:$0xff]   ;;  %v8098_v28 = vld [vmem:[%s9017_s30 + $0x7c0] ss:$16 sps:$4 sm:$0xff]  }
  0xd1   : > { %5321 = vmatprep.subr.bf16.mxu0 %v8016_v29  ;;  %5854 = vmatprep.subr.bf16.mxu1 %v8019_v31  ;;  %v9314_v29 = vld.sshfl [vmem:[%s10001_s0 + $0x8] sm:$0xff pattern:$0x75316420] }
  0xd2   : > { %v8101_v31 = vld [vmem:[%s9017_s30 + $0x7c8] ss:$16 sps:$4 sm:$0xff]  }
  0xd3   : > { %5313 = vmatmul.mubr.bf16.vlgmr.msra.gmra.mrb[0].mxu0 %v9250_v33  ;;  %5846 = vmatmul.mubr.bf16.vlgmr.msra.gmra.mrb[0].mxu1 %v9250_v33 }
  0xd4   : > { %5322 = vmatpush1.bf16.msra.mxu0 %v8014_v32  ;;  %5855 = vmatpush1.bf16.msra.mxu1 %v8017_v20  ;;  %v8106_v32 = vld [vmem:[%s9017_s30 + $0x7e4] ss:$16 sps:$4 sm:$0xff]   ;;  %v8109_v20 = vld [vmem:[%s9017_s30 + $0x7ec] ss:$16 sps:$4 sm:$0xff]  }
  0xd5   : > { %5323 = vmatprep.subr.bf16.mxu0 %v8022_v34  ;;  %5856 = vmatprep.subr.bf16.mxu1 %v8025_v35  ;;  %v8104_v34 = vld [vmem:[%s9017_s30 + $0x7e0] ss:$16 sps:$4 sm:$0xff]   ;;  %v8107_v35 = vld [vmem:[%s9017_s30 + $0x7e8] ss:$16 sps:$4 sm:$0xff]  }
  0xd6   : > { %5353 = vmatprep.mubr.bf16.mxu0 %v1137_v36  ;;  %5886 = vmatprep.mubr.bf16.mxu1 %v1137_v36  ;;  %v8112_v36 = vld [vmem:[%s9017_s30 + $0x804] ss:$16 sps:$4 sm:$0xff]  }
  0xd8   : > { %5324 = vmatpush1.bf16.msra.mxu0 %v8020_v37  ;;  %5857 = vmatpush1.bf16.msra.mxu1 %v8023_v22  ;;  %v8115_v37 = vld [vmem:[%s9017_s30 + $0x80c] ss:$16 sps:$4 sm:$0xff]   ;;  %v1153_v22 = vcombine.high %v9314_v29, %v9314_v29 }
  0xd9   : > { %5325 = vmatprep.subr.bf16.mxu0 %v8028_v38  ;;  %5858 = vmatprep.subr.bf16.mxu1 %v8031_v39  ;;  %v8110_v38 = vld [vmem:[%s9017_s30 + $0x800] ss:$16 sps:$4 sm:$0xff]   ;;  %v1135_v39 = vcombine.high %v9250_v33, %v9250_v33 }
  0xda   : > { %v8116_v33 = vld [vmem:[%s9017_s30 + $0x820] ss:$16 sps:$4 sm:$0xff]  }
  0xdc   : > { %5326 = vmatpush1.bf16.msra.mxu0 %v8026_v30  ;;  %5859 = vmatpush1.bf16.msra.mxu1 %v8029_v40  ;;  %v8113_v30 = vld [vmem:[%s9017_s30 + $0x808] ss:$16 sps:$4 sm:$0xff]   ;;  %v8118_v40 = vld [vmem:[%s9017_s30 + $0x824] ss:$16 sps:$4 sm:$0xff]  }
  0xdd   : > { %5327 = vmatprep.subr.bf16.mxu0 %v8034_v41  ;;  %5860 = vmatprep.subr.bf16.mxu1 %v8037_v42  ;;  %v8121_v41 = vld [vmem:[%s9017_s30 + $0x82c] ss:$16 sps:$4 sm:$0xff]   ;;  %v9332_v42 = vrot.slane %v1153_v22, %v9012_v6  ;;  %v8197_v22 = vld [vmem:[%s9017_s30 + $0x9c8] ss:$16 sps:$4 sm:$0xff]  }
  0xe0   : > { %5328 = vmatpush1.bf16.msra.mxu0 %v8032_v43  ;;  %5861 = vmatpush1.bf16.msra.mxu1 %v8035_v44  ;;  %v8119_v43 = vld [vmem:[%s9017_s30 + $0x828] ss:$16 sps:$4 sm:$0xff]   ;;  %v8124_v44 = vld [vmem:[%s9017_s30 + $0x844] ss:$16 sps:$4 sm:$0xff]  }
  0xe1   : > { %5329 = vmatprep.subr.bf16.mxu0 %v8040_v45  ;;  %5862 = vmatprep.subr.bf16.mxu1 %v8043_v46  ;;  %v8127_v45 = vld [vmem:[%s9017_s30 + $0x84c] ss:$16 sps:$4 sm:$0xff]   ;;  %v8122_v46 = vld [vmem:[%s9017_s30 + $0x840] ss:$16 sps:$4 sm:$0xff]  }
  0xe4   : > { %5330 = vmatpush1.bf16.msra.mxu0 %v8038_v47  ;;  %5863 = vmatpush1.bf16.msra.mxu1 %v8041_v48  ;;  %v8125_v47 = vld [vmem:[%s9017_s30 + $0x848] ss:$16 sps:$4 sm:$0xff]   ;;  %v8130_v48 = vld [vmem:[%s9017_s30 + $0x864] ss:$16 sps:$4 sm:$0xff]  }
  0xe5   : > { %5331 = vmatprep.subr.bf16.mxu0 %v8046_v49  ;;  %5864 = vmatprep.subr.bf16.mxu1 %v8049_v50  ;;  %v8133_v49 = vld [vmem:[%s9017_s30 + $0x86c] ss:$16 sps:$4 sm:$0xff]   ;;  %v8128_v50 = vld [vmem:[%s9017_s30 + $0x860] ss:$16 sps:$4 sm:$0xff]  }
  0xe8   : > { %5332 = vmatpush1.bf16.msra.mxu0 %v8044_v51  ;;  %5865 = vmatpush1.bf16.msra.mxu1 %v8047_v52  ;;  %v8131_v51 = vld [vmem:[%s9017_s30 + $0x868] ss:$16 sps:$4 sm:$0xff]   ;;  %v8136_v52 = vld [vmem:[%s9017_s30 + $0x884] ss:$16 sps:$4 sm:$0xff]  }
  0xe9   : > { %5333 = vmatprep.subr.bf16.mxu0 %v8052_v53  ;;  %5866 = vmatprep.subr.bf16.mxu1 %v8055_v54  ;;  %v8139_v53 = vld [vmem:[%s9017_s30 + $0x88c] ss:$16 sps:$4 sm:$0xff]   ;;  %v8134_v54 = vld [vmem:[%s9017_s30 + $0x880] ss:$16 sps:$4 sm:$0xff]  }
  0xec   : > { %5334 = vmatpush1.bf16.msra.mxu0 %v8050_v55  ;;  %5867 = vmatpush1.bf16.msra.mxu1 %v8053_v56  ;;  %v8137_v55 = vld [vmem:[%s9017_s30 + $0x888] ss:$16 sps:$4 sm:$0xff]   ;;  %v8142_v56 = vld [vmem:[%s9017_s30 + $0x8a4] ss:$16 sps:$4 sm:$0xff]  }
  0xed   : > { %5335 = vmatprep.subr.bf16.mxu0 %v8058_v57  ;;  %5868 = vmatprep.subr.bf16.mxu1 %v8061_v58  ;;  %v8145_v57 = vld [vmem:[%s9017_s30 + $0x8ac] ss:$16 sps:$4 sm:$0xff]   ;;  %v8140_v58 = vld [vmem:[%s9017_s30 + $0x8a0] ss:$16 sps:$4 sm:$0xff]  }
  0xf0   : > { %5336 = vmatpush1.bf16.msra.mxu0 %v8056_v59  ;;  %5869 = vmatpush1.bf16.msra.mxu1 %v8059_v60  ;;  %v8143_v59 = vld [vmem:[%s9017_s30 + $0x8a8] ss:$16 sps:$4 sm:$0xff]   ;;  %v8148_v60 = vld [vmem:[%s9017_s30 + $0x8c4] ss:$16 sps:$4 sm:$0xff]  }
  0xf1   : > { %5337 = vmatprep.subr.bf16.mxu0 %v8064_v61  ;;  %5870 = vmatprep.subr.bf16.mxu1 %v8067_v62  ;;  %v8151_v61 = vld [vmem:[%s9017_s30 + $0x8cc] ss:$16 sps:$4 sm:$0xff]   ;;  %v8146_v62 = vld [vmem:[%s9017_s30 + $0x8c0] ss:$16 sps:$4 sm:$0xff]  }
  0xf4   : > { %5338 = vmatpush1.bf16.msra.mxu0 %v8062_v63  ;;  %5871 = vmatpush1.bf16.msra.mxu1 %v8065_v1  ;;  %v8149_v63 = vld [vmem:[%s9017_s30 + $0x8c8] ss:$16 sps:$4 sm:$0xff]   ;;  %v8154_v1 = vld [vmem:[%s9017_s30 + $0x8e4] ss:$16 sps:$4 sm:$0xff]  }
  0xf5   : > { %5339 = vmatprep.subr.bf16.mxu0 %v8070_v2  ;;  %5872 = vmatprep.subr.bf16.mxu1 %v8073_v4  ;;  %v8157_v2 = vld [vmem:[%s9017_s30 + $0x8ec] ss:$16 sps:$4 sm:$0xff]   ;;  %v8152_v4 = vld [vmem:[%s9017_s30 + $0x8e0] ss:$16 sps:$4 sm:$0xff]  }
  0xf8   : > { %5340 = vmatpush1.bf16.msra.mxu0 %v8068_v7  ;;  %5873 = vmatpush1.bf16.msra.mxu1 %v8071_v9  ;;  %v8155_v7 = vld [vmem:[%s9017_s30 + $0x8e8] ss:$16 sps:$4 sm:$0xff]   ;;  %v8160_v9 = vld [vmem:[%s9017_s30 + $0x904] ss:$16 sps:$4 sm:$0xff]  }
  0xf9   : > { %5341 = vmatprep.subr.bf16.mxu0 %v8076_v10  ;;  %5874 = vmatprep.subr.bf16.mxu1 %v8079_v11  ;;  %v8163_v10 = vld [vmem:[%s9017_s30 + $0x90c] ss:$16 sps:$4 sm:$0xff]   ;;  %v8158_v11 = vld [vmem:[%s9017_s30 + $0x900] ss:$16 sps:$4 sm:$0xff]  }
  0xfc   : > { %5342 = vmatpush1.bf16.msra.mxu0 %v8074_v12  ;;  %5875 = vmatpush1.bf16.msra.mxu1 %v8077_v13  ;;  %v8161_v12 = vld [vmem:[%s9017_s30 + $0x908] ss:$16 sps:$4 sm:$0xff]   ;;  %v8166_v13 = vld [vmem:[%s9017_s30 + $0x924] ss:$16 sps:$4 sm:$0xff]  }
  0xfd   : > { %5343 = vmatprep.subr.bf16.mxu0 %v8082_v14  ;;  %5876 = vmatprep.subr.bf16.mxu1 %v8085_v15  ;;  %v8169_v14 = vld [vmem:[%s9017_s30 + $0x92c] ss:$16 sps:$4 sm:$0xff]   ;;  %v8164_v15 = vld [vmem:[%s9017_s30 + $0x920] ss:$16 sps:$4 sm:$0xff]  }
 0x100   : > { %5344 = vmatpush1.bf16.msra.mxu0 %v8080_v17  ;;  %5877 = vmatpush1.bf16.msra.mxu1 %v8083_v18  ;;  %v8167_v17 = vld [vmem:[%s9017_s30 + $0x928] ss:$16 sps:$4 sm:$0xff]   ;;  %v8172_v18 = vld [vmem:[%s9017_s30 + $0x944] ss:$16 sps:$4 sm:$0xff]  }
 0x101   : > { %5345 = vmatprep.subr.bf16.mxu0 %v8088_v19  ;;  %5878 = vmatprep.subr.bf16.mxu1 %v8091_v21  ;;  %v8175_v19 = vld [vmem:[%s9017_s30 + $0x94c] ss:$16 sps:$4 sm:$0xff]   ;;  %v8170_v21 = vld [vmem:[%s9017_s30 + $0x940] ss:$16 sps:$4 sm:$0xff]  }
 0x104   : > { %5346 = vmatpush1.bf16.msra.mxu0 %v8086_v23  ;;  %5879 = vmatpush1.bf16.msra.mxu1 %v8089_v24  ;;  %v8173_v23 = vld [vmem:[%s9017_s30 + $0x948] ss:$16 sps:$4 sm:$0xff]   ;;  %v8178_v24 = vld [vmem:[%s9017_s30 + $0x964] ss:$16 sps:$4 sm:$0xff]  }
 0x105   : > { %5347 = vmatprep.subr.bf16.mxu0 %v8094_v5  ;;  %5880 = vmatprep.subr.bf16.mxu1 %v8097_v8  ;;  %v8181_v5 = vld [vmem:[%s9017_s30 + $0x96c] ss:$16 sps:$4 sm:$0xff]   ;;  %v8176_v8 = vld [vmem:[%s9017_s30 + $0x960] ss:$16 sps:$4 sm:$0xff]  }
 0x108   : > { %5348 = vmatpush1.bf16.msra.mxu0 %v8092_v25  ;;  %5881 = vmatpush1.bf16.msra.mxu1 %v8095_v26  ;;  %v8179_v25 = vld [vmem:[%s9017_s30 + $0x968] ss:$16 sps:$4 sm:$0xff]   ;;  %v8184_v26 = vld [vmem:[%s9017_s30 + $0x984] ss:$16 sps:$4 sm:$0xff]  }
 0x109   : > { %5349 = vmatprep.subr.bf16.mxu0 %v8100_v16  ;;  %5882 = vmatprep.subr.bf16.mxu1 %v8103_v27  ;;  %v8187_v16 = vld [vmem:[%s9017_s30 + $0x98c] ss:$16 sps:$4 sm:$0xff]   ;;  %v8182_v27 = vld [vmem:[%s9017_s30 + $0x980] ss:$16 sps:$4 sm:$0xff]  }
 0x10c   : > { %5350 = vmatpush1.bf16.msra.mxu0 %v8098_v28  ;;  %5883 = vmatpush1.bf16.msra.mxu1 %v8101_v31  ;;  %v8185_v28 = vld [vmem:[%s9017_s30 + $0x988] ss:$16 sps:$4 sm:$0xff]   ;;  %v8190_v31 = vld [vmem:[%s9017_s30 + $0x9a4] ss:$16 sps:$4 sm:$0xff]  }
 0x10d   : > { %5351 = vmatprep.subr.bf16.mxu0 %v8106_v32  ;;  %5884 = vmatprep.subr.bf16.mxu1 %v8109_v20  ;;  %v8193_v32 = vld [vmem:[%s9017_s30 + $0x9ac] ss:$16 sps:$4 sm:$0xff]   ;;  %v8188_v20 = vld [vmem:[%s9017_s30 + $0x9a0] ss:$16 sps:$4 sm:$0xff]  }
 0x110   : > { %5352 = vmatpush1.bf16.msra.mxu0 %v8104_v34  ;;  %5885 = vmatpush1.bf16.msra.mxu1 %v8107_v35  ;;  %v8191_v34 = vld [vmem:[%s9017_s30 + $0x9a8] ss:$16 sps:$4 sm:$0xff]   ;;  %v8196_v35 = vld [vmem:[%s9017_s30 + $0x9c4] ss:$16 sps:$4 sm:$0xff]  }
 0x111   : > { %5362 = vmatprep.subr.bf16.mxu0 %v8112_v36  ;;  %5895 = vmatprep.subr.bf16.mxu1 %v8115_v37  ;;  %v8199_v36 = vld [vmem:[%s9017_s30 + $0x9cc] ss:$16 sps:$4 sm:$0xff]   ;;  %v8194_v37 = vld [vmem:[%s9017_s30 + $0x9c0] ss:$16 sps:$4 sm:$0xff]  }
 0x113   : > { %5354 = vmatmul.mubr.bf16.vlgmr.msra.gmra.mrb[0].mxu0 %v1135_v39  ;;  %5887 = vmatmul.mubr.bf16.vlgmr.msra.gmra.mrb[0].mxu1 %v1135_v39  ;;  %v8205_v39 = vld [vmem:[%s9017_s30 + $0x9ec] ss:$16 sps:$4 sm:$0xff]  }
 0x114   : > { %5363 = vmatpush1.bf16.msra.mxu0 %v8110_v38  ;;  %5896 = vmatpush1.bf16.msra.mxu1 %v8113_v30  ;;  %v8202_v38 = vld [vmem:[%s9017_s30 + $0x9e4] ss:$16 sps:$4 sm:$0xff]   ;;  %v8200_v30 = vld [vmem:[%s9017_s30 + $0x9e0] ss:$16 sps:$4 sm:$0xff]  }
 0x115   : > { %5364 = vmatprep.subr.bf16.mxu0 %v8118_v40  ;;  %5897 = vmatprep.subr.bf16.mxu1 %v8121_v41  ;;  %v8203_v40 = vld [vmem:[%s9017_s30 + $0x9e8] ss:$16 sps:$4 sm:$0xff]   ;;  %v8208_v41 = vld [vmem:[%s9017_s30 + $0xa04] ss:$16 sps:$4 sm:$0xff]  }
 0x116   : > { %5394 = vmatprep.mubr.bf16.mxu0 %v9332_v42  ;;  %5927 = vmatprep.mubr.bf16.mxu1 %v9332_v42 }
 0x118   : > { %5365 = vmatpush1.bf16.msra.mxu0 %v8116_v33  ;;  %5898 = vmatpush1.bf16.msra.mxu1 %v8119_v43  ;;  %v8211_v33 = vld [vmem:[%s9017_s30 + $0xa0c] ss:$16 sps:$4 sm:$0xff]   ;;  %v9398_v43 = vrot.slane %v9314_v29, %v9012_v6  ;;  %v8212_v29 = vld [vmem:[%s9017_s30 + $0xa20] ss:$16 sps:$4 sm:$0xff]  }
 0x119   : > { %5366 = vmatprep.subr.bf16.mxu0 %v8124_v44  ;;  %5899 = vmatprep.subr.bf16.mxu1 %v8127_v45  ;;  %v8206_v44 = vld [vmem:[%s9017_s30 + $0xa00] ss:$16 sps:$4 sm:$0xff]   ;;  %v8209_v45 = vld [vmem:[%s9017_s30 + $0xa08] ss:$16 sps:$4 sm:$0xff]  }
 0x11c   : > { %5367 = vmatpush1.bf16.msra.mxu0 %v8122_v46  ;;  %5900 = vmatpush1.bf16.msra.mxu1 %v8125_v47  ;;  %v8214_v46 = vld [vmem:[%s9017_s30 + $0xa24] ss:$16 sps:$4 sm:$0xff]   ;;  %v8217_v47 = vld [vmem:[%s9017_s30 + $0xa2c] ss:$16 sps:$4 sm:$0xff]  }
 0x11d   : > { %5368 = vmatprep.subr.bf16.mxu0 %v8130_v48  ;;  %5901 = vmatprep.subr.bf16.mxu1 %v8133_v49  ;;  %v1185_v48 = vcombine.high %v9332_v42, %v9332_v42  ;;  %v8215_v49 = vld [vmem:[%s9017_s30 + $0xa28] ss:$16 sps:$4 sm:$0xff]   ;;  %v8218_v42 = vld [vmem:[%s9017_s30 + $0xa40] ss:$16 sps:$4 sm:$0xff]  }
 0x120   : > { %5369 = vmatpush1.bf16.msra.mxu0 %v8128_v50  ;;  %5902 = vmatpush1.bf16.msra.mxu1 %v8131_v51  ;;  %v8220_v50 = vld [vmem:[%s9017_s30 + $0xa44] ss:$16 sps:$4 sm:$0xff]   ;;  %v8223_v51 = vld [vmem:[%s9017_s30 + $0xa4c] ss:$16 sps:$4 sm:$0xff]  }
 0x121   : > { %5370 = vmatprep.subr.bf16.mxu0 %v8136_v52  ;;  %5903 = vmatprep.subr.bf16.mxu1 %v8139_v53  ;;  %v8221_v52 = vld [vmem:[%s9017_s30 + $0xa48] ss:$16 sps:$4 sm:$0xff]   ;;  %v8226_v53 = vld [vmem:[%s9017_s30 + $0xa64] ss:$16 sps:$4 sm:$0xff]  }
 0x124   : > { %5371 = vmatpush1.bf16.msra.mxu0 %v8134_v54  ;;  %5904 = vmatpush1.bf16.msra.mxu1 %v8137_v55  ;;  %v8229_v54 = vld [vmem:[%s9017_s30 + $0xa6c] ss:$16 sps:$4 sm:$0xff]   ;;  %v8224_v55 = vld [vmem:[%s9017_s30 + $0xa60] ss:$16 sps:$4 sm:$0xff]  }
 0x125   : > { %5372 = vmatprep.subr.bf16.mxu0 %v8142_v56  ;;  %5905 = vmatprep.subr.bf16.mxu1 %v8145_v57  ;;  %v8227_v56 = vld [vmem:[%s9017_s30 + $0xa68] ss:$16 sps:$4 sm:$0xff]   ;;  %v8232_v57 = vld [vmem:[%s9017_s30 + $0xa84] ss:$16 sps:$4 sm:$0xff]  }
 0x128   : > { %5373 = vmatpush1.bf16.msra.mxu0 %v8140_v58  ;;  %5906 = vmatpush1.bf16.msra.mxu1 %v8143_v59  ;;  %v8235_v58 = vld [vmem:[%s9017_s30 + $0xa8c] ss:$16 sps:$4 sm:$0xff]   ;;  %v8230_v59 = vld [vmem:[%s9017_s30 + $0xa80] ss:$16 sps:$4 sm:$0xff]  }
 0x129   : > { %5374 = vmatprep.subr.bf16.mxu0 %v8148_v60  ;;  %5907 = vmatprep.subr.bf16.mxu1 %v8151_v61  ;;  %v8233_v60 = vld [vmem:[%s9017_s30 + $0xa88] ss:$16 sps:$4 sm:$0xff]   ;;  %v8238_v61 = vld [vmem:[%s9017_s30 + $0xaa4] ss:$16 sps:$4 sm:$0xff]  }
 0x12c   : > { %5375 = vmatpush1.bf16.msra.mxu0 %v8146_v62  ;;  %5908 = vmatpush1.bf16.msra.mxu1 %v8149_v63  ;;  %v8241_v62 = vld [vmem:[%s9017_s30 + $0xaac] ss:$16 sps:$4 sm:$0xff]   ;;  %v8236_v63 = vld [vmem:[%s9017_s30 + $0xaa0] ss:$16 sps:$4 sm:$0xff]  }
 0x12d   : > { %5376 = vmatprep.subr.bf16.mxu0 %v8154_v1  ;;  %5909 = vmatprep.subr.bf16.mxu1 %v8157_v2  ;;  %v8239_v1 = vld [vmem:[%s9017_s30 + $0xaa8] ss:$16 sps:$4 sm:$0xff]   ;;  %v8244_v2 = vld [vmem:[%s9017_s30 + $0xac4] ss:$16 sps:$4 sm:$0xff]  }
 0x130   : > { %5377 = vmatpush1.bf16.msra.mxu0 %v8152_v4  ;;  %5910 = vmatpush1.bf16.msra.mxu1 %v8155_v7  ;;  %v8247_v4 = vld [vmem:[%s9017_s30 + $0xacc] ss:$16 sps:$4 sm:$0xff]   ;;  %v8242_v7 = vld [vmem:[%s9017_s30 + $0xac0] ss:$16 sps:$4 sm:$0xff]  }
 0x131   : > { %5378 = vmatprep.subr.bf16.mxu0 %v8160_v9  ;;  %5911 = vmatprep.subr.bf16.mxu1 %v8163_v10  ;;  %v8245_v9 = vld [vmem:[%s9017_s30 + $0xac8] ss:$16 sps:$4 sm:$0xff]   ;;  %v8250_v10 = vld [vmem:[%s9017_s30 + $0xae4] ss:$16 sps:$4 sm:$0xff]  }
 0x134   : > { %5379 = vmatpush1.bf16.msra.mxu0 %v8158_v11  ;;  %5912 = vmatpush1.bf16.msra.mxu1 %v8161_v12  ;;  %v8253_v11 = vld [vmem:[%s9017_s30 + $0xaec] ss:$16 sps:$4 sm:$0xff]   ;;  %v8248_v12 = vld [vmem:[%s9017_s30 + $0xae0] ss:$16 sps:$4 sm:$0xff]  }
 0x135   : > { %5380 = vmatprep.subr.bf16.mxu0 %v8166_v13  ;;  %5913 = vmatprep.subr.bf16.mxu1 %v8169_v14  ;;  %v8251_v13 = vld [vmem:[%s9017_s30 + $0xae8] ss:$16 sps:$4 sm:$0xff]   ;;  %v8256_v14 = vld [vmem:[%s9017_s30 + $0xb04] ss:$16 sps:$4 sm:$0xff]  }
 0x138   : > { %5381 = vmatpush1.bf16.msra.mxu0 %v8164_v15  ;;  %5914 = vmatpush1.bf16.msra.mxu1 %v8167_v17  ;;  %v8259_v15 = vld [vmem:[%s9017_s30 + $0xb0c] ss:$16 sps:$4 sm:$0xff]   ;;  %v8254_v17 = vld [vmem:[%s9017_s30 + $0xb00] ss:$16 sps:$4 sm:$0xff]  }
 0x139   : > { %5382 = vmatprep.subr.bf16.mxu0 %v8172_v18  ;;  %5915 = vmatprep.subr.bf16.mxu1 %v8175_v19  ;;  %v8257_v18 = vld [vmem:[%s9017_s30 + $0xb08] ss:$16 sps:$4 sm:$0xff]   ;;  %v8262_v19 = vld [vmem:[%s9017_s30 + $0xb24] ss:$16 sps:$4 sm:$0xff]  }
 0x13c   : > { %5383 = vmatpush1.bf16.msra.mxu0 %v8170_v21  ;;  %5916 = vmatpush1.bf16.msra.mxu1 %v8173_v23  ;;  %v8265_v21 = vld [vmem:[%s9017_s30 + $0xb2c] ss:$16 sps:$4 sm:$0xff]   ;;  %v8260_v23 = vld [vmem:[%s9017_s30 + $0xb20] ss:$16 sps:$4 sm:$0xff]  }
 0x13d   : > { %5384 = vmatprep.subr.bf16.mxu0 %v8178_v24  ;;  %5917 = vmatprep.subr.bf16.mxu1 %v8181_v5  ;;  %v8263_v24 = vld [vmem:[%s9017_s30 + $0xb28] ss:$16 sps:$4 sm:$0xff]   ;;  %v8268_v5 = vld [vmem:[%s9017_s30 + $0xb44] ss:$16 sps:$4 sm:$0xff]  }
 0x140   : > { %5385 = vmatpush1.bf16.msra.mxu0 %v8176_v8  ;;  %5918 = vmatpush1.bf16.msra.mxu1 %v8179_v25  ;;  %v8271_v8 = vld [vmem:[%s9017_s30 + $0xb4c] ss:$16 sps:$4 sm:$0xff]   ;;  %v8266_v25 = vld [vmem:[%s9017_s30 + $0xb40] ss:$16 sps:$4 sm:$0xff]  }
 0x141   : > { %5386 = vmatprep.subr.bf16.mxu0 %v8184_v26  ;;  %5919 = vmatprep.subr.bf16.mxu1 %v8187_v16  ;;  %v8269_v26 = vld [vmem:[%s9017_s30 + $0xb48] ss:$16 sps:$4 sm:$0xff]   ;;  %v8274_v16 = vld [vmem:[%s9017_s30 + $0xb64] ss:$16 sps:$4 sm:$0xff]  }
 0x144   : > { %5387 = vmatpush1.bf16.msra.mxu0 %v8182_v27  ;;  %5920 = vmatpush1.bf16.msra.mxu1 %v8185_v28  ;;  %v8277_v27 = vld [vmem:[%s9017_s30 + $0xb6c] ss:$16 sps:$4 sm:$0xff]   ;;  %v8272_v28 = vld [vmem:[%s9017_s30 + $0xb60] ss:$16 sps:$4 sm:$0xff]  }
 0x145   : > { %5388 = vmatprep.subr.bf16.mxu0 %v8190_v31  ;;  %5921 = vmatprep.subr.bf16.mxu1 %v8193_v32  ;;  %v8275_v31 = vld [vmem:[%s9017_s30 + $0xb68] ss:$16 sps:$4 sm:$0xff]   ;;  %v8280_v32 = vld [vmem:[%s9017_s30 + $0xb84] ss:$16 sps:$4 sm:$0xff]  }
 0x148   : > { %5389 = vmatpush1.bf16.msra.mxu0 %v8188_v20  ;;  %5922 = vmatpush1.bf16.msra.mxu1 %v8191_v34  ;;  %v8283_v20 = vld [vmem:[%s9017_s30 + $0xb8c] ss:$16 sps:$4 sm:$0xff]   ;;  %v8278_v34 = vld [vmem:[%s9017_s30 + $0xb80] ss:$16 sps:$4 sm:$0xff]  }
 0x149   : > { %5390 = vmatprep.subr.bf16.mxu0 %v8196_v35  ;;  %5923 = vmatprep.subr.bf16.mxu1 %v8199_v36  ;;  %v8281_v35 = vld [vmem:[%s9017_s30 + $0xb88] ss:$16 sps:$4 sm:$0xff]   ;;  %v8286_v36 = vld [vmem:[%s9017_s30 + $0xba4] ss:$16 sps:$4 sm:$0xff]  }
 0x14c   : > { %5391 = vmatpush1.bf16.msra.mxu0 %v8194_v37  ;;  %5924 = vmatpush1.bf16.msra.mxu1 %v8197_v22  ;;  %v8289_v37 = vld [vmem:[%s9017_s30 + $0xbac] ss:$16 sps:$4 sm:$0xff]   ;;  %v8284_v22 = vld [vmem:[%s9017_s30 + $0xba0] ss:$16 sps:$4 sm:$0xff]  }
 0x14d   : > { %5392 = vmatprep.subr.bf16.mxu0 %v8202_v38  ;;  %5925 = vmatprep.subr.bf16.mxu1 %v8205_v39  ;;  %v8287_v38 = vld [vmem:[%s9017_s30 + $0xba8] ss:$16 sps:$4 sm:$0xff]   ;;  %v8292_v39 = vld [vmem:[%s9017_s30 + $0xbc4] ss:$16 sps:$4 sm:$0xff]  }
 0x150   : > { %5393 = vmatpush1.bf16.msra.mxu0 %v8200_v30  ;;  %5926 = vmatpush1.bf16.msra.mxu1 %v8203_v40  ;;  %v8295_v30 = vld [vmem:[%s9017_s30 + $0xbcc] ss:$16 sps:$4 sm:$0xff]  }
 0x151   : > { %5403 = vmatprep.subr.bf16.mxu0 %v8208_v41  ;;  %5936 = vmatprep.subr.bf16.mxu1 %v8211_v33  ;;  %v8936_v40 = vld [vmem:[%s10001_s0 + $0x8] sm:$0xff]  ;;  %v8290_v33 = vld [vmem:[%s9017_s30 + $0xbc0] ss:$16 sps:$4 sm:$0xff]  }
 0x152   : > { %v1138_v41 = vcombine.high %v8936_v40, %v8936_v40  ;;  %v8379_v40 = vld [vmem:[%s9017_s30 + $0xd8c] ss:$16 sps:$4 sm:$0xff]  }
 0x153   : > { %5395 = vmatmul.mubr.bf16.vlgmr.msra.gmra.mrb[0].mxu0 %v9398_v43  ;;  %5928 = vmatmul.mubr.bf16.vlgmr.msra.gmra.mrb[0].mxu1 %v9398_v43 }
 0x154   : > { %5404 = vmatpush1.bf16.msra.mxu0 %v8206_v44  ;;  %5937 = vmatpush1.bf16.msra.mxu1 %v8209_v45  ;;  %v8293_v44 = vld [vmem:[%s9017_s30 + $0xbc8] ss:$16 sps:$4 sm:$0xff]   ;;  %v8298_v45 = vld [vmem:[%s9017_s30 + $0xbe4] ss:$16 sps:$4 sm:$0xff]  }
 0x155   : > { %5405 = vmatprep.subr.bf16.mxu0 %v8214_v46  ;;  %5938 = vmatprep.subr.bf16.mxu1 %v8217_v47  ;;  %v8301_v46 = vld [vmem:[%s9017_s30 + $0xbec] ss:$16 sps:$4 sm:$0xff]   ;;  %v9468_v47 = vrot.slane %v1138_v41, %v9012_v6  ;;  %v8374_v41 = vld [vmem:[%s9017_s30 + $0xd80] ss:$16 sps:$4 sm:$0xff]  }
 0x156   : > { %5435 = vmatprep.mubr.bf16.mxu0 %v1185_v48  ;;  %5968 = vmatprep.mubr.bf16.mxu1 %v1185_v48  ;;  %v8296_v48 = vld [vmem:[%s9017_s30 + $0xbe0] ss:$16 sps:$4 sm:$0xff]  }
 0x158   : > { %5406 = vmatpush1.bf16.msra.mxu0 %v8212_v29  ;;  %5939 = vmatpush1.bf16.msra.mxu1 %v8215_v49  ;;  %v8299_v29 = vld [vmem:[%s9017_s30 + $0xbe8] ss:$16 sps:$4 sm:$0xff]   ;;  %v8304_v49 = vld [vmem:[%s9017_s30 + $0xc04] ss:$16 sps:$4 sm:$0xff]  }
 0x159   : > { %5407 = vmatprep.subr.bf16.mxu0 %v8220_v50  ;;  %5940 = vmatprep.subr.bf16.mxu1 %v8223_v51  ;;  %v8307_v50 = vld [vmem:[%s9017_s30 + $0xc0c] ss:$16 sps:$4 sm:$0xff]   ;;  %v1154_v51 = vcombine.high %v9468_v47, %v9468_v47 }
 0x15c   : > { %5408 = vmatpush1.bf16.msra.mxu0 %v8218_v42  ;;  %5941 = vmatpush1.bf16.msra.mxu1 %v8221_v52  ;;  %v1183_v42 = vcombine.high %v9398_v43, %v9398_v43  ;;  %v8302_v52 = vld [vmem:[%s9017_s30 + $0xc00] ss:$16 sps:$4 sm:$0xff]  }
 0x15d   : > { %5409 = vmatprep.subr.bf16.mxu0 %v8226_v53  ;;  %5942 = vmatprep.subr.bf16.mxu1 %v8229_v54  ;;  %v8305_v53 = vld [vmem:[%s9017_s30 + $0xc08] ss:$16 sps:$4 sm:$0xff]   ;;  %v8310_v54 = vld [vmem:[%s9017_s30 + $0xc24] ss:$16 sps:$4 sm:$0xff]   ;;  %v8308_v43 = vld [vmem:[%s9017_s30 + $0xc20] ss:$16 sps:$4 sm:$0xff]  }
 0x160   : > { %5410 = vmatpush1.bf16.msra.mxu0 %v8224_v55  ;;  %5943 = vmatpush1.bf16.msra.mxu1 %v8227_v56  ;;  %v8313_v55 = vld [vmem:[%s9017_s30 + $0xc2c] ss:$16 sps:$4 sm:$0xff]   ;;  %v9483_v56 = vrot.slane %v1154_v51, %v9012_v6  ;;  %v8389_v51 = vld [vmem:[%s9017_s30 + $0xdc8] ss:$16 sps:$4 sm:$0xff]  }
 0x161   : > { %5411 = vmatprep.subr.bf16.mxu0 %v8232_v57  ;;  %5944 = vmatprep.subr.bf16.mxu1 %v8235_v58  ;;  %v8311_v57 = vld [vmem:[%s9017_s30 + $0xc28] ss:$16 sps:$4 sm:$0xff]   ;;  %v8316_v58 = vld [vmem:[%s9017_s30 + $0xc44] ss:$16 sps:$4 sm:$0xff]  }
 0x164   : > { %5412 = vmatpush1.bf16.msra.mxu0 %v8230_v59  ;;  %5945 = vmatpush1.bf16.msra.mxu1 %v8233_v60  ;;  %v8319_v59 = vld [vmem:[%s9017_s30 + $0xc4c] ss:$16 sps:$4 sm:$0xff]   ;;  %v8314_v60 = vld [vmem:[%s9017_s30 + $0xc40] ss:$16 sps:$4 sm:$0xff]  }
 0x165   : > { %5413 = vmatprep.subr.bf16.mxu0 %v8238_v61  ;;  %5946 = vmatprep.subr.bf16.mxu1 %v8241_v62  ;;  %v8317_v61 = vld [vmem:[%s9017_s30 + $0xc48] ss:$16 sps:$4 sm:$0xff]   ;;  %v8322_v62 = vld [vmem:[%s9017_s30 + $0xc64] ss:$16 sps:$4 sm:$0xff]  }
 0x168   : > { %5414 = vmatpush1.bf16.msra.mxu0 %v8236_v63  ;;  %5947 = vmatpush1.bf16.msra.mxu1 %v8239_v1  ;;  %v8325_v63 = vld [vmem:[%s9017_s30 + $0xc6c] ss:$16 sps:$4 sm:$0xff]   ;;  %v8320_v1 = vld [vmem:[%s9017_s30 + $0xc60] ss:$16 sps:$4 sm:$0xff]  }
 0x169   : > { %5415 = vmatprep.subr.bf16.mxu0 %v8244_v2  ;;  %5948 = vmatprep.subr.bf16.mxu1 %v8247_v4  ;;  %v8323_v2 = vld [vmem:[%s9017_s30 + $0xc68] ss:$16 sps:$4 sm:$0xff]   ;;  %v8328_v4 = vld [vmem:[%s9017_s30 + $0xc84] ss:$16 sps:$4 sm:$0xff]  }
 0x16c   : > { %5416 = vmatpush1.bf16.msra.mxu0 %v8242_v7  ;;  %5949 = vmatpush1.bf16.msra.mxu1 %v8245_v9  ;;  %v8331_v7 = vld [vmem:[%s9017_s30 + $0xc8c] ss:$16 sps:$4 sm:$0xff]   ;;  %v8326_v9 = vld [vmem:[%s9017_s30 + $0xc80] ss:$16 sps:$4 sm:$0xff]  }
 0x16d   : > { %5417 = vmatprep.subr.bf16.mxu0 %v8250_v10  ;;  %5950 = vmatprep.subr.bf16.mxu1 %v8253_v11  ;;  %v8329_v10 = vld [vmem:[%s9017_s30 + $0xc88] ss:$16 sps:$4 sm:$0xff]   ;;  %v8334_v11 = vld [vmem:[%s9017_s30 + $0xca4] ss:$16 sps:$4 sm:$0xff]  }
 0x170   : > { %5418 = vmatpush1.bf16.msra.mxu0 %v8248_v12  ;;  %5951 = vmatpush1.bf16.msra.mxu1 %v8251_v13  ;;  %v8337_v12 = vld [vmem:[%s9017_s30 + $0xcac] ss:$16 sps:$4 sm:$0xff]   ;;  %v8332_v13 = vld [vmem:[%s9017_s30 + $0xca0] ss:$16 sps:$4 sm:$0xff]  }
 0x171   : > { %5419 = vmatprep.subr.bf16.mxu0 %v8256_v14  ;;  %5952 = vmatprep.subr.bf16.mxu1 %v8259_v15  ;;  %v8335_v14 = vld [vmem:[%s9017_s30 + $0xca8] ss:$16 sps:$4 sm:$0xff]   ;;  %v8340_v15 = vld [vmem:[%s9017_s30 + $0xcc4] ss:$16 sps:$4 sm:$0xff]  }
 0x174   : > { %5420 = vmatpush1.bf16.msra.mxu0 %v8254_v17  ;;  %5953 = vmatpush1.bf16.msra.mxu1 %v8257_v18  ;;  %v8343_v17 = vld [vmem:[%s9017_s30 + $0xccc] ss:$16 sps:$4 sm:$0xff]   ;;  %v8338_v18 = vld [vmem:[%s9017_s30 + $0xcc0] ss:$16 sps:$4 sm:$0xff]  }
 0x175   : > { %5421 = vmatprep.subr.bf16.mxu0 %v8262_v19  ;;  %5954 = vmatprep.subr.bf16.mxu1 %v8265_v21  ;;  %v8341_v19 = vld [vmem:[%s9017_s30 + $0xcc8] ss:$16 sps:$4 sm:$0xff]   ;;  %v8346_v21 = vld [vmem:[%s9017_s30 + $0xce4] ss:$16 sps:$4 sm:$0xff]  }
 0x178   : > { %5422 = vmatpush1.bf16.msra.mxu0 %v8260_v23  ;;  %5955 = vmatpush1.bf16.msra.mxu1 %v8263_v24  ;;  %v8349_v23 = vld [vmem:[%s9017_s30 + $0xcec] ss:$16 sps:$4 sm:$0xff]   ;;  %v8344_v24 = vld [vmem:[%s9017_s30 + $0xce0] ss:$16 sps:$4 sm:$0xff]  }
 0x179   : > { %5423 = vmatprep.subr.bf16.mxu0 %v8268_v5  ;;  %5956 = vmatprep.subr.bf16.mxu1 %v8271_v8  ;;  %v8347_v5 = vld [vmem:[%s9017_s30 + $0xce8] ss:$16 sps:$4 sm:$0xff]   ;;  %v8352_v8 = vld [vmem:[%s9017_s30 + $0xd04] ss:$16 sps:$4 sm:$0xff]  }
 0x17c   : > { %5424 = vmatpush1.bf16.msra.mxu0 %v8266_v25  ;;  %5957 = vmatpush1.bf16.msra.mxu1 %v8269_v26  ;;  %v8355_v25 = vld [vmem:[%s9017_s30 + $0xd0c] ss:$16 sps:$4 sm:$0xff]   ;;  %v8350_v26 = vld [vmem:[%s9017_s30 + $0xd00] ss:$16 sps:$4 sm:$0xff]  }
 0x17d   : > { %5425 = vmatprep.subr.bf16.mxu0 %v8274_v16  ;;  %5958 = vmatprep.subr.bf16.mxu1 %v8277_v27  ;;  %v8353_v16 = vld [vmem:[%s9017_s30 + $0xd08] ss:$16 sps:$4 sm:$0xff]   ;;  %v8358_v27 = vld [vmem:[%s9017_s30 + $0xd24] ss:$16 sps:$4 sm:$0xff]  }
 0x180   : > { %5426 = vmatpush1.bf16.msra.mxu0 %v8272_v28  ;;  %5959 = vmatpush1.bf16.msra.mxu1 %v8275_v31  ;;  %v8361_v28 = vld [vmem:[%s9017_s30 + $0xd2c] ss:$16 sps:$4 sm:$0xff]   ;;  %v8356_v31 = vld [vmem:[%s9017_s30 + $0xd20] ss:$16 sps:$4 sm:$0xff]  }
 0x181   : > { %5427 = vmatprep.subr.bf16.mxu0 %v8280_v32  ;;  %5960 = vmatprep.subr.bf16.mxu1 %v8283_v20  ;;  %v8359_v32 = vld [vmem:[%s9017_s30 + $0xd28] ss:$16 sps:$4 sm:$0xff]   ;;  %v8364_v20 = vld [vmem:[%s9017_s30 + $0xd44] ss:$16 sps:$4 sm:$0xff]  }
 0x184   : > { %5428 = vmatpush1.bf16.msra.mxu0 %v8278_v34  ;;  %5961 = vmatpush1.bf16.msra.mxu1 %v8281_v35  ;;  %v8367_v34 = vld [vmem:[%s9017_s30 + $0xd4c] ss:$16 sps:$4 sm:$0xff]   ;;  %v8362_v35 = vld [vmem:[%s9017_s30 + $0xd40] ss:$16 sps:$4 sm:$0xff]  }
 0x185   : > { %5429 = vmatprep.subr.bf16.mxu0 %v8286_v36  ;;  %5962 = vmatprep.subr.bf16.mxu1 %v8289_v37  ;;  %v8365_v36 = vld [vmem:[%s9017_s30 + $0xd48] ss:$16 sps:$4 sm:$0xff]   ;;  %v8370_v37 = vld [vmem:[%s9017_s30 + $0xd64] ss:$16 sps:$4 sm:$0xff]  }
 0x188   : > { %5430 = vmatpush1.bf16.msra.mxu0 %v8284_v22  ;;  %5963 = vmatpush1.bf16.msra.mxu1 %v8287_v38  ;;  %v8373_v22 = vld [vmem:[%s9017_s30 + $0xd6c] ss:$16 sps:$4 sm:$0xff]   ;;  %v8368_v38 = vld [vmem:[%s9017_s30 + $0xd60] ss:$16 sps:$4 sm:$0xff]  }
 0x189   : > { %5431 = vmatprep.subr.bf16.mxu0 %v8292_v39  ;;  %5964 = vmatprep.subr.bf16.mxu1 %v8295_v30  ;;  %v8371_v39 = vld [vmem:[%s9017_s30 + $0xd68] ss:$16 sps:$4 sm:$0xff]   ;;  %v8376_v30 = vld [vmem:[%s9017_s30 + $0xd84] ss:$16 sps:$4 sm:$0xff]  }
 0x18c   : > { %5432 = vmatpush1.bf16.msra.mxu0 %v8290_v33  ;;  %5965 = vmatpush1.bf16.msra.mxu1 %v8293_v44  ;;  %v8377_v33 = vld [vmem:[%s9017_s30 + $0xd88] ss:$16 sps:$4 sm:$0xff]   ;;  %v8382_v44 = vld [vmem:[%s9017_s30 + $0xda4] ss:$16 sps:$4 sm:$0xff]  }
 0x18d   : > { %5433 = vmatprep.subr.bf16.mxu0 %v8298_v45  ;;  %5966 = vmatprep.subr.bf16.mxu1 %v8301_v46  ;;  %v8385_v45 = vld [vmem:[%s9017_s30 + $0xdac] ss:$16 sps:$4 sm:$0xff]   ;;  %v8380_v46 = vld [vmem:[%s9017_s30 + $0xda0] ss:$16 sps:$4 sm:$0xff]  }
 0x190   : > { %5434 = vmatpush1.bf16.msra.mxu0 %v8296_v48  ;;  %5967 = vmatpush1.bf16.msra.mxu1 %v8299_v29  ;;  %v8383_v48 = vld [vmem:[%s9017_s30 + $0xda8] ss:$16 sps:$4 sm:$0xff]   ;;  %v8388_v29 = vld [vmem:[%s9017_s30 + $0xdc4] ss:$16 sps:$4 sm:$0xff]  }
 0x191   : > { %5444 = vmatprep.subr.bf16.mxu0 %v8304_v49  ;;  %5977 = vmatprep.subr.bf16.mxu1 %v8307_v50  ;;  %v8391_v49 = vld [vmem:[%s9017_s30 + $0xdcc] ss:$16 sps:$4 sm:$0xff]   ;;  %v8386_v50 = vld [vmem:[%s9017_s30 + $0xdc0] ss:$16 sps:$4 sm:$0xff]  }
 0x193   : > { %5436 = vmatmul.mubr.bf16.vlgmr.msra.gmra.mrb[0].mxu0 %v1183_v42  ;;  %5969 = vmatmul.mubr.bf16.vlgmr.msra.gmra.mrb[0].mxu1 %v1183_v42  ;;  %v8394_v42 = vld [vmem:[%s9017_s30 + $0xde4] ss:$16 sps:$4 sm:$0xff]  }
 0x194   : > { %5445 = vmatpush1.bf16.msra.mxu0 %v8302_v52  ;;  %5978 = vmatpush1.bf16.msra.mxu1 %v8305_v53  ;;  %v8397_v52 = vld [vmem:[%s9017_s30 + $0xdec] ss:$16 sps:$4 sm:$0xff]   ;;  %v8392_v53 = vld [vmem:[%s9017_s30 + $0xde0] ss:$16 sps:$4 sm:$0xff]  }
 0x195   : > { %5446 = vmatprep.subr.bf16.mxu0 %v8310_v54  ;;  %5979 = vmatprep.subr.bf16.mxu1 %v8313_v55  ;;  %v8395_v54 = vld [vmem:[%s9017_s30 + $0xde8] ss:$16 sps:$4 sm:$0xff]   ;;  %v8401_v55 = vld [vmem:[%s9017_s30 + $0xe04] ss:$16 sps:$4 sm:$0xff]  }
 0x196   : > { %5476 = vmatprep.mubr.bf16.mxu0 %v9483_v56  ;;  %6009 = vmatprep.mubr.bf16.mxu1 %v9483_v56 }
 0x198   : > { %5447 = vmatpush1.bf16.msra.mxu0 %v8308_v43  ;;  %5980 = vmatpush1.bf16.msra.mxu1 %v8311_v57  ;;  %v8404_v43 = vld [vmem:[%s9017_s30 + $0xe0c] ss:$16 sps:$4 sm:$0xff]   ;;  %v9549_v57 = vrot.slane %v9468_v47, %v9012_v6  ;;  %v8405_v47 = vld [vmem:[%s9017_s30 + $0xe20] ss:$16 sps:$4 sm:$0xff]  }
 0x199   : > { %5448 = vmatprep.subr.bf16.mxu0 %v8316_v58  ;;  %5981 = vmatprep.subr.bf16.mxu1 %v8319_v59  ;;  %v8399_v58 = vld [vmem:[%s9017_s30 + $0xe00] ss:$16 sps:$4 sm:$0xff]   ;;  %v8402_v59 = vld [vmem:[%s9017_s30 + $0xe08] ss:$16 sps:$4 sm:$0xff]  }
 0x19c   : > { %5449 = vmatpush1.bf16.msra.mxu0 %v8314_v60  ;;  %5982 = vmatpush1.bf16.msra.mxu1 %v8317_v61  ;;  %v8407_v60 = vld [vmem:[%s9017_s30 + $0xe24] ss:$16 sps:$4 sm:$0xff]   ;;  %v8410_v61 = vld [vmem:[%s9017_s30 + $0xe2c] ss:$16 sps:$4 sm:$0xff]  }
 0x19d   : > { %5450 = vmatprep.subr.bf16.mxu0 %v8322_v62  ;;  %5983 = vmatprep.subr.bf16.mxu1 %v8325_v63  ;;  %v1186_v62 = vcombine.high %v9483_v56, %v9483_v56  ;;  %v8408_v63 = vld [vmem:[%s9017_s30 + $0xe28] ss:$16 sps:$4 sm:$0xff]   ;;  %v8411_v56 = vld [vmem:[%s9017_s30 + $0xe40] ss:$16 sps:$4 sm:$0xff]  }
 0x1a0   : > { %5451 = vmatpush1.bf16.msra.mxu0 %v8320_v1  ;;  %5984 = vmatpush1.bf16.msra.mxu1 %v8323_v2  ;;  %v8413_v1 = vld [vmem:[%s9017_s30 + $0xe44] ss:$16 sps:$4 sm:$0xff]   ;;  %v8416_v2 = vld [vmem:[%s9017_s30 + $0xe4c] ss:$16 sps:$4 sm:$0xff]  }
 0x1a1   : > { %5452 = vmatprep.subr.bf16.mxu0 %v8328_v4  ;;  %5985 = vmatprep.subr.bf16.mxu1 %v8331_v7  ;;  %v8414_v4 = vld [vmem:[%s9017_s30 + $0xe48] ss:$16 sps:$4 sm:$0xff]   ;;  %v8419_v7 = vld [vmem:[%s9017_s30 + $0xe64] ss:$16 sps:$4 sm:$0xff]  }
 0x1a4   : > { %5453 = vmatpush1.bf16.msra.mxu0 %v8326_v9  ;;  %5986 = vmatpush1.bf16.msra.mxu1 %v8329_v10  ;;  %v8422_v9 = vld [vmem:[%s9017_s30 + $0xe6c] ss:$16 sps:$4 sm:$0xff]   ;;  %v8417_v10 = vld [vmem:[%s9017_s30 + $0xe60] ss:$16 sps:$4 sm:$0xff]  }
 0x1a5   : > { %5454 = vmatprep.subr.bf16.mxu0 %v8334_v11  ;;  %5987 = vmatprep.subr.bf16.mxu1 %v8337_v12  ;;  %v8420_v11 = vld [vmem:[%s9017_s30 + $0xe68] ss:$16 sps:$4 sm:$0xff]   ;;  %v8425_v12 = vld [vmem:[%s9017_s30 + $0xe84] ss:$16 sps:$4 sm:$0xff]  }
 0x1a8   : > { %5455 = vmatpush1.bf16.msra.mxu0 %v8332_v13  ;;  %5988 = vmatpush1.bf16.msra.mxu1 %v8335_v14  ;;  %v8428_v13 = vld [vmem:[%s9017_s30 + $0xe8c] ss:$16 sps:$4 sm:$0xff]   ;;  %v8423_v14 = vld [vmem:[%s9017_s30 + $0xe80] ss:$16 sps:$4 sm:$0xff]  }
 0x1a9   : > { %5456 = vmatprep.subr.bf16.mxu0 %v8340_v15  ;;  %5989 = vmatprep.subr.bf16.mxu1 %v8343_v17  ;;  %v8426_v15 = vld [vmem:[%s9017_s30 + $0xe88] ss:$16 sps:$4 sm:$0xff]   ;;  %v8431_v17 = vld [vmem:[%s9017_s30 + $0xea4] ss:$16 sps:$4 sm:$0xff]  }
 0x1ac   : > { %5457 = vmatpush1.bf16.msra.mxu0 %v8338_v18  ;;  %5990 = vmatpush1.bf16.msra.mxu1 %v8341_v19  ;;  %v8434_v18 = vld [vmem:[%s9017_s30 + $0xeac] ss:$16 sps:$4 sm:$0xff]   ;;  %v8429_v19 = vld [vmem:[%s9017_s30 + $0xea0] ss:$16 sps:$4 sm:$0xff]  }
 0x1ad   : > { %5458 = vmatprep.subr.bf16.mxu0 %v8346_v21  ;;  %5991 = vmatprep.subr.bf16.mxu1 %v8349_v23  ;;  %v8432_v21 = vld [vmem:[%s9017_s30 + $0xea8] ss:$16 sps:$4 sm:$0xff]   ;;  %v8437_v23 = vld [vmem:[%s9017_s30 + $0xec4] ss:$16 sps:$4 sm:$0xff]  }
 0x1b0   : > { %5459 = vmatpush1.bf16.msra.mxu0 %v8344_v24  ;;  %5992 = vmatpush1.bf16.msra.mxu1 %v8347_v5  ;;  %v8440_v24 = vld [vmem:[%s9017_s30 + $0xecc] ss:$16 sps:$4 sm:$0xff]   ;;  %v8435_v5 = vld [vmem:[%s9017_s30 + $0xec0] ss:$16 sps:$4 sm:$0xff]  }
 0x1b1   : > { %5460 = vmatprep.subr.bf16.mxu0 %v8352_v8  ;;  %5993 = vmatprep.subr.bf16.mxu1 %v8355_v25  ;;  %v8438_v8 = vld [vmem:[%s9017_s30 + $0xec8] ss:$16 sps:$4 sm:$0xff]   ;;  %v8443_v25 = vld [vmem:[%s9017_s30 + $0xee4] ss:$16 sps:$4 sm:$0xff]  }
 0x1b4   : > { %5461 = vmatpush1.bf16.msra.mxu0 %v8350_v26  ;;  %5994 = vmatpush1.bf16.msra.mxu1 %v8353_v16  ;;  %v8446_v26 = vld [vmem:[%s9017_s30 + $0xeec] ss:$16 sps:$4 sm:$0xff]   ;;  %v8441_v16 = vld [vmem:[%s9017_s30 + $0xee0] ss:$16 sps:$4 sm:$0xff]  }
 0x1b5   : > { %5462 = vmatprep.subr.bf16.mxu0 %v8358_v27  ;;  %5995 = vmatprep.subr.bf16.mxu1 %v8361_v28  ;;  %v8444_v27 = vld [vmem:[%s9017_s30 + $0xee8] ss:$16 sps:$4 sm:$0xff]   ;;  %v8449_v28 = vld [vmem:[%s9017_s30 + $0xf04] ss:$16 sps:$4 sm:$0xff]  }
 0x1b8   : > { %5463 = vmatpush1.bf16.msra.mxu0 %v8356_v31  ;;  %5996 = vmatpush1.bf16.msra.mxu1 %v8359_v32  ;;  %v8452_v31 = vld [vmem:[%s9017_s30 + $0xf0c] ss:$16 sps:$4 sm:$0xff]   ;;  %v8447_v32 = vld [vmem:[%s9017_s30 + $0xf00] ss:$16 sps:$4 sm:$0xff]  }
 0x1b9   : > { %5464 = vmatprep.subr.bf16.mxu0 %v8364_v20  ;;  %5997 = vmatprep.subr.bf16.mxu1 %v8367_v34  ;;  %v8450_v20 = vld [vmem:[%s9017_s30 + $0xf08] ss:$16 sps:$4 sm:$0xff]   ;;  %v8455_v34 = vld [vmem:[%s9017_s30 + $0xf24] ss:$16 sps:$4 sm:$0xff]  }
 0x1bc   : > { %5465 = vmatpush1.bf16.msra.mxu0 %v8362_v35  ;;  %5998 = vmatpush1.bf16.msra.mxu1 %v8365_v36  ;;  %v8458_v35 = vld [vmem:[%s9017_s30 + $0xf2c] ss:$16 sps:$4 sm:$0xff]   ;;  %v8453_v36 = vld [vmem:[%s9017_s30 + $0xf20] ss:$16 sps:$4 sm:$0xff]  }
 0x1bd   : > { %5466 = vmatprep.subr.bf16.mxu0 %v8370_v37  ;;  %5999 = vmatprep.subr.bf16.mxu1 %v8373_v22  ;;  %v8456_v37 = vld [vmem:[%s9017_s30 + $0xf28] ss:$16 sps:$4 sm:$0xff]   ;;  %v8461_v22 = vld [vmem:[%s9017_s30 + $0xf44] ss:$16 sps:$4 sm:$0xff]  }
 0x1c0   : > { %5467 = vmatpush1.bf16.msra.mxu0 %v8368_v38  ;;  %6000 = vmatpush1.bf16.msra.mxu1 %v8371_v39  ;;  %v8464_v38 = vld [vmem:[%s9017_s30 + $0xf4c] ss:$16 sps:$4 sm:$0xff]   ;;  %v8459_v39 = vld [vmem:[%s9017_s30 + $0xf40] ss:$16 sps:$4 sm:$0xff]  }
 0x1c1   : > { %5468 = vmatprep.subr.bf16.mxu0 %v8376_v30  ;;  %6001 = vmatprep.subr.bf16.mxu1 %v8379_v40  ;;  %v8462_v30 = vld [vmem:[%s9017_s30 + $0xf48] ss:$16 sps:$4 sm:$0xff]   ;;  %v8467_v40 = vld [vmem:[%s9017_s30 + $0xf64] ss:$16 sps:$4 sm:$0xff]  }
 0x1c4   : > { %5469 = vmatpush1.bf16.msra.mxu0 %v8374_v41  ;;  %6002 = vmatpush1.bf16.msra.mxu1 %v8377_v33  ;;  %v8470_v41 = vld [vmem:[%s9017_s30 + $0xf6c] ss:$16 sps:$4 sm:$0xff]   ;;  %v8465_v33 = vld [vmem:[%s9017_s30 + $0xf60] ss:$16 sps:$4 sm:$0xff]  }
 0x1c5   : > { %5470 = vmatprep.subr.bf16.mxu0 %v8382_v44  ;;  %6003 = vmatprep.subr.bf16.mxu1 %v8385_v45  ;;  %v8468_v44 = vld [vmem:[%s9017_s30 + $0xf68] ss:$16 sps:$4 sm:$0xff]   ;;  %v8473_v45 = vld [vmem:[%s9017_s30 + $0xf84] ss:$16 sps:$4 sm:$0xff]  }
 0x1c8   : > { %5471 = vmatpush1.bf16.msra.mxu0 %v8380_v46  ;;  %6004 = vmatpush1.bf16.msra.mxu1 %v8383_v48  ;;  %v8476_v46 = vld [vmem:[%s9017_s30 + $0xf8c] ss:$16 sps:$4 sm:$0xff]   ;;  %v8471_v48 = vld [vmem:[%s9017_s30 + $0xf80] ss:$16 sps:$4 sm:$0xff]  }
 0x1c9   : > { %5472 = vmatprep.subr.bf16.mxu0 %v8388_v29  ;;  %6005 = vmatprep.subr.bf16.mxu1 %v8391_v49  ;;  %v8474_v29 = vld [vmem:[%s9017_s30 + $0xf88] ss:$16 sps:$4 sm:$0xff]   ;;  %v8479_v49 = vld [vmem:[%s9017_s30 + $0xfa4] ss:$16 sps:$4 sm:$0xff]  }
 0x1cc   : > { %5473 = vmatpush1.bf16.msra.mxu0 %v8386_v50  ;;  %6006 = vmatpush1.bf16.msra.mxu1 %v8389_v51  ;;  %v8482_v50 = vld [vmem:[%s9017_s30 + $0xfac] ss:$16 sps:$4 sm:$0xff]   ;;  %v8477_v51 = vld [vmem:[%s9017_s30 + $0xfa0] ss:$16 sps:$4 sm:$0xff]  }
 0x1cd   : > { %5474 = vmatprep.subr.bf16.mxu0 %v8394_v42  ;;  %6007 = vmatprep.subr.bf16.mxu1 %v8397_v52  ;;  %v8480_v42 = vld [vmem:[%s9017_s30 + $0xfa8] ss:$16 sps:$4 sm:$0xff]   ;;  %v8485_v52 = vld [vmem:[%s9017_s30 + $0xfc4] ss:$16 sps:$4 sm:$0xff]  }
 0x1d0   : > { %5475 = vmatpush1.bf16.msra.mxu0 %v8392_v53  ;;  %6008 = vmatpush1.bf16.msra.mxu1 %v8395_v54  ;;  %v8488_v53 = vld [vmem:[%s9017_s30 + $0xfcc] ss:$16 sps:$4 sm:$0xff]   ;;  %v9614_v54 = vld [vmem:[%s10001_s0 + $0x10] sm:$0xff] }
 0x1d1   : > { %5485 = vmatprep.subr.bf16.mxu0 %v8401_v55  ;;  %6018 = vmatprep.subr.bf16.mxu1 %v8404_v43  ;;  %v8483_v55 = vld [vmem:[%s9017_s30 + $0xfc0] ss:$16 sps:$4 sm:$0xff]   ;;  %v8486_v43 = vld [vmem:[%s9017_s30 + $0xfc8] ss:$16 sps:$4 sm:$0xff]  }
 0x1d3   : > { %5477 = vmatmul.mubr.bf16.vlgmr.msra.gmra.mrb[0].mxu0 %v9549_v57  ;;  %6010 = vmatmul.mubr.bf16.vlgmr.msra.gmra.mrb[0].mxu1 %v9549_v57 }
 0x1d4   : > { %5486 = vmatpush1.bf16.msra.mxu0 %v8399_v58  ;;  %6019 = vmatpush1.bf16.msra.mxu1 %v8402_v59  ;;  %v8491_v58 = vld [vmem:[%s9017_s30 + $0xfe4] ss:$16 sps:$4 sm:$0xff]   ;;  %v8494_v59 = vld [vmem:[%s9017_s30 + $0xfec] ss:$16 sps:$4 sm:$0xff]  }
 0x1d5   : > { %5487 = vmatprep.subr.bf16.mxu0 %v8407_v60  ;;  %6020 = vmatprep.subr.bf16.mxu1 %v8410_v61  ;;  %v9622_v60 = vrot.slane %v9614_v54, %v9012_v6  ;;  %v8489_v61 = vld [vmem:[%s9017_s30 + $0xfe0] ss:$16 sps:$4 sm:$0xff]  }
 0x1d6   : > { %5517 = vmatprep.mubr.bf16.mxu0 %v1186_v62  ;;  %6050 = vmatprep.mubr.bf16.mxu1 %v1186_v62  ;;  %v8492_v62 = vld [vmem:[%s9017_s30 + $0xfe8] ss:$16 sps:$4 sm:$0xff]  }
 0x1d8   : > { %5488 = vmatpush1.bf16.msra.mxu0 %v8405_v47  ;;  %6021 = vmatpush1.bf16.msra.mxu1 %v8408_v63  ;;  %v8497_v47 = vld [vmem:[%s9017_s30 + $0x1004] ss:$16 sps:$4 sm:$0xff]   ;;  %v8500_v63 = vld [vmem:[%s9017_s30 + $0x100c] ss:$16 sps:$4 sm:$0xff]  }
 0x1d9   : > { %5489 = vmatprep.subr.bf16.mxu0 %v8413_v1  ;;  %6022 = vmatprep.subr.bf16.mxu1 %v8416_v2  ;;  %v1202_v1 = vcombine.high %v9622_v60, %v9622_v60  ;;  %v1184_v2 = vcombine.high %v9549_v57, %v9549_v57  ;;  %v8501_v57 = vld [vmem:[%s9017_s30 + $0x1020] ss:$16 sps:$4 sm:$0xff]  }
 0x1dc   : > { %5490 = vmatpush1.bf16.msra.mxu0 %v8411_v56  ;;  %6023 = vmatpush1.bf16.msra.mxu1 %v8414_v4  ;;  %v8495_v56 = vld [vmem:[%s9017_s30 + $0x1000] ss:$16 sps:$4 sm:$0xff]   ;;  %v8498_v4 = vld [vmem:[%s9017_s30 + $0x1008] ss:$16 sps:$4 sm:$0xff]  }
 0x1dd   : > { %5491 = vmatprep.subr.bf16.mxu0 %v8419_v7  ;;  %6024 = vmatprep.subr.bf16.mxu1 %v8422_v9  ;;  %v8503_v7 = vld [vmem:[%s9017_s30 + $0x1024] ss:$16 sps:$4 sm:$0xff]   ;;  %v8506_v9 = vld [vmem:[%s9017_s30 + $0x102c] ss:$16 sps:$4 sm:$0xff]  }
 0x1e0   : > { %5492 = vmatpush1.bf16.msra.mxu0 %v8417_v10  ;;  %6025 = vmatpush1.bf16.msra.mxu1 %v8420_v11  ;;  %v9637_v10 = vrot.slane %v1202_v1, %v9012_v6  ;;  %v8504_v11 = vld [vmem:[%s9017_s30 + $0x1028] ss:$16 sps:$4 sm:$0xff]   ;;  %v8579_v1 = vld [vmem:[%s9017_s30 + $0x11c0] ss:$16 sps:$4 sm:$0xff]  }
 0x1e1   : > { %5493 = vmatprep.subr.bf16.mxu0 %v8425_v12  ;;  %6026 = vmatprep.subr.bf16.mxu1 %v8428_v13  ;;  %v8509_v12 = vld [vmem:[%s9017_s30 + $0x1044] ss:$16 sps:$4 sm:$0xff]   ;;  %v8512_v13 = vld [vmem:[%s9017_s30 + $0x104c] ss:$16 sps:$4 sm:$0xff]  }
 0x1e4   : > { %5494 = vmatpush1.bf16.msra.mxu0 %v8423_v14  ;;  %6027 = vmatpush1.bf16.msra.mxu1 %v8426_v15  ;;  %v8507_v14 = vld [vmem:[%s9017_s30 + $0x1040] ss:$16 sps:$4 sm:$0xff]   ;;  %v8510_v15 = vld [vmem:[%s9017_s30 + $0x1048] ss:$16 sps:$4 sm:$0xff]  }
 0x1e5   : > { %5495 = vmatprep.subr.bf16.mxu0 %v8431_v17  ;;  %6028 = vmatprep.subr.bf16.mxu1 %v8434_v18  ;;  %v8515_v17 = vld [vmem:[%s9017_s30 + $0x1064] ss:$16 sps:$4 sm:$0xff]   ;;  %v8518_v18 = vld [vmem:[%s9017_s30 + $0x106c] ss:$16 sps:$4 sm:$0xff]  }
 0x1e8   : > { %5496 = vmatpush1.bf16.msra.mxu0 %v8429_v19  ;;  %6029 = vmatpush1.bf16.msra.mxu1 %v8432_v21  ;;  %v8513_v19 = vld [vmem:[%s9017_s30 + $0x1060] ss:$16 sps:$4 sm:$0xff]   ;;  %v8516_v21 = vld [vmem:[%s9017_s30 + $0x1068] ss:$16 sps:$4 sm:$0xff]  }
 0x1e9   : > { %5497 = vmatprep.subr.bf16.mxu0 %v8437_v23  ;;  %6030 = vmatprep.subr.bf16.mxu1 %v8440_v24  ;;  %v8521_v23 = vld [vmem:[%s9017_s30 + $0x1084] ss:$16 sps:$4 sm:$0xff]   ;;  %v8524_v24 = vld [vmem:[%s9017_s30 + $0x108c] ss:$16 sps:$4 sm:$0xff]  }
 0x1ec   : > { %5498 = vmatpush1.bf16.msra.mxu0 %v8435_v5  ;;  %6031 = vmatpush1.bf16.msra.mxu1 %v8438_v8  ;;  %v8519_v5 = vld [vmem:[%s9017_s30 + $0x1080] ss:$16 sps:$4 sm:$0xff]   ;;  %v8522_v8 = vld [vmem:[%s9017_s30 + $0x1088] ss:$16 sps:$4 sm:$0xff]  }
 0x1ed   : > { %5499 = vmatprep.subr.bf16.mxu0 %v8443_v25  ;;  %6032 = vmatprep.subr.bf16.mxu1 %v8446_v26  ;;  %v8527_v25 = vld [vmem:[%s9017_s30 + $0x10a4] ss:$16 sps:$4 sm:$0xff]   ;;  %v8530_v26 = vld [vmem:[%s9017_s30 + $0x10ac] ss:$16 sps:$4 sm:$0xff]  }
 0x1f0   : > { %5500 = vmatpush1.bf16.msra.mxu0 %v8441_v16  ;;  %6033 = vmatpush1.bf16.msra.mxu1 %v8444_v27  ;;  %v8525_v16 = vld [vmem:[%s9017_s30 + $0x10a0] ss:$16 sps:$4 sm:$0xff]   ;;  %v8528_v27 = vld [vmem:[%s9017_s30 + $0x10a8] ss:$16 sps:$4 sm:$0xff]  }
 0x1f1   : > { %5501 = vmatprep.subr.bf16.mxu0 %v8449_v28  ;;  %6034 = vmatprep.subr.bf16.mxu1 %v8452_v31  ;;  %v8533_v28 = vld [vmem:[%s9017_s30 + $0x10c4] ss:$16 sps:$4 sm:$0xff]   ;;  %v8536_v31 = vld [vmem:[%s9017_s30 + $0x10cc] ss:$16 sps:$4 sm:$0xff]  }
 0x1f4   : > { %5502 = vmatpush1.bf16.msra.mxu0 %v8447_v32  ;;  %6035 = vmatpush1.bf16.msra.mxu1 %v8450_v20  ;;  %v8531_v32 = vld [vmem:[%s9017_s30 + $0x10c0] ss:$16 sps:$4 sm:$0xff]   ;;  %v8534_v20 = vld [vmem:[%s9017_s30 + $0x10c8] ss:$16 sps:$4 sm:$0xff]  }
 0x1f5   : > { %5503 = vmatprep.subr.bf16.mxu0 %v8455_v34  ;;  %6036 = vmatprep.subr.bf16.mxu1 %v8458_v35  ;;  %v8539_v34 = vld [vmem:[%s9017_s30 + $0x10e4] ss:$16 sps:$4 sm:$0xff]   ;;  %v8542_v35 = vld [vmem:[%s9017_s30 + $0x10ec] ss:$16 sps:$4 sm:$0xff]  }
 0x1f8   : > { %5504 = vmatpush1.bf16.msra.mxu0 %v8453_v36  ;;  %6037 = vmatpush1.bf16.msra.mxu1 %v8456_v37  ;;  %v8537_v36 = vld [vmem:[%s9017_s30 + $0x10e0] ss:$16 sps:$4 sm:$0xff]   ;;  %v8540_v37 = vld [vmem:[%s9017_s30 + $0x10e8] ss:$16 sps:$4 sm:$0xff]  }
 0x1f9   : > { %5505 = vmatprep.subr.bf16.mxu0 %v8461_v22  ;;  %6038 = vmatprep.subr.bf16.mxu1 %v8464_v38  ;;  %v8545_v22 = vld [vmem:[%s9017_s30 + $0x1104] ss:$16 sps:$4 sm:$0xff]   ;;  %v8548_v38 = vld [vmem:[%s9017_s30 + $0x110c] ss:$16 sps:$4 sm:$0xff]  }
 0x1fc   : > { %5506 = vmatpush1.bf16.msra.mxu0 %v8459_v39  ;;  %6039 = vmatpush1.bf16.msra.mxu1 %v8462_v30  ;;  %v8543_v39 = vld [vmem:[%s9017_s30 + $0x1100] ss:$16 sps:$4 sm:$0xff]   ;;  %v8546_v30 = vld [vmem:[%s9017_s30 + $0x1108] ss:$16 sps:$4 sm:$0xff]  }
 0x1fd   : > { %5507 = vmatprep.subr.bf16.mxu0 %v8467_v40  ;;  %6040 = vmatprep.subr.bf16.mxu1 %v8470_v41  ;;  %v8551_v40 = vld [vmem:[%s9017_s30 + $0x1124] ss:$16 sps:$4 sm:$0xff]   ;;  %v8554_v41 = vld [vmem:[%s9017_s30 + $0x112c] ss:$16 sps:$4 sm:$0xff]  }
 0x200   : > { %5508 = vmatpush1.bf16.msra.mxu0 %v8465_v33  ;;  %6041 = vmatpush1.bf16.msra.mxu1 %v8468_v44  ;;  %v8549_v33 = vld [vmem:[%s9017_s30 + $0x1120] ss:$16 sps:$4 sm:$0xff]   ;;  %v8552_v44 = vld [vmem:[%s9017_s30 + $0x1128] ss:$16 sps:$4 sm:$0xff]  }
 0x201   : > { %5509 = vmatprep.subr.bf16.mxu0 %v8473_v45  ;;  %6042 = vmatprep.subr.bf16.mxu1 %v8476_v46  ;;  %v8557_v45 = vld [vmem:[%s9017_s30 + $0x1144] ss:$16 sps:$4 sm:$0xff]   ;;  %v8560_v46 = vld [vmem:[%s9017_s30 + $0x114c] ss:$16 sps:$4 sm:$0xff]  }
 0x204   : > { %5510 = vmatpush1.bf16.msra.mxu0 %v8471_v48  ;;  %6043 = vmatpush1.bf16.msra.mxu1 %v8474_v29  ;;  %v8555_v48 = vld [vmem:[%s9017_s30 + $0x1140] ss:$16 sps:$4 sm:$0xff]   ;;  %v8558_v29 = vld [vmem:[%s9017_s30 + $0x1148] ss:$16 sps:$4 sm:$0xff]  }
 0x205   : > { %5511 = vmatprep.subr.bf16.mxu0 %v8479_v49  ;;  %6044 = vmatprep.subr.bf16.mxu1 %v8482_v50  ;;  %v8563_v49 = vld [vmem:[%s9017_s30 + $0x1164] ss:$16 sps:$4 sm:$0xff]   ;;  %v8566_v50 = vld [vmem:[%s9017_s30 + $0x116c] ss:$16 sps:$4 sm:$0xff]  }
 0x208   : > { %5512 = vmatpush1.bf16.msra.mxu0 %v8477_v51  ;;  %6045 = vmatpush1.bf16.msra.mxu1 %v8480_v42  ;;  %v8561_v51 = vld [vmem:[%s9017_s30 + $0x1160] ss:$16 sps:$4 sm:$0xff]   ;;  %v8564_v42 = vld [vmem:[%s9017_s30 + $0x1168] ss:$16 sps:$4 sm:$0xff]  }
 0x209   : > { %5513 = vmatprep.subr.bf16.mxu0 %v8485_v52  ;;  %6046 = vmatprep.subr.bf16.mxu1 %v8488_v53  ;;  %v8569_v52 = vld [vmem:[%s9017_s30 + $0x1184] ss:$16 sps:$4 sm:$0xff]   ;;  %v8572_v53 = vld [vmem:[%s9017_s30 + $0x118c] ss:$16 sps:$4 sm:$0xff]  }
 0x20c   : > { %5514 = vmatpush1.bf16.msra.mxu0 %v8483_v55  ;;  %6047 = vmatpush1.bf16.msra.mxu1 %v8486_v43  ;;  %v8567_v55 = vld [vmem:[%s9017_s30 + $0x1180] ss:$16 sps:$4 sm:$0xff]   ;;  %v8570_v43 = vld [vmem:[%s9017_s30 + $0x1188] ss:$16 sps:$4 sm:$0xff]  }
 0x20d   : > { %5515 = vmatprep.subr.bf16.mxu0 %v8491_v58  ;;  %6048 = vmatprep.subr.bf16.mxu1 %v8494_v59  ;;  %v8575_v58 = vld [vmem:[%s9017_s30 + $0x11a4] ss:$16 sps:$4 sm:$0xff]   ;;  %v8578_v59 = vld [vmem:[%s9017_s30 + $0x11ac] ss:$16 sps:$4 sm:$0xff]  }
 0x210   : > { %5516 = vmatpush1.bf16.msra.mxu0 %v8489_v61  ;;  %6049 = vmatpush1.bf16.msra.mxu1 %v8492_v62  ;;  %v8573_v61 = vld [vmem:[%s9017_s30 + $0x11a0] ss:$16 sps:$4 sm:$0xff]   ;;  %v8576_v62 = vld [vmem:[%s9017_s30 + $0x11a8] ss:$16 sps:$4 sm:$0xff]  }
 0x211   : > { %5526 = vmatprep.subr.bf16.mxu0 %v8497_v47  ;;  %6059 = vmatprep.subr.bf16.mxu1 %v8500_v63  ;;  %v8581_v47 = vld [vmem:[%s9017_s30 + $0x11c4] ss:$16 sps:$4 sm:$0xff]   ;;  %v8584_v63 = vld [vmem:[%s9017_s30 + $0x11cc] ss:$16 sps:$4 sm:$0xff]  }
 0x213   : > { %5518 = vmatmul.mubr.bf16.vlgmr.msra.gmra.mrb[0].mxu0 %v1184_v2  ;;  %6051 = vmatmul.mubr.bf16.vlgmr.msra.gmra.mrb[0].mxu1 %v1184_v2  ;;  %v8582_v2 = vld [vmem:[%s9017_s30 + $0x11c8] ss:$16 sps:$4 sm:$0xff]  }
 0x214   : > { %5527 = vmatpush1.bf16.msra.mxu0 %v8495_v56  ;;  %6060 = vmatpush1.bf16.msra.mxu1 %v8498_v4  ;;  %v8587_v56 = vld [vmem:[%s9017_s30 + $0x11e4] ss:$16 sps:$4 sm:$0xff]   ;;  %v8590_v4 = vld [vmem:[%s9017_s30 + $0x11ec] ss:$16 sps:$4 sm:$0xff]  }
 0x215   : > { %5528 = vmatprep.subr.bf16.mxu0 %v8503_v7  ;;  %6061 = vmatprep.subr.bf16.mxu1 %v8506_v9  ;;  %v8585_v7 = vld [vmem:[%s9017_s30 + $0x11e0] ss:$16 sps:$4 sm:$0xff]   ;;  %v8588_v9 = vld [vmem:[%s9017_s30 + $0x11e8] ss:$16 sps:$4 sm:$0xff]  }
 0x216   : > { %5558 = vmatprep.mubr.bf16.mxu0 %v9637_v10  ;;  %6091 = vmatprep.mubr.bf16.mxu1 %v9637_v10 }
 0x218   : > { %5529 = vmatpush1.bf16.msra.mxu0 %v8501_v57  ;;  %6062 = vmatpush1.bf16.msra.mxu1 %v8504_v11  ;;  %v8593_v57 = vld [vmem:[%s9017_s30 + $0x1204] ss:$16 sps:$4 sm:$0xff]   ;;  %v8596_v11 = vld [vmem:[%s9017_s30 + $0x120c] ss:$16 sps:$4 sm:$0xff]  }
 0x219   : > { %5530 = vmatprep.subr.bf16.mxu0 %v8509_v12  ;;  %6063 = vmatprep.subr.bf16.mxu1 %v8512_v13  ;;  %v9703_v12 = vrot.slane %v9622_v60, %v9012_v6  ;;  %v8591_v13 = vld [vmem:[%s9017_s30 + $0x1200] ss:$16 sps:$4 sm:$0xff]  }
 0x21a   : > { %v8597_v60 = vld [vmem:[%s9017_s30 + $0x1220] ss:$16 sps:$4 sm:$0xff]  }
 0x21c   : > { %5531 = vmatpush1.bf16.msra.mxu0 %v8507_v14  ;;  %6064 = vmatpush1.bf16.msra.mxu1 %v8510_v15  ;;  %v8594_v14 = vld [vmem:[%s9017_s30 + $0x1208] ss:$16 sps:$4 sm:$0xff]   ;;  %v8599_v15 = vld [vmem:[%s9017_s30 + $0x1224] ss:$16 sps:$4 sm:$0xff]  }
 0x21d   : > { %5532 = vmatprep.subr.bf16.mxu0 %v8515_v17  ;;  %6065 = vmatprep.subr.bf16.mxu1 %v8518_v18  ;;  %v8602_v17 = vld [vmem:[%s9017_s30 + $0x122c] ss:$16 sps:$4 sm:$0xff]   ;;  %v1234_v18 = vcombine.high %v9637_v10, %v9637_v10  ;;  %v8603_v10 = vld [vmem:[%s9017_s30 + $0x1240] ss:$16 sps:$4 sm:$0xff]  }
 0x220   : > { %5533 = vmatpush1.bf16.msra.mxu0 %v8513_v19  ;;  %6066 = vmatpush1.bf16.msra.mxu1 %v8516_v21  ;;  %v8600_v19 = vld [vmem:[%s9017_s30 + $0x1228] ss:$16 sps:$4 sm:$0xff]   ;;  %v8605_v21 = vld [vmem:[%s9017_s30 + $0x1244] ss:$16 sps:$4 sm:$0xff]  }
 0x221   : > { %5534 = vmatprep.subr.bf16.mxu0 %v8521_v23  ;;  %6067 = vmatprep.subr.bf16.mxu1 %v8524_v24  ;;  %v8608_v23 = vld [vmem:[%s9017_s30 + $0x124c] ss:$16 sps:$4 sm:$0xff]   ;;  %v8606_v24 = vld [vmem:[%s9017_s30 + $0x1248] ss:$16 sps:$4 sm:$0xff]  }
 0x224   : > { %5535 = vmatpush1.bf16.msra.mxu0 %v8519_v5  ;;  %6068 = vmatpush1.bf16.msra.mxu1 %v8522_v8  ;;  %v8611_v5 = vld [vmem:[%s9017_s30 + $0x1264] ss:$16 sps:$4 sm:$0xff]   ;;  %v8614_v8 = vld [vmem:[%s9017_s30 + $0x126c] ss:$16 sps:$4 sm:$0xff]  }
 0x225   : > { %5536 = vmatprep.subr.bf16.mxu0 %v8527_v25  ;;  %6069 = vmatprep.subr.bf16.mxu1 %v8530_v26  ;;  %v8609_v25 = vld [vmem:[%s9017_s30 + $0x1260] ss:$16 sps:$4 sm:$0xff]   ;;  %v8612_v26 = vld [vmem:[%s9017_s30 + $0x1268] ss:$16 sps:$4 sm:$0xff]  }
 0x228   : > { %5537 = vmatpush1.bf16.msra.mxu0 %v8525_v16  ;;  %6070 = vmatpush1.bf16.msra.mxu1 %v8528_v27  ;;  %v8617_v16 = vld [vmem:[%s9017_s30 + $0x1284] ss:$16 sps:$4 sm:$0xff]   ;;  %v8620_v27 = vld [vmem:[%s9017_s30 + $0x128c] ss:$16 sps:$4 sm:$0xff]  }
 0x229   : > { %5538 = vmatprep.subr.bf16.mxu0 %v8533_v28  ;;  %6071 = vmatprep.subr.bf16.mxu1 %v8536_v31  ;;  %v8615_v28 = vld [vmem:[%s9017_s30 + $0x1280] ss:$16 sps:$4 sm:$0xff]   ;;  %v8618_v31 = vld [vmem:[%s9017_s30 + $0x1288] ss:$16 sps:$4 sm:$0xff]  }
 0x22c   : > { %5539 = vmatpush1.bf16.msra.mxu0 %v8531_v32  ;;  %6072 = vmatpush1.bf16.msra.mxu1 %v8534_v20  ;;  %v8623_v32 = vld [vmem:[%s9017_s30 + $0x12a4] ss:$16 sps:$4 sm:$0xff]   ;;  %v8626_v20 = vld [vmem:[%s9017_s30 + $0x12ac] ss:$16 sps:$4 sm:$0xff]  }
 0x22d   : > { %5540 = vmatprep.subr.bf16.mxu0 %v8539_v34  ;;  %6073 = vmatprep.subr.bf16.mxu1 %v8542_v35  ;;  %v8621_v34 = vld [vmem:[%s9017_s30 + $0x12a0] ss:$16 sps:$4 sm:$0xff]   ;;  %v8624_v35 = vld [vmem:[%s9017_s30 + $0x12a8] ss:$16 sps:$4 sm:$0xff]  }
 0x230   : > { %5541 = vmatpush1.bf16.msra.mxu0 %v8537_v36  ;;  %6074 = vmatpush1.bf16.msra.mxu1 %v8540_v37  ;;  %v8629_v36 = vld [vmem:[%s9017_s30 + $0x12c4] ss:$16 sps:$4 sm:$0xff]   ;;  %v8632_v37 = vld [vmem:[%s9017_s30 + $0x12cc] ss:$16 sps:$4 sm:$0xff]  }
 0x231   : > { %5542 = vmatprep.subr.bf16.mxu0 %v8545_v22  ;;  %6075 = vmatprep.subr.bf16.mxu1 %v8548_v38  ;;  %v8627_v22 = vld [vmem:[%s9017_s30 + $0x12c0] ss:$16 sps:$4 sm:$0xff]   ;;  %v8630_v38 = vld [vmem:[%s9017_s30 + $0x12c8] ss:$16 sps:$4 sm:$0xff]  }
 0x234   : > { %5543 = vmatpush1.bf16.msra.mxu0 %v8543_v39  ;;  %6076 = vmatpush1.bf16.msra.mxu1 %v8546_v30  ;;  %v8635_v39 = vld [vmem:[%s9017_s30 + $0x12e4] ss:$16 sps:$4 sm:$0xff]   ;;  %v8638_v30 = vld [vmem:[%s9017_s30 + $0x12ec] ss:$16 sps:$4 sm:$0xff]  }
 0x235   : > { %5544 = vmatprep.subr.bf16.mxu0 %v8551_v40  ;;  %6077 = vmatprep.subr.bf16.mxu1 %v8554_v41  ;;  %v8633_v40 = vld [vmem:[%s9017_s30 + $0x12e0] ss:$16 sps:$4 sm:$0xff]   ;;  %v8636_v41 = vld [vmem:[%s9017_s30 + $0x12e8] ss:$16 sps:$4 sm:$0xff]  }
 0x238   : > { %5545 = vmatpush1.bf16.msra.mxu0 %v8549_v33  ;;  %6078 = vmatpush1.bf16.msra.mxu1 %v8552_v44  ;;  %v8641_v33 = vld [vmem:[%s9017_s30 + $0x1304] ss:$16 sps:$4 sm:$0xff]   ;;  %v8644_v44 = vld [vmem:[%s9017_s30 + $0x130c] ss:$16 sps:$4 sm:$0xff]  }
 0x239   : > { %5546 = vmatprep.subr.bf16.mxu0 %v8557_v45  ;;  %6079 = vmatprep.subr.bf16.mxu1 %v8560_v46  ;;  %v8639_v45 = vld [vmem:[%s9017_s30 + $0x1300] ss:$16 sps:$4 sm:$0xff]   ;;  %v8642_v46 = vld [vmem:[%s9017_s30 + $0x1308] ss:$16 sps:$4 sm:$0xff]  }
 0x23c   : > { %5547 = vmatpush1.bf16.msra.mxu0 %v8555_v48  ;;  %6080 = vmatpush1.bf16.msra.mxu1 %v8558_v29  ;;  %v8647_v48 = vld [vmem:[%s9017_s30 + $0x1324] ss:$16 sps:$4 sm:$0xff]   ;;  %v8650_v29 = vld [vmem:[%s9017_s30 + $0x132c] ss:$16 sps:$4 sm:$0xff]  }
 0x23d   : > { %5548 = vmatprep.subr.bf16.mxu0 %v8563_v49  ;;  %6081 = vmatprep.subr.bf16.mxu1 %v8566_v50  ;;  %v8645_v49 = vld [vmem:[%s9017_s30 + $0x1320] ss:$16 sps:$4 sm:$0xff]   ;;  %v8648_v50 = vld [vmem:[%s9017_s30 + $0x1328] ss:$16 sps:$4 sm:$0xff]  }
 0x240   : > { %5549 = vmatpush1.bf16.msra.mxu0 %v8561_v51  ;;  %6082 = vmatpush1.bf16.msra.mxu1 %v8564_v42  ;;  %v8653_v51 = vld [vmem:[%s9017_s30 + $0x1344] ss:$16 sps:$4 sm:$0xff]   ;;  %v8656_v42 = vld [vmem:[%s9017_s30 + $0x134c] ss:$16 sps:$4 sm:$0xff]  }
 0x241   : > { %5550 = vmatprep.subr.bf16.mxu0 %v8569_v52  ;;  %6083 = vmatprep.subr.bf16.mxu1 %v8572_v53  ;;  %v8651_v52 = vld [vmem:[%s9017_s30 + $0x1340] ss:$16 sps:$4 sm:$0xff]   ;;  %v8654_v53 = vld [vmem:[%s9017_s30 + $0x1348] ss:$16 sps:$4 sm:$0xff]  }
 0x244   : > { %5551 = vmatpush1.bf16.msra.mxu0 %v8567_v55  ;;  %6084 = vmatpush1.bf16.msra.mxu1 %v8570_v43  ;;  %v8659_v55 = vld [vmem:[%s9017_s30 + $0x1364] ss:$16 sps:$4 sm:$0xff]   ;;  %v8662_v43 = vld [vmem:[%s9017_s30 + $0x136c] ss:$16 sps:$4 sm:$0xff]  }
 0x245   : > { %5552 = vmatprep.subr.bf16.mxu0 %v8575_v58  ;;  %6085 = vmatprep.subr.bf16.mxu1 %v8578_v59  ;;  %v8657_v58 = vld [vmem:[%s9017_s30 + $0x1360] ss:$16 sps:$4 sm:$0xff]   ;;  %v8660_v59 = vld [vmem:[%s9017_s30 + $0x1368] ss:$16 sps:$4 sm:$0xff]  }
 0x248   : > { %5553 = vmatpush1.bf16.msra.mxu0 %v8573_v61  ;;  %6086 = vmatpush1.bf16.msra.mxu1 %v8576_v62  ;;  %v8665_v61 = vld [vmem:[%s9017_s30 + $0x1384] ss:$16 sps:$4 sm:$0xff]   ;;  %v8668_v62 = vld [vmem:[%s9017_s30 + $0x138c] ss:$16 sps:$4 sm:$0xff]  }
 0x249   : > { %5554 = vmatprep.subr.bf16.mxu0 %v8581_v47  ;;  %6087 = vmatprep.subr.bf16.mxu1 %v8584_v63  ;;  %v8663_v47 = vld [vmem:[%s9017_s30 + $0x1380] ss:$16 sps:$4 sm:$0xff]   ;;  %v8666_v63 = vld [vmem:[%s9017_s30 + $0x1388] ss:$16 sps:$4 sm:$0xff]  }
 0x24c   : > { %5555 = vmatpush1.bf16.msra.mxu0 %v8579_v1  ;;  %6088 = vmatpush1.bf16.msra.mxu1 %v8582_v2  ;;  %v8671_v1 = vld [vmem:[%s9017_s30 + $0x13a4] ss:$16 sps:$4 sm:$0xff]   ;;  %v8674_v2 = vld [vmem:[%s9017_s30 + $0x13ac] ss:$16 sps:$4 sm:$0xff]  }
 0x24d   : > { %5556 = vmatprep.subr.bf16.mxu0 %v8587_v56  ;;  %6089 = vmatprep.subr.bf16.mxu1 %v8590_v4  ;;  %v8669_v56 = vld [vmem:[%s9017_s30 + $0x13a0] ss:$16 sps:$4 sm:$0xff]   ;;  %v8672_v4 = vld [vmem:[%s9017_s30 + $0x13a8] ss:$16 sps:$4 sm:$0xff]  }
 0x250   : > { %5557 = vmatpush1.bf16.msra.mxu0 %v8585_v7  ;;  %6090 = vmatpush1.bf16.msra.mxu1 %v8588_v9  ;;  %v8677_v7 = vld [vmem:[%s9017_s30 + $0x13c4] ss:$16 sps:$4 sm:$0xff]   ;;  %v8680_v9 = vld [vmem:[%s9017_s30 + $0x13cc] ss:$16 sps:$4 sm:$0xff]  }
 0x251   : > { %5567 = vmatprep.subr.bf16.mxu0 %v8593_v57  ;;  %6100 = vmatprep.subr.bf16.mxu1 %v8596_v11  ;;  %v1187_v57 = vcombine.high %v9614_v54, %v9614_v54  ;;  %v8675_v11 = vld [vmem:[%s9017_s30 + $0x13c0] ss:$16 sps:$4 sm:$0xff]  }
 0x252   : > { %v8681_v54 = vld [vmem:[%s9017_s30 + $0x13e0] ss:$16 sps:$4 sm:$0xff]  }
 0x253   : > { %5559 = vmatmul.mubr.bf16.vlgmr.msra.gmra.mrb[0].mxu0 %v9703_v12  ;;  %6092 = vmatmul.mubr.bf16.vlgmr.msra.gmra.mrb[0].mxu1 %v9703_v12 }
 0x254   : > { %5568 = vmatpush1.bf16.msra.mxu0 %v8591_v13  ;;  %6101 = vmatpush1.bf16.msra.mxu1 %v8594_v14  ;;  %v8678_v13 = vld [vmem:[%s9017_s30 + $0x13c8] ss:$16 sps:$4 sm:$0xff]   ;;  %v8683_v14 = vld [vmem:[%s9017_s30 + $0x13e4] ss:$16 sps:$4 sm:$0xff]  }
 0x255   : > { %5569 = vmatprep.subr.bf16.mxu0 %v8599_v15  ;;  %6102 = vmatprep.subr.bf16.mxu1 %v8602_v17  ;;  %v8686_v15 = vld [vmem:[%s9017_s30 + $0x13ec] ss:$16 sps:$4 sm:$0xff]   ;;  %v9772_v17 = vrot.slane %v1187_v57, %v9012_v6  ;;  %v8759_v57 = vld [vmem:[%s9017_s30 + $0x1580] ss:$16 sps:$4 sm:$0xff]  }
 0x256   : > { %5599 = vmatprep.mubr.bf16.mxu0 %v1234_v18  ;;  %6132 = vmatprep.mubr.bf16.mxu1 %v1234_v18  ;;  %v8684_v18 = vld [vmem:[%s9017_s30 + $0x13e8] ss:$16 sps:$4 sm:$0xff]  }
 0x258   : > { %5570 = vmatpush1.bf16.msra.mxu0 %v8597_v60  ;;  %6103 = vmatpush1.bf16.msra.mxu1 %v8600_v19  ;;  %v8689_v60 = vld [vmem:[%s9017_s30 + $0x1404] ss:$16 sps:$4 sm:$0xff]   ;;  %v8692_v19 = vld [vmem:[%s9017_s30 + $0x140c] ss:$16 sps:$4 sm:$0xff]  }
 0x259   : > { %5571 = vmatprep.subr.bf16.mxu0 %v8605_v21  ;;  %6104 = vmatprep.subr.bf16.mxu1 %v8608_v23  ;;  %v1203_v21 = vcombine.high %v9772_v17, %v9772_v17  ;;  %v1232_v23 = vcombine.high %v9703_v12, %v9703_v12  ;;  %v8693_v12 = vld [vmem:[%s9017_s30 + $0x1420] ss:$16 sps:$4 sm:$0xff]  }
 0x25c   : > { %5572 = vmatpush1.bf16.msra.mxu0 %v8603_v10  ;;  %6105 = vmatpush1.bf16.msra.mxu1 %v8606_v24  ;;  %v8687_v10 = vld [vmem:[%s9017_s30 + $0x1400] ss:$16 sps:$4 sm:$0xff]   ;;  %v8690_v24 = vld [vmem:[%s9017_s30 + $0x1408] ss:$16 sps:$4 sm:$0xff]  }
 0x25d   : > { %5573 = vmatprep.subr.bf16.mxu0 %v8611_v5  ;;  %6106 = vmatprep.subr.bf16.mxu1 %v8614_v8  ;;  %v8695_v5 = vld [vmem:[%s9017_s30 + $0x1424] ss:$16 sps:$4 sm:$0xff]   ;;  %v8698_v8 = vld [vmem:[%s9017_s30 + $0x142c] ss:$16 sps:$4 sm:$0xff]  }
 0x260   : > { %5574 = vmatpush1.bf16.msra.mxu0 %v8609_v25  ;;  %6107 = vmatpush1.bf16.msra.mxu1 %v8612_v26  ;;  %v9787_v25 = vrot.slane %v1203_v21, %v9012_v6  ;;  %v8696_v26 = vld [vmem:[%s9017_s30 + $0x1428] ss:$16 sps:$4 sm:$0xff]  }
 0x261   : > { %5575 = vmatprep.subr.bf16.mxu0 %v8617_v16  ;;  %6108 = vmatprep.subr.bf16.mxu1 %v8620_v27  ;;  %v8701_v16 = vld [vmem:[%s9017_s30 + $0x1444] ss:$16 sps:$4 sm:$0xff]   ;;  %v8704_v27 = vld [vmem:[%s9017_s30 + $0x144c] ss:$16 sps:$4 sm:$0xff]   ;;  %v8774_v21 = vld [vmem:[%s9017_s30 + $0x15c8] ss:$16 sps:$4 sm:$0xff]  }
 0x264   : > { %5576 = vmatpush1.bf16.msra.mxu0 %v8615_v28  ;;  %6109 = vmatpush1.bf16.msra.mxu1 %v8618_v31  ;;  %v8699_v28 = vld [vmem:[%s9017_s30 + $0x1440] ss:$16 sps:$4 sm:$0xff]   ;;  %v8702_v31 = vld [vmem:[%s9017_s30 + $0x1448] ss:$16 sps:$4 sm:$0xff]  }
 0x265   : > { %5577 = vmatprep.subr.bf16.mxu0 %v8623_v32  ;;  %6110 = vmatprep.subr.bf16.mxu1 %v8626_v20  ;;  %v8707_v32 = vld [vmem:[%s9017_s30 + $0x1464] ss:$16 sps:$4 sm:$0xff]   ;;  %v8710_v20 = vld [vmem:[%s9017_s30 + $0x146c] ss:$16 sps:$4 sm:$0xff]  }
 0x268   : > { %5578 = vmatpush1.bf16.msra.mxu0 %v8621_v34  ;;  %6111 = vmatpush1.bf16.msra.mxu1 %v8624_v35  ;;  %v8705_v34 = vld [vmem:[%s9017_s30 + $0x1460] ss:$16 sps:$4 sm:$0xff]   ;;  %v8708_v35 = vld [vmem:[%s9017_s30 + $0x1468] ss:$16 sps:$4 sm:$0xff]  }
 0x269   : > { %5579 = vmatprep.subr.bf16.mxu0 %v8629_v36  ;;  %6112 = vmatprep.subr.bf16.mxu1 %v8632_v37  ;;  %v8713_v36 = vld [vmem:[%s9017_s30 + $0x1484] ss:$16 sps:$4 sm:$0xff]   ;;  %v8716_v37 = vld [vmem:[%s9017_s30 + $0x148c] ss:$16 sps:$4 sm:$0xff]  }
 0x26c   : > { %5580 = vmatpush1.bf16.msra.mxu0 %v8627_v22  ;;  %6113 = vmatpush1.bf16.msra.mxu1 %v8630_v38  ;;  %v8711_v22 = vld [vmem:[%s9017_s30 + $0x1480] ss:$16 sps:$4 sm:$0xff]   ;;  %v8714_v38 = vld [vmem:[%s9017_s30 + $0x1488] ss:$16 sps:$4 sm:$0xff]  }
 0x26d   : > { %5581 = vmatprep.subr.bf16.mxu0 %v8635_v39  ;;  %6114 = vmatprep.subr.bf16.mxu1 %v8638_v30  ;;  %v8719_v39 = vld [vmem:[%s9017_s30 + $0x14a4] ss:$16 sps:$4 sm:$0xff]   ;;  %v8722_v30 = vld [vmem:[%s9017_s30 + $0x14ac] ss:$16 sps:$4 sm:$0xff]  }
 0x270   : > { %5582 = vmatpush1.bf16.msra.mxu0 %v8633_v40  ;;  %6115 = vmatpush1.bf16.msra.mxu1 %v8636_v41  ;;  %v8717_v40 = vld [vmem:[%s9017_s30 + $0x14a0] ss:$16 sps:$4 sm:$0xff]   ;;  %v8720_v41 = vld [vmem:[%s9017_s30 + $0x14a8] ss:$16 sps:$4 sm:$0xff]  }
 0x271   : > { %5583 = vmatprep.subr.bf16.mxu0 %v8641_v33  ;;  %6116 = vmatprep.subr.bf16.mxu1 %v8644_v44  ;;  %v8725_v33 = vld [vmem:[%s9017_s30 + $0x14c4] ss:$16 sps:$4 sm:$0xff]   ;;  %v8728_v44 = vld [vmem:[%s9017_s30 + $0x14cc] ss:$16 sps:$4 sm:$0xff]  }
 0x274   : > { %5584 = vmatpush1.bf16.msra.mxu0 %v8639_v45  ;;  %6117 = vmatpush1.bf16.msra.mxu1 %v8642_v46  ;;  %v8723_v45 = vld [vmem:[%s9017_s30 + $0x14c0] ss:$16 sps:$4 sm:$0xff]   ;;  %v8726_v46 = vld [vmem:[%s9017_s30 + $0x14c8] ss:$16 sps:$4 sm:$0xff]  }
 0x275   : > { %5585 = vmatprep.subr.bf16.mxu0 %v8647_v48  ;;  %6118 = vmatprep.subr.bf16.mxu1 %v8650_v29  ;;  %v8731_v48 = vld [vmem:[%s9017_s30 + $0x14e4] ss:$16 sps:$4 sm:$0xff]   ;;  %v8734_v29 = vld [vmem:[%s9017_s30 + $0x14ec] ss:$16 sps:$4 sm:$0xff]  }
 0x278   : > { %5586 = vmatpush1.bf16.msra.mxu0 %v8645_v49  ;;  %6119 = vmatpush1.bf16.msra.mxu1 %v8648_v50  ;;  %v8729_v49 = vld [vmem:[%s9017_s30 + $0x14e0] ss:$16 sps:$4 sm:$0xff]   ;;  %v8732_v50 = vld [vmem:[%s9017_s30 + $0x14e8] ss:$16 sps:$4 sm:$0xff]  }
 0x279   : > { %5587 = vmatprep.subr.bf16.mxu0 %v8653_v51  ;;  %6120 = vmatprep.subr.bf16.mxu1 %v8656_v42  ;;  %v8737_v51 = vld [vmem:[%s9017_s30 + $0x1504] ss:$16 sps:$4 sm:$0xff]   ;;  %v8740_v42 = vld [vmem:[%s9017_s30 + $0x150c] ss:$16 sps:$4 sm:$0xff]  }
 0x27c   : > { %5588 = vmatpush1.bf16.msra.mxu0 %v8651_v52  ;;  %6121 = vmatpush1.bf16.msra.mxu1 %v8654_v53  ;;  %v8735_v52 = vld [vmem:[%s9017_s30 + $0x1500] ss:$16 sps:$4 sm:$0xff]   ;;  %v8738_v53 = vld [vmem:[%s9017_s30 + $0x1508] ss:$16 sps:$4 sm:$0xff]  }
 0x27d   : > { %5589 = vmatprep.subr.bf16.mxu0 %v8659_v55  ;;  %6122 = vmatprep.subr.bf16.mxu1 %v8662_v43  ;;  %v8743_v55 = vld [vmem:[%s9017_s30 + $0x1524] ss:$16 sps:$4 sm:$0xff]   ;;  %v8746_v43 = vld [vmem:[%s9017_s30 + $0x152c] ss:$16 sps:$4 sm:$0xff]  }
 0x280   : > { %5590 = vmatpush1.bf16.msra.mxu0 %v8657_v58  ;;  %6123 = vmatpush1.bf16.msra.mxu1 %v8660_v59  ;;  %v8741_v58 = vld [vmem:[%s9017_s30 + $0x1520] ss:$16 sps:$4 sm:$0xff]   ;;  %v8744_v59 = vld [vmem:[%s9017_s30 + $0x1528] ss:$16 sps:$4 sm:$0xff]  }
 0x281   : > { %5591 = vmatprep.subr.bf16.mxu0 %v8665_v61  ;;  %6124 = vmatprep.subr.bf16.mxu1 %v8668_v62  ;;  %v8749_v61 = vld [vmem:[%s9017_s30 + $0x1544] ss:$16 sps:$4 sm:$0xff]   ;;  %v8752_v62 = vld [vmem:[%s9017_s30 + $0x154c] ss:$16 sps:$4 sm:$0xff]  }
 0x284   : > { %5592 = vmatpush1.bf16.msra.mxu0 %v8663_v47  ;;  %6125 = vmatpush1.bf16.msra.mxu1 %v8666_v63  ;;  %v8747_v47 = vld [vmem:[%s9017_s30 + $0x1540] ss:$16 sps:$4 sm:$0xff]   ;;  %v8750_v63 = vld [vmem:[%s9017_s30 + $0x1548] ss:$16 sps:$4 sm:$0xff]  }
 0x285   : > { %5593 = vmatprep.subr.bf16.mxu0 %v8671_v1  ;;  %6126 = vmatprep.subr.bf16.mxu1 %v8674_v2  ;;  %v8755_v1 = vld [vmem:[%s9017_s30 + $0x1564] ss:$16 sps:$4 sm:$0xff]   ;;  %v8758_v2 = vld [vmem:[%s9017_s30 + $0x156c] ss:$16 sps:$4 sm:$0xff]  }
 0x288   : > { %5594 = vmatpush1.bf16.msra.mxu0 %v8669_v56  ;;  %6127 = vmatpush1.bf16.msra.mxu1 %v8672_v4  ;;  %v8753_v56 = vld [vmem:[%s9017_s30 + $0x1560] ss:$16 sps:$4 sm:$0xff]   ;;  %v8756_v4 = vld [vmem:[%s9017_s30 + $0x1568] ss:$16 sps:$4 sm:$0xff]  }
 0x289   : > { %5595 = vmatprep.subr.bf16.mxu0 %v8677_v7  ;;  %6128 = vmatprep.subr.bf16.mxu1 %v8680_v9  ;;  %v8761_v7 = vld [vmem:[%s9017_s30 + $0x1584] ss:$16 sps:$4 sm:$0xff]   ;;  %v8764_v9 = vld [vmem:[%s9017_s30 + $0x158c] ss:$16 sps:$4 sm:$0xff]  }
 0x28c   : > { %5596 = vmatpush1.bf16.msra.mxu0 %v8675_v11  ;;  %6129 = vmatpush1.bf16.msra.mxu1 %v8678_v13  ;;  %v8762_v11 = vld [vmem:[%s9017_s30 + $0x1588] ss:$16 sps:$4 sm:$0xff]   ;;  %v8767_v13 = vld [vmem:[%s9017_s30 + $0x15a4] ss:$16 sps:$4 sm:$0xff]  }
 0x28d   : > { %5597 = vmatprep.subr.bf16.mxu0 %v8683_v14  ;;  %6130 = vmatprep.subr.bf16.mxu1 %v8686_v15  ;;  %v8770_v14 = vld [vmem:[%s9017_s30 + $0x15ac] ss:$16 sps:$4 sm:$0xff]   ;;  %v8765_v15 = vld [vmem:[%s9017_s30 + $0x15a0] ss:$16 sps:$4 sm:$0xff]  }
 0x290   : > { %5598 = vmatpush1.bf16.msra.mxu0 %v8681_v54  ;;  %6131 = vmatpush1.bf16.msra.mxu1 %v8684_v18  ;;  %v8768_v54 = vld [vmem:[%s9017_s30 + $0x15a8] ss:$16 sps:$4 sm:$0xff]   ;;  %v8773_v18 = vld [vmem:[%s9017_s30 + $0x15c4] ss:$16 sps:$4 sm:$0xff]  }
 0x291   : > { %5608 = vmatprep.subr.bf16.mxu0 %v8689_v60  ;;  %6141 = vmatprep.subr.bf16.mxu1 %v8692_v19  ;;  %v8776_v60 = vld [vmem:[%s9017_s30 + $0x15cc] ss:$16 sps:$4 sm:$0xff]   ;;  %v8771_v19 = vld [vmem:[%s9017_s30 + $0x15c0] ss:$16 sps:$4 sm:$0xff]  }
 0x293   : > { %5600 = vmatmul.mubr.bf16.vlgmr.msra.gmra.mrb[0].mxu0 %v1232_v23  ;;  %6133 = vmatmul.mubr.bf16.vlgmr.msra.gmra.mrb[0].mxu1 %v1232_v23  ;;  %v8779_v23 = vld [vmem:[%s9017_s30 + $0x15e4] ss:$16 sps:$4 sm:$0xff]  }
 0x294   : > { %5609 = vmatpush1.bf16.msra.mxu0 %v8687_v10  ;;  %6142 = vmatpush1.bf16.msra.mxu1 %v8690_v24  ;;  %v8782_v10 = vld [vmem:[%s9017_s30 + $0x15ec] ss:$16 sps:$4 sm:$0xff]   ;;  %v8777_v24 = vld [vmem:[%s9017_s30 + $0x15e0] ss:$16 sps:$4 sm:$0xff]  }
 0x295   : > { %5610 = vmatprep.subr.bf16.mxu0 %v8695_v5  ;;  %6143 = vmatprep.subr.bf16.mxu1 %v8698_v8  ;;  %v8780_v5 = vld [vmem:[%s9017_s30 + $0x15e8] ss:$16 sps:$4 sm:$0xff]   ;;  %v8786_v8 = vld [vmem:[%s9017_s30 + $0x1604] ss:$16 sps:$4 sm:$0xff]  }
 0x296   : > { %5640 = vmatprep.mubr.bf16.mxu0 %v9787_v25  ;;  %6173 = vmatprep.mubr.bf16.mxu1 %v9787_v25 }
 0x298   : > { %5611 = vmatpush1.bf16.msra.mxu0 %v8693_v12  ;;  %6144 = vmatpush1.bf16.msra.mxu1 %v8696_v26  ;;  %v8789_v12 = vld [vmem:[%s9017_s30 + $0x160c] ss:$16 sps:$4 sm:$0xff]   ;;  %v9859_v26 = vrot.slane %v9772_v17, %v9012_v6  ;;  %v8790_v17 = vld [vmem:[%s9017_s30 + $0x1620] ss:$16 sps:$4 sm:$0xff]  }
 0x299   : > { %5612 = vmatprep.subr.bf16.mxu0 %v8701_v16  ;;  %6145 = vmatprep.subr.bf16.mxu1 %v8704_v27  ;;  %v8784_v16 = vld [vmem:[%s9017_s30 + $0x1600] ss:$16 sps:$4 sm:$0xff]   ;;  %v8787_v27 = vld [vmem:[%s9017_s30 + $0x1608] ss:$16 sps:$4 sm:$0xff]  }
 0x29c   : > { %5613 = vmatpush1.bf16.msra.mxu0 %v8699_v28  ;;  %6146 = vmatpush1.bf16.msra.mxu1 %v8702_v31  ;;  %v8792_v28 = vld [vmem:[%s9017_s30 + $0x1624] ss:$16 sps:$4 sm:$0xff]   ;;  %v8795_v31 = vld [vmem:[%s9017_s30 + $0x162c] ss:$16 sps:$4 sm:$0xff]  }
 0x29d   : > { %5614 = vmatprep.subr.bf16.mxu0 %v8707_v32  ;;  %6147 = vmatprep.subr.bf16.mxu1 %v8710_v20  ;;  %v1235_v32 = vcombine.high %v9787_v25, %v9787_v25  ;;  %v8793_v20 = vld [vmem:[%s9017_s30 + $0x1628] ss:$16 sps:$4 sm:$0xff]   ;;  %v8796_v25 = vld [vmem:[%s9017_s30 + $0x1640] ss:$16 sps:$4 sm:$0xff]  }
 0x2a0   : > { %5615 = vmatpush1.bf16.msra.mxu0 %v8705_v34  ;;  %6148 = vmatpush1.bf16.msra.mxu1 %v8708_v35  ;;  %v8798_v34 = vld [vmem:[%s9017_s30 + $0x1644] ss:$16 sps:$4 sm:$0xff]   ;;  %v8801_v35 = vld [vmem:[%s9017_s30 + $0x164c] ss:$16 sps:$4 sm:$0xff]  }
 0x2a1   : > { %5616 = vmatprep.subr.bf16.mxu0 %v8713_v36  ;;  %6149 = vmatprep.subr.bf16.mxu1 %v8716_v37  ;;  %v8799_v36 = vld [vmem:[%s9017_s30 + $0x1648] ss:$16 sps:$4 sm:$0xff]   ;;  %v8804_v37 = vld [vmem:[%s9017_s30 + $0x1664] ss:$16 sps:$4 sm:$0xff]  }
 0x2a4   : > { %5617 = vmatpush1.bf16.msra.mxu0 %v8711_v22  ;;  %6150 = vmatpush1.bf16.msra.mxu1 %v8714_v38  ;;  %v8807_v22 = vld [vmem:[%s9017_s30 + $0x166c] ss:$16 sps:$4 sm:$0xff]   ;;  %v8802_v38 = vld [vmem:[%s9017_s30 + $0x1660] ss:$16 sps:$4 sm:$0xff]  }
 0x2a5   : > { %5618 = vmatprep.subr.bf16.mxu0 %v8719_v39  ;;  %6151 = vmatprep.subr.bf16.mxu1 %v8722_v30  ;;  %v8805_v39 = vld [vmem:[%s9017_s30 + $0x1668] ss:$16 sps:$4 sm:$0xff]   ;;  %v8810_v30 = vld [vmem:[%s9017_s30 + $0x1684] ss:$16 sps:$4 sm:$0xff]  }
 0x2a8   : > { %5619 = vmatpush1.bf16.msra.mxu0 %v8717_v40  ;;  %6152 = vmatpush1.bf16.msra.mxu1 %v8720_v41  ;;  %v8813_v40 = vld [vmem:[%s9017_s30 + $0x168c] ss:$16 sps:$4 sm:$0xff]   ;;  %v8808_v41 = vld [vmem:[%s9017_s30 + $0x1680] ss:$16 sps:$4 sm:$0xff]  }
 0x2a9   : > { %5620 = vmatprep.subr.bf16.mxu0 %v8725_v33  ;;  %6153 = vmatprep.subr.bf16.mxu1 %v8728_v44  ;;  %v8811_v33 = vld [vmem:[%s9017_s30 + $0x1688] ss:$16 sps:$4 sm:$0xff]   ;;  %v8816_v44 = vld [vmem:[%s9017_s30 + $0x16a4] ss:$16 sps:$4 sm:$0xff]  }
 0x2ac   : > { %5621 = vmatpush1.bf16.msra.mxu0 %v8723_v45  ;;  %6154 = vmatpush1.bf16.msra.mxu1 %v8726_v46  ;;  %v8819_v45 = vld [vmem:[%s9017_s30 + $0x16ac] ss:$16 sps:$4 sm:$0xff]   ;;  %v8814_v46 = vld [vmem:[%s9017_s30 + $0x16a0] ss:$16 sps:$4 sm:$0xff]  }
 0x2ad   : > { %5622 = vmatprep.subr.bf16.mxu0 %v8731_v48  ;;  %6155 = vmatprep.subr.bf16.mxu1 %v8734_v29  ;;  %v8817_v48 = vld [vmem:[%s9017_s30 + $0x16a8] ss:$16 sps:$4 sm:$0xff]   ;;  %v8822_v29 = vld [vmem:[%s9017_s30 + $0x16c4] ss:$16 sps:$4 sm:$0xff]  }
 0x2b0   : > { %5623 = vmatpush1.bf16.msra.mxu0 %v8729_v49  ;;  %6156 = vmatpush1.bf16.msra.mxu1 %v8732_v50  ;;  %v8825_v49 = vld [vmem:[%s9017_s30 + $0x16cc] ss:$16 sps:$4 sm:$0xff]   ;;  %v8820_v50 = vld [vmem:[%s9017_s30 + $0x16c0] ss:$16 sps:$4 sm:$0xff]  }
 0x2b1   : > { %5624 = vmatprep.subr.bf16.mxu0 %v8737_v51  ;;  %6157 = vmatprep.subr.bf16.mxu1 %v8740_v42  ;;  %v8823_v51 = vld [vmem:[%s9017_s30 + $0x16c8] ss:$16 sps:$4 sm:$0xff]   ;;  %v8828_v42 = vld [vmem:[%s9017_s30 + $0x16e4] ss:$16 sps:$4 sm:$0xff]  }
 0x2b4   : > { %5625 = vmatpush1.bf16.msra.mxu0 %v8735_v52  ;;  %6158 = vmatpush1.bf16.msra.mxu1 %v8738_v53  ;;  %v8831_v52 = vld [vmem:[%s9017_s30 + $0x16ec] ss:$16 sps:$4 sm:$0xff]   ;;  %v8826_v53 = vld [vmem:[%s9017_s30 + $0x16e0] ss:$16 sps:$4 sm:$0xff]  }
 0x2b5   : > { %5626 = vmatprep.subr.bf16.mxu0 %v8743_v55  ;;  %6159 = vmatprep.subr.bf16.mxu1 %v8746_v43  ;;  %v8829_v55 = vld [vmem:[%s9017_s30 + $0x16e8] ss:$16 sps:$4 sm:$0xff]   ;;  %v8834_v43 = vld [vmem:[%s9017_s30 + $0x1704] ss:$16 sps:$4 sm:$0xff]  }
 0x2b8   : > { %5627 = vmatpush1.bf16.msra.mxu0 %v8741_v58  ;;  %6160 = vmatpush1.bf16.msra.mxu1 %v8744_v59  ;;  %v8837_v58 = vld [vmem:[%s9017_s30 + $0x170c] ss:$16 sps:$4 sm:$0xff]   ;;  %v8832_v59 = vld [vmem:[%s9017_s30 + $0x1700] ss:$16 sps:$4 sm:$0xff]  }
 0x2b9   : > { %5628 = vmatprep.subr.bf16.mxu0 %v8749_v61  ;;  %6161 = vmatprep.subr.bf16.mxu1 %v8752_v62  ;;  %v8835_v61 = vld [vmem:[%s9017_s30 + $0x1708] ss:$16 sps:$4 sm:$0xff]   ;;  %v8840_v62 = vld [vmem:[%s9017_s30 + $0x1724] ss:$16 sps:$4 sm:$0xff]  }
 0x2bc   : > { %5629 = vmatpush1.bf16.msra.mxu0 %v8747_v47  ;;  %6162 = vmatpush1.bf16.msra.mxu1 %v8750_v63  ;;  %v8843_v47 = vld [vmem:[%s9017_s30 + $0x172c] ss:$16 sps:$4 sm:$0xff]   ;;  %v8838_v63 = vld [vmem:[%s9017_s30 + $0x1720] ss:$16 sps:$4 sm:$0xff]  }
 0x2bd   : > { %5630 = vmatprep.subr.bf16.mxu0 %v8755_v1  ;;  %6163 = vmatprep.subr.bf16.mxu1 %v8758_v2  ;;  %v8841_v1 = vld [vmem:[%s9017_s30 + $0x1728] ss:$16 sps:$4 sm:$0xff]   ;;  %v8846_v2 = vld [vmem:[%s9017_s30 + $0x1744] ss:$16 sps:$4 sm:$0xff]  }
 0x2c0   : > { %5631 = vmatpush1.bf16.msra.mxu0 %v8753_v56  ;;  %6164 = vmatpush1.bf16.msra.mxu1 %v8756_v4  ;;  %v8849_v56 = vld [vmem:[%s9017_s30 + $0x174c] ss:$16 sps:$4 sm:$0xff]   ;;  %v8844_v4 = vld [vmem:[%s9017_s30 + $0x1740] ss:$16 sps:$4 sm:$0xff]  }
 0x2c1   : > { %5632 = vmatprep.subr.bf16.mxu0 %v8761_v7  ;;  %6165 = vmatprep.subr.bf16.mxu1 %v8764_v9  ;;  %v8847_v7 = vld [vmem:[%s9017_s30 + $0x1748] ss:$16 sps:$4 sm:$0xff]   ;;  %v8852_v9 = vld [vmem:[%s9017_s30 + $0x1764] ss:$16 sps:$4 sm:$0xff]  }
 0x2c4   : > { %5633 = vmatpush1.bf16.msra.mxu0 %v8759_v57  ;;  %6166 = vmatpush1.bf16.msra.mxu1 %v8762_v11  ;;  %v8855_v57 = vld [vmem:[%s9017_s30 + $0x176c] ss:$16 sps:$4 sm:$0xff]   ;;  %v8850_v11 = vld [vmem:[%s9017_s30 + $0x1760] ss:$16 sps:$4 sm:$0xff]  }
 0x2c5   : > { %5634 = vmatprep.subr.bf16.mxu0 %v8767_v13  ;;  %6167 = vmatprep.subr.bf16.mxu1 %v8770_v14  ;;  %v8853_v13 = vld [vmem:[%s9017_s30 + $0x1768] ss:$16 sps:$4 sm:$0xff]   ;;  %v8858_v14 = vld [vmem:[%s9017_s30 + $0x1784] ss:$16 sps:$4 sm:$0xff]  }
 0x2c8   : > { %5635 = vmatpush1.bf16.msra.mxu0 %v8765_v15  ;;  %6168 = vmatpush1.bf16.msra.mxu1 %v8768_v54  ;;  %v8861_v15 = vld [vmem:[%s9017_s30 + $0x178c] ss:$16 sps:$4 sm:$0xff]   ;;  %v8856_v54 = vld [vmem:[%s9017_s30 + $0x1780] ss:$16 sps:$4 sm:$0xff]  }
 0x2c9   : > { %5636 = vmatprep.subr.bf16.mxu0 %v8773_v18  ;;  %6169 = vmatprep.subr.bf16.mxu1 %v8776_v60  ;;  %v8859_v18 = vld [vmem:[%s9017_s30 + $0x1788] ss:$16 sps:$4 sm:$0xff]   ;;  %v8864_v60 = vld [vmem:[%s9017_s30 + $0x17a4] ss:$16 sps:$4 sm:$0xff]  }
 0x2cc   : > { %5637 = vmatpush1.bf16.msra.mxu0 %v8771_v19  ;;  %6170 = vmatpush1.bf16.msra.mxu1 %v8774_v21  ;;  %v8867_v19 = vld [vmem:[%s9017_s30 + $0x17ac] ss:$16 sps:$4 sm:$0xff]   ;;  %v8862_v21 = vld [vmem:[%s9017_s30 + $0x17a0] ss:$16 sps:$4 sm:$0xff]  }
 0x2cd   : > { %5638 = vmatprep.subr.bf16.mxu0 %v8779_v23  ;;  %6171 = vmatprep.subr.bf16.mxu1 %v8782_v10  ;;  %v8865_v23 = vld [vmem:[%s9017_s30 + $0x17a8] ss:$16 sps:$4 sm:$0xff]   ;;  %v8870_v10 = vld [vmem:[%s9017_s30 + $0x17c4] ss:$16 sps:$4 sm:$0xff]  }
 0x2d0   : > { %5639 = vmatpush1.bf16.msra.mxu0 %v8777_v24  ;;  %6172 = vmatpush1.bf16.msra.mxu1 %v8780_v5  ;;  %v8873_v24 = vld [vmem:[%s9017_s30 + $0x17cc] ss:$16 sps:$4 sm:$0xff]   ;;  %v8868_v5 = vld [vmem:[%s9017_s30 + $0x17c0] ss:$16 sps:$4 sm:$0xff]  }
 0x2d1   : > { %5649 = vmatprep.subr.bf16.mxu0 %v8786_v8  ;;  %6182 = vmatprep.subr.bf16.mxu1 %v8789_v12  ;;  %v8871_v8 = vld [vmem:[%s9017_s30 + $0x17c8] ss:$16 sps:$4 sm:$0xff]   ;;  %v8876_v12 = vld [vmem:[%s9017_s30 + $0x17e4] ss:$16 sps:$4 sm:$0xff]  }
 0x2d3   : > { %5641 = vmatmul.mubr.bf16.vlgmr.msra.gmra.mrb[0].mxu0 %v9859_v26  ;;  %6174 = vmatmul.mubr.bf16.vlgmr.msra.gmra.mrb[0].mxu1 %v9859_v26 }
 0x2d4   : > { %5650 = vmatpush1.bf16.msra.mxu0 %v8784_v16  ;;  %6183 = vmatpush1.bf16.msra.mxu1 %v8787_v27  ;;  %v8879_v16 = vld [vmem:[%s9017_s30 + $0x17ec] ss:$16 sps:$4 sm:$0xff]   ;;  %v8874_v27 = vld [vmem:[%s9017_s30 + $0x17e0] ss:$16 sps:$4 sm:$0xff]  }
 0x2d5   : > { %5651 = vmatprep.subr.bf16.mxu0 %v8792_v28  ;;  %6184 = vmatprep.subr.bf16.mxu1 %v8795_v31  ;;  %v8877_v28 = vld [vmem:[%s9017_s30 + $0x17e8] ss:$16 sps:$4 sm:$0xff]   ;;  %v8882_v31 = vld [vmem:[%s9017_s30 + $0x1804] ss:$16 sps:$4 sm:$0xff]  }
 0x2d6   : > { %5681 = vmatprep.mubr.bf16.mxu0 %v1235_v32  ;;  %6214 = vmatprep.mubr.bf16.mxu1 %v1235_v32  ;;  %v8885_v32 = vld [vmem:[%s9017_s30 + $0x180c] ss:$16 sps:$4 sm:$0xff]  }
 0x2d8   : > { %5652 = vmatpush1.bf16.msra.mxu0 %v8790_v17  ;;  %6185 = vmatpush1.bf16.msra.mxu1 %v8793_v20  ;;  %v1233_v17 = vcombine.high %v9859_v26, %v9859_v26  ;;  %v8880_v20 = vld [vmem:[%s9017_s30 + $0x1800] ss:$16 sps:$4 sm:$0xff]   ;;  %v8889_v26 = vld [vmem:[%s9017_s30 + $0x1828] ss:$16 sps:$4 sm:$0xff]  }
 0x2d9   : > { %5653 = vmatprep.subr.bf16.mxu0 %v8798_v34  ;;  %6186 = vmatprep.subr.bf16.mxu1 %v8801_v35  ;;  %v8883_v34 = vld [vmem:[%s9017_s30 + $0x1808] ss:$16 sps:$4 sm:$0xff]   ;;  %v8888_v35 = vld [vmem:[%s9017_s30 + $0x1824] ss:$16 sps:$4 sm:$0xff]  }
 0x2dc   : > { %5654 = vmatpush1.bf16.msra.mxu0 %v8796_v25  ;;  %6187 = vmatpush1.bf16.msra.mxu1 %v8799_v36  ;;  %v8891_v25 = vld [vmem:[%s9017_s30 + $0x182c] ss:$16 sps:$4 sm:$0xff]   ;;  %v8886_v36 = vld [vmem:[%s9017_s30 + $0x1820] ss:$16 sps:$4 sm:$0xff]  }
 0x2dd   : > { %5655 = vmatprep.subr.bf16.mxu0 %v8804_v37  ;;  %6188 = vmatprep.subr.bf16.mxu1 %v8807_v22  ;;  %v8894_v37 = vld [vmem:[%s9017_s30 + $0x1844] ss:$16 sps:$4 sm:$0xff]   ;;  %v8897_v22 = vld [vmem:[%s9017_s30 + $0x184c] ss:$16 sps:$4 sm:$0xff]  }
 0x2e0   : > { %5656 = vmatpush1.bf16.msra.mxu0 %v8802_v38  ;;  %6189 = vmatpush1.bf16.msra.mxu1 %v8805_v39  ;;  %v8951_v38 = vmov 0   ;;  %v8892_v39 = vld [vmem:[%s9017_s30 + $0x1840] ss:$16 sps:$4 sm:$0xff]  }
 0x2e1   : > { %5657 = vmatprep.subr.bf16.mxu0 %v8810_v30  ;;  %6190 = vmatprep.subr.bf16.mxu1 %v8813_v40  ;;  %v8895_v30 = vld [vmem:[%s9017_s30 + $0x1848] ss:$16 sps:$4 sm:$0xff]   ;;  %v8900_v40 = vld [vmem:[%s9017_s30 + $0x1864] ss:$16 sps:$4 sm:$0xff]  }
 0x2e4   : > { %5658 = vmatpush1.bf16.msra.mxu0 %v8808_v41  ;;  %6191 = vmatpush1.bf16.msra.mxu1 %v8811_v33  ;;  %v8903_v41 = vld [vmem:[%s9017_s30 + $0x186c] ss:$16 sps:$4 sm:$0xff]   ;;  %v8898_v33 = vld [vmem:[%s9017_s30 + $0x1860] ss:$16 sps:$4 sm:$0xff]  }
 0x2e5   : > { %5659 = vmatprep.subr.bf16.mxu0 %v8816_v44  ;;  %6192 = vmatprep.subr.bf16.mxu1 %v8819_v45  ;;  %v8901_v44 = vld [vmem:[%s9017_s30 + $0x1868] ss:$16 sps:$4 sm:$0xff]  }
 0x2e6   : > { %v6745_v45 = vld.sshfl [vmem:[%s10001_s0 + $0x18] sm:$0x1 pattern:$0x75316420] }
 0x2e8   : > { %5660 = vmatpush1.bf16.msra.mxu0 %v8814_v46  ;;  %6193 = vmatpush1.bf16.msra.mxu1 %v8817_v48  ;;  %v8904_v46 = vld [vmem:[%s9814_s15 + $0x40] sm:$0xff]  }
 0x2e9   : > { %5661 = vmatprep.subr.bf16.mxu0 %v8822_v29  ;;  %6194 = vmatprep.subr.bf16.mxu1 %v8825_v49  ;;  %v8905_v48 = vld [vmem:[%s9814_s15 + $0xc0] sm:$0xff]   ;;  %v1249_v29 = vrot.slane %v6745_v45, %v9012_v6  ;;  %v8910_v6 = vld [vmem:[%s9814_s15 + $0x8] sm:$0xff]  }
 0x2ea   : > { %v8906_v49 = vld [vmem:[%s9814_s15] sm:$0xff]  }
 0x2ec   : > { %5662 = vmatpush1.bf16.msra.mxu0 %v8820_v50  ;;  %6195 = vmatpush1.bf16.msra.mxu1 %v8823_v51  ;;  %v8907_v50 = vld [vmem:[%s9814_s15 + $0x80] sm:$0xff]   ;;  %v8908_v51 = vld [vmem:[%s9814_s15 + $0x48] sm:$0xff]  }
 0x2ed   : > { %5663 = vmatprep.subr.bf16.mxu0 %v8828_v42  ;;  %6196 = vmatprep.subr.bf16.mxu1 %v8831_v52  ;;  %v8909_v42 = vld [vmem:[%s9814_s15 + $0xc8] sm:$0xff]  }
 0x2ee   : > { %v8911_v52 = vld [vmem:[%s9814_s15 + $0x88] sm:$0xff]  }
 0x2f0   : > { %5664 = vmatpush1.bf16.msra.mxu0 %v8826_v53  ;;  %6197 = vmatpush1.bf16.msra.mxu1 %v8829_v55  ;;  %v8912_v53 = vld [vmem:[%s9814_s15 + $0x50] sm:$0xff]  }
 0x2f1   : > { %5665 = vmatprep.subr.bf16.mxu0 %v8834_v43  ;;  %6198 = vmatprep.subr.bf16.mxu1 %v8837_v58  ;;  %v8913_v55 = vld [vmem:[%s9814_s15 + $0xd0] sm:$0xff]  }
 0x2f2   : > { %v8914_v43 = vld [vmem:[%s9814_s15 + $0x10] sm:$0xff]  }
 0x2f3   : > { %v8915_v58 = vld [vmem:[%s9814_s15 + $0x90] sm:$0xff]  }
 0x2f4   : > { %5666 = vmatpush1.bf16.msra.mxu0 %v8832_v59  ;;  %6199 = vmatpush1.bf16.msra.mxu1 %v8835_v61  ;;  %v8916_v59 = vld [vmem:[%s9814_s15 + $0x58] sm:$0xff]  }
 0x2f5   : > { %5667 = vmatprep.subr.bf16.mxu0 %v8840_v62  ;;  %6200 = vmatprep.subr.bf16.mxu1 %v8843_v47  ;;  %v8917_v61 = vld [vmem:[%s9814_s15 + $0xd8] sm:$0xff]  }
 0x2f6   : > { %v8918_v62 = vld [vmem:[%s9814_s15 + $0x18] sm:$0xff]  }
 0x2f7   : > { %v8919_v47 = vld [vmem:[%s9814_s15 + $0x98] sm:$0xff]  }
 0x2f8   : > { %5668 = vmatpush1.bf16.msra.mxu0 %v8838_v63  ;;  %6201 = vmatpush1.bf16.msra.mxu1 %v8841_v1  ;;  %v8920_v63 = vld [vmem:[%s9814_s15 + $0x60] sm:$0xff]  }
 0x2f9   : > { %5669 = vmatprep.subr.bf16.mxu0 %v8846_v2  ;;  %6202 = vmatprep.subr.bf16.mxu1 %v8849_v56  ;;  %v8921_v1 = vld [vmem:[%s9814_s15 + $0xe0] sm:$0xff]  }
 0x2fa   : > { %v8922_v2 = vld [vmem:[%s9814_s15 + $0x20] sm:$0xff]  }
 0x2fb   : > { %v8923_v56 = vld [vmem:[%s9814_s15 + $0xa0] sm:$0xff]  }
 0x2fc   : > { %5670 = vmatpush1.bf16.msra.mxu0 %v8844_v4  ;;  %6203 = vmatpush1.bf16.msra.mxu1 %v8847_v7  ;;  %v8924_v4 = vld [vmem:[%s9814_s15 + $0x68] sm:$0xff]  }
 0x2fd   : > { %5671 = vmatprep.subr.bf16.mxu0 %v8852_v9  ;;  %6204 = vmatprep.subr.bf16.mxu1 %v8855_v57  ;;  %v8925_v7 = vld [vmem:[%s9814_s15 + $0xe8] sm:$0xff]  }
 0x2fe   : > { %v8926_v9 = vld [vmem:[%s9814_s15 + $0x28] sm:$0xff]  }
 0x2ff   : > { %v8927_v57 = vld [vmem:[%s9814_s15 + $0xa8] sm:$0xff]  }
 0x300   : > { %5672 = vmatpush1.bf16.msra.mxu0 %v8850_v11  ;;  %6205 = vmatpush1.bf16.msra.mxu1 %v8853_v13  ;;  %v8928_v11 = vld [vmem:[%s9814_s15 + $0x70] sm:$0xff]  }
 0x301   : > { %5673 = vmatprep.subr.bf16.mxu0 %v8858_v14  ;;  %6206 = vmatprep.subr.bf16.mxu1 %v8861_v15  ;;  %v8929_v13 = vld [vmem:[%s9814_s15 + $0xf0] sm:$0xff]  }
 0x302   : > { %v8930_v14 = vld [vmem:[%s9814_s15 + $0x30] sm:$0xff]  }
 0x303   : > { %v8931_v15 = vld [vmem:[%s9814_s15 + $0xb0] sm:$0xff]  }
 0x304   : > { %5674 = vmatpush1.bf16.msra.mxu0 %v8856_v54  ;;  %6207 = vmatpush1.bf16.msra.mxu1 %v8859_v18  ;;  %v8932_v54 = vld [vmem:[%s9814_s15 + $0x78] sm:$0xff]  }
 0x305   : > { %5675 = vmatprep.subr.bf16.mxu0 %v8864_v60  ;;  %6208 = vmatprep.subr.bf16.mxu1 %v8867_v19  ;;  %v8933_v18 = vld [vmem:[%s9814_s15 + $0xf8] sm:$0xff]  }
 0x306   : > { %v8934_v60 = vld [vmem:[%s9814_s15 + $0x38] sm:$0xff]  }
 0x307   : > { %v8935_v19 = vld [vmem:[%s9814_s15 + $0xb8] sm:$0xff]  }
 0x308   : > { %5676 = vmatpush1.bf16.msra.mxu0 %v8862_v21  ;;  %6209 = vmatpush1.bf16.msra.mxu1 %v8865_v23  ;;  %v1067_v21 = vsub.s32 0, %v8997_v3  ;;  %v1075_v23 = vsub.s32 2, %v8997_v3 }
 0x309   : > { %5677 = vmatprep.subr.bf16.mxu0 %v8870_v10  ;;  %6210 = vmatprep.subr.bf16.mxu1 %v8873_v24  ;;  %v1063_v10 = vld [vmem:[%s261_s24] sm:$0xf]  ;;  %v1071_v24 = vsub.s32 1, %v8997_v3 }
 0x30c   : > { %5678 = vmatpush1.bf16.msra.mxu0 %v8868_v5  ;;  %6211 = vmatpush1.bf16.msra.mxu1 %v8871_v8  ;;  %v1079_v5 = vsub.s32 3, %v8997_v3  ;;  %v1068_v8 = vrot.slane %v1063_v10, %v1067_v21 }
 0x30d   : > { %5679 = vmatprep.subr.bf16.mxu0 %v8876_v12  ;;  %6212 = vmatprep.subr.bf16.mxu1 %v8879_v16  ;;  %v1076_v12 = vrot.slane %v1063_v10, %v1075_v23  ;;  %v1072_v16 = vrot.slane %v1063_v10, %v1071_v24 }
 0x310   : > { %5680 = vmatpush1.bf16.msra.mxu0 %v8874_v27  ;;  %6213 = vmatpush1.bf16.msra.mxu1 %v8877_v28  ;;  %v1080_v27 = vrot.slane %v1063_v10, %v1079_v5 }
 0x311   : > { %5690 = vmatprep.subr.bf16.mxu0 %v8882_v31  ;;  %6223 = vmatprep.subr.bf16.mxu1 %v8885_v32 }
 0x313   : > { %5682 = vmatmul.mubr.bf16.vlgmr.msra.gmra.mrb[0].mxu0 %v1233_v17  ;;  %6215 = vmatmul.mubr.bf16.vlgmr.msra.gmra.mrb[0].mxu1 %v1233_v17 }
 0x314   : > { %5691 = vmatpush1.bf16.msra.mxu0 %v8880_v20  ;;  %6224 = vmatpush1.bf16.msra.mxu1 %v8883_v34 }
 0x315   : > { %5692 = vmatprep.subr.bf16.mxu0 %v8888_v35  ;;  %6225 = vmatprep.subr.bf16.mxu1 %v8891_v25 }
 0x316   : > { %5722 = vmatprep.mubr.bf16.mxu0 %v8951_v38  ;;  %6255 = vmatprep.mubr.bf16.mxu1 %v8951_v38 }
 0x318   : > { %5693 = vmatpush1.bf16.msra.mxu0 %v8886_v36  ;;  %6226 = vmatpush1.bf16.msra.mxu1 %v8889_v26 }
 0x319   : > { %5694 = vmatprep.subr.bf16.mxu0 %v8894_v37  ;;  %6227 = vmatprep.subr.bf16.mxu1 %v8897_v22 }
 0x31c   : > { %5695 = vmatpush1.bf16.msra.mxu0 %v8892_v39  ;;  %6228 = vmatpush1.bf16.msra.mxu1 %v8895_v30 }
 0x31d   : > { %5696 = vmatprep.subr.bf16.mxu0 %v8900_v40  ;;  %6229 = vmatprep.subr.bf16.mxu1 %v8903_v41 }
 0x320   : > { %5697 = vmatpush1.bf16.msra.mxu0 %v8898_v33  ;;  %6230 = vmatpush1.bf16.msra.mxu1 %v8901_v44 }
 0x321   : > { %7570 = vmatprep.subr.bf16.mxu0 %v8904_v46  ;;  %7592 = vmatprep.subr.bf16.mxu1 %v8905_v48 }
 0x323   : > { %7530 = vmatmul.mubr.msk.bf16.vlgmr.msra.gmra.mrb[0].mxu0 %vm5194_vm0, %v1249_v29  ;;  %7531 = vmatmul.mubr.msk.bf16.vlgmr.msra.gmra.mrb[0].mxu1 %vm5194_vm0, %v1249_v29 }
 0x324   : > { %7571 = vmatpush3.bf16.msra.mxu0 %v8906_v49  ;;  %7593 = vmatpush3.bf16.msra.mxu1 %v8907_v50 }
 0x325   : > { %7572 = vmatprep.subr.bf16.mxu0 %v8908_v51  ;;  %7594 = vmatprep.subr.bf16.mxu1 %v8909_v42  ;;  %v7532_v51 = vld [vmem:[%s269_s28] ss:$0 sm:$0xff] }
 0x328   : > { %7573 = vmatpush3.bf16.msra.mxu0 %v8910_v6  ;;  %7595 = vmatpush3.bf16.msra.mxu1 %v8911_v52 }
 0x329   : > { %7574 = vmatprep.subr.bf16.mxu0 %v8912_v53  ;;  %7596 = vmatprep.subr.bf16.mxu1 %v8913_v55 }
 0x32c   : > { %7575 = vmatpush3.bf16.msra.mxu0 %v8914_v43  ;;  %7597 = vmatpush3.bf16.msra.mxu1 %v8915_v58 }
 0x32d   : > { %7576 = vmatprep.subr.bf16.mxu0 %v8916_v59  ;;  %7598 = vmatprep.subr.bf16.mxu1 %v8917_v61 }
 0x330   : > { %7577 = vmatpush3.bf16.msra.mxu0 %v8918_v62  ;;  %7599 = vmatpush3.bf16.msra.mxu1 %v8919_v47  ;;  %v6628_v47 = vand.u32 (!%p7565_p4), 127, %v1065_v0 }
 0x331   : > { %7578 = vmatprep.subr.bf16.mxu0 %v8920_v63  ;;  %7600 = vmatprep.subr.bf16.mxu1 %v8921_v1 }
 0x332   : > { %vm6629_vm6 = vcmp.lt.s32.totalorder (!%p7565_p4), %v6628_v47, 6 }
 0x334   : > { %7579 = vmatpush3.bf16.msra.mxu0 %v8922_v2  ;;  %7601 = vmatpush3.bf16.msra.mxu1 %v8923_v56 }
 0x335   : > { %7580 = vmatprep.subr.bf16.mxu0 %v8924_v4  ;;  %7602 = vmatprep.subr.bf16.mxu1 %v8925_v7 }
 0x338   : > { %7581 = vmatpush3.bf16.msra.mxu0 %v8926_v9  ;;  %7603 = vmatpush3.bf16.msra.mxu1 %v8927_v57 }
 0x339   : > { %7582 = vmatprep.subr.bf16.mxu0 %v8928_v11  ;;  %7604 = vmatprep.subr.bf16.mxu1 %v8929_v13 }
 0x33c   : > { %7583 = vmatpush3.bf16.msra.mxu0 %v8930_v14  ;;  %7605 = vmatpush3.bf16.msra.mxu1 %v8931_v15 }
 0x33d   : > { %7584 = vmatprep.subr.bf16.mxu0 %v8932_v54  ;;  %7606 = vmatprep.subr.bf16.mxu1 %v8933_v18 }
 0x340   : > { %7585 = vmatpush3.bf16.msra.mxu0 %v8934_v60  ;;  %7607 = vmatpush3.bf16.msra.mxu1 %v8935_v19 }
 0x3f6   : > { %v5724_v28 = vpop.f32.mrb[0].mxu0  ;;  %v6257_v31 = vpop.f32.mrb[0].mxu1 }
 0x3f7   : > { %v7614_v32 = vadd.f32 %v5724_v28, %v1068_v8  ;;  %v7616_v17 = vadd.f32 %v6257_v31, %v1076_v12  ;;  %v5726_v20 = vpop.f32.mrb[1].mxu0  ;;  %v6259_v34 = vpop.f32.mrb[1].mxu1 }
 0x3f8   : > { %v7615_v35 = vadd.f32 %v5726_v20, %v1072_v16  ;;  %v7617_v25 = vadd.f32 %v6259_v34, %v1080_v27  ;;  %v5728_v36 = vpop.f32.mrb[2].mxu0  ;;  %v6261_v26 = vpop.f32.mrb[2].mxu1 }
 0x3f9   : > { %vm6264_vm1 = vcmp.ge.f32.partialorder %v7614_v32, 0.0  ;;  %v6268_v37 = vmul.f32 0.01, %v7614_v32  ;;  %vm6266_vm2 = vcmp.ge.f32.partialorder %v7616_v17, 0.0  ;;  %v6270_v22 = vmul.f32 0.01, %v7616_v17 }
 0x3fa   : > { %vm6265_vm3 = vcmp.ge.f32.partialorder %v7615_v35, 0.0  ;;  %v6269_v3 = vmul.f32 0.01, %v7615_v35  ;;  %vm6267_vm4 = vcmp.ge.f32.partialorder %v7617_v25, 0.0  ;;  %v6271_v38 = vmul.f32 0.01, %v7617_v25 }
 0x3fb   : > { %v6272_v39 = vsel %vm6264_vm1, %v7614_v32, %v6268_v37  ;;  %v6274_v30 = vsel %vm6266_vm2, %v7616_v17, %v6270_v22  ;;  %v5729_v40 = vpop.f32.mrb[3].mxu0  ;;  %v6262_v41 = vpop.f32.mrb[3].mxu1 }
 0x3fc   : > { %v6273_v33 = vsel %vm6265_vm3, %v7615_v35, %v6269_v3  ;;  %v6275_v44 = vsel %vm6267_vm4, %v7617_v25, %v6271_v38  ;;  %v6276_v48 = vpack.c.bf16 %v6272_v39, %v6272_v39  ;;  %v6278_v29 = vpack.c.bf16 %v6274_v30, %v6274_v30 }
 0x3fd   : > { %v6277_v45 = vpack.c.bf16 %v6273_v33, %v6273_v33  ;;  %v6279_v46 = vpack.c.bf16 %v6275_v44, %v6275_v44 }
 0x3ff   : > { %6575 = vmatprep.mubr.bf16.mxu0 %v6277_v45  ;;  %6615 = vmatprep.mubr.bf16.mxu1 %v6279_v46 }
 0x400   : > { %6576 = vmatmul.mubr.bf16.vlgmr.msra.gmra.mrb[4].mxu0 %v6276_v48  ;;  %6616 = vmatmul.mubr.bf16.vlgmr.msra.gmra.mrb[4].mxu1 %v6278_v29 }
 0x4d3   : > { %v7586_v49 = vpop.f32.mrb[4].mxu0  ;;  %v7608_v50 = vpop.f32.mrb[4].mxu1  ;;  %6626 = sbr.rel (%p7565_p4) target bundleno = 1559 (0x617), region = 44 }
 0x4d4   : > { %v7587_v42 = vpop.f32.mrb[5].mxu0  ;;  %v7609_v6 = vpop.f32.mrb[5].mxu1 }
 0x4d5   : > { %v7588_v52 = vadd.f32 %v7587_v42, %v7586_v49  ;;  %v7610_v53 = vadd.f32 %v7609_v6, %v7608_v50  ;;  %v7589_v55 = vpop.f32.mrb[6].mxu0  ;;  %v7611_v43 = vpop.f32.mrb[6].mxu1 }
 0x4d6   : > { %v7590_v58 = vpop.f32.mrb[7].mxu0  ;;  %v7612_v59 = vpop.f32.mrb[7].mxu1 }
 0x4d7   : > { %v6578_v61 = vadd.f32 %v7588_v52, %v7532_v51 }
 0x4d9   : > { %v6618_v62 = vadd.f32 %v7610_v53, %v6578_v61 }
 0x4db   : > { %v6630_v63 = vsel %vm6629_vm6, %v6618_v62, -inf }
 0x4dc   : > { %v6632_v1 = vsel %vm6631_vm5, %v6630_v63, -inf }
 0x4dd   : > { %6633 = vmax.xlane.f32.xlu0 %v6632_v1 }
 0x56a   : > { %v6634_v2 = vpop.xlane.xlu0 %6633 }
 0x56b   : > { %v6635_v56 = vsub.f32 %v6630_v63, %v6634_v2 }
 0x56d   : > { %v6636_v4 = vmul.f32 1.442695, %v6635_v56 }
 0x56f   : > { %8937 = vpow2.f32 %v6636_v4 }
 0x579   : > { %v8938_v7 = vpop.eup %8937 }
 0x57a   : > { %v6638_v9 = vsel %vm6631_vm5, %v8938_v7, 0.0 }
 0x57b   : > { %6639 = vadd.xlane.f32.xlu0 %v6638_v9 }
 0x608   : > { %v6640_v57 = vpop.xlane.xlu0 %6639 }
 0x609   : > { %8939 = vrcp.f32 %v6640_v57 }
 0x613   : > { %v8940_v11 = vpop.eup %8939 }
 0x614   : > { %v6642_v13 = vmul.f32 %v8940_v11, %v8938_v7 }
 0x616   : > { %6643 = vst [vmem:[%s9009_s27] sm:$0x3] %v6642_v13 }
 0x617 PF: > { %p7566_p5 = scmp.eq.s32.totalorder %s8988_s19, 0 }
 0x618   : > { %6648 = vst [vmem:[%s9009_s27] sm:$0x3] (!%p7566_p5), %v6618_v62 }
 0x619   : > { %6647 = sbr.rel (%p7566_p5) target bundleno = 1568 (0x620), region = 48 }
 0x620 PF: > { %s15_s18 = sadd.s32 1, %s8948_s18  }
 0x621   : > { %p12_p6 = scmp.ge.s32.totalorder %s15_s18, 4  }
 0x623   :  { %14 = sbr.rel (!%p12_p6) target bundleno = 1 (0x1), region = 87 }

</bundles_post_ra>
